<compile_context>
chip_gen: v5e
topology: v5e:2x2
jax: 0.10.0
libtpu: 0.0.40
codegen_flags: <defaults>
</compile_context>

<pallas_src>
import jax
import jax.numpy as jnp
from jax.experimental import pallas as pl
from jax.experimental.pallas import tpu as pltpu

K_IN = 5000      # layer-1 input features
N1 = 1000        # layer-1 output features
K_PAD = 5120     # K padded to a multiple of the K tile (and of 128)
N1_PAD = 1024    # N1 padded to a lane-dense multiple of 128
TK = 1280        # K tile -> 4 grid steps (good DMA overlap, ~10.5 MiB dbl-buf)


def _fused_mlp_kernel(x_ref, w1_ref, b1_ref, w2_ref, b2_ref, w3_ref, b3_ref,
                      w4_ref, b4_ref, o_ref, acc_ref):
    k = pl.program_id(0)

    @pl.when(k == 0)
    def _():
        acc_ref[...] = jnp.zeros_like(acc_ref)

    # Layer-1 partial product for this K tile (MXU, f32 accumulate).
    acc_ref[...] += jnp.dot(x_ref[...], w1_ref[...],
                            preferred_element_type=jnp.float32)

    # Epilogue on the last K step: bias + ReLU of layer 1, then layers 2-4
    # entirely in VMEM; only the final (B, 2) result is written to HBM.
    @pl.when(k == pl.num_programs(0) - 1)
    def _():
        h = jnp.maximum(acc_ref[...] + b1_ref[...], 0.0)              # (B, 1024)
        h = jnp.maximum(
            jnp.dot(h, w2_ref[...], preferred_element_type=jnp.float32)
            + b2_ref[...], 0.0)                                       # (B, 100)
        h = jnp.maximum(
            jnp.dot(h, w3_ref[...], preferred_element_type=jnp.float32)
            + b3_ref[...], 0.0)                                       # (B, 10)
        y = (jnp.dot(h, w4_ref[...], preferred_element_type=jnp.float32)
             + b4_ref[...])                                           # (B, 2)
        o_ref[...] = y.astype(o_ref.dtype)


def fused_mlp(x_padded, padded_params, *, tk=TK):
    """Whole 4-layer MLP in one pallas_call.  x_padded: (B, K_PAD)."""
    w1, b1, w2, b2, w3, b3, w4, b4 = padded_params
    B, Kp = x_padded.shape
    Np = w1.shape[1]
    assert Kp % tk == 0, (Kp, tk)
    nk = Kp // tk
    n2, n3, n4 = w2.shape[1], w3.shape[1], w4.shape[1]

    return pl.pallas_call(
        _fused_mlp_kernel,
        out_shape=jax.ShapeDtypeStruct((B, n4), x_padded.dtype),
        grid_spec=pltpu.PrefetchScalarGridSpec(
            num_scalar_prefetch=0,
            grid=(nk,),
            in_specs=[
                pl.BlockSpec((B, tk), lambda k: (0, k)),    # x K-tile
                pl.BlockSpec((tk, Np), lambda k: (k, 0)),   # W1 K-tile (streamed)
                pl.BlockSpec((1, Np), lambda k: (0, 0)),    # b1 (resident)
                pl.BlockSpec((Np, n2), lambda k: (0, 0)),   # W2 (resident)
                pl.BlockSpec((1, n2), lambda k: (0, 0)),    # b2
                pl.BlockSpec((n2, n3), lambda k: (0, 0)),   # W3
                pl.BlockSpec((1, n3), lambda k: (0, 0)),    # b3
                pl.BlockSpec((n3, n4), lambda k: (0, 0)),   # W4
                pl.BlockSpec((1, n4), lambda k: (0, 0)),    # b4
            ],
            out_specs=pl.BlockSpec((B, n4), lambda k: (0, 0)),
            scratch_shapes=[pltpu.VMEM((B, Np), jnp.float32)],
        ),
        compiler_params=pltpu.CompilerParams(
            dimension_semantics=("arbitrary",),
            vmem_limit_bytes=32 * 1024 * 1024,
        ),
    )(x_padded, w1, b1, w2, b2, w3, b3, w4, b4)


def prepare_params(params):
    """One-time (outside jit) padding / reshaping of parameters."""
    (w1, b1), (w2, b2), (w3, b3), (w4, b4) = params
    K, N1_ = w1.shape
    w1p = jnp.pad(w1, ((0, K_PAD - K), (0, N1_PAD - N1_)))
    b1p = jnp.pad(b1, (0, N1_PAD - N1_)).reshape(1, N1_PAD)
    w2p = jnp.pad(w2, ((0, N1_PAD - N1_), (0, 0)))   # zero rows for padded h1 cols
    return (w1p, b1p,
            w2p, b2.reshape(1, -1),
            w3, b3.reshape(1, -1),
            w4, b4.reshape(1, -1))


@jax.jit
def logistic_regression_forward(x, padded_params):
    Kp = padded_params[0].shape[0]
    B, K = x.shape
    if Kp != K:
        # Only the tiny (B, K) activation is padded per call (~160 KB);
        # the 20 MB W1 was padded once in prepare_params.
        x = jnp.pad(x, ((0, 0), (0, Kp - K)))
    return fused_mlp(x, padded_params)


if __name__ == "__main__":
    key = jax.random.PRNGKey(0)
    B = 8
    dims = [5000, 1000, 100, 10, 2]

    # Deterministic parameter init (mimics nn.Linear's U(-1/sqrt(fan_in), +)).
    params = []
    for i in range(4):
        key, kw, kb = jax.random.split(key, 3)
        fan_in = dims[i]
        bound = 1.0 / (fan_in ** 0.5)
        w = jax.random.uniform(kw, (dims[i], dims[i + 1]), jnp.float32,
                               minval=-bound, maxval=bound)
        b = jax.random.uniform(kb, (dims[i + 1],), jnp.float32,
                               minval=-bound, maxval=bound)
        params.append((w, b))

    key, kx = jax.random.split(key)
    x = jax.random.normal(kx, (B, dims[0]), jnp.float32)

    padded_params = prepare_params(params)
    out = jax.block_until_ready(logistic_regression_forward(x, padded_params))

    # Pure-JAX reference (unpadded) for correctness.
    ref = x
    for i, (w, b) in enumerate(params):
        ref = ref @ w + b
        if i < 3:
            ref = jnp.maximum(ref, 0.0)

    assert out.shape == (B, 2), out.shape
    assert jnp.allclose(out, ref, atol=1e-4, rtol=1e-4), "mismatch vs reference"
    print("KERNEL_OK")
</pallas_src>

<mosaic_0001>
module attributes {stable_mosaic.version = 11 : i64} {
  func.func @_fused_mlp_kernel(%arg0: i32, %arg1: memref<8x1280xf32, #tpu.memory_space<vmem>>, %arg2: memref<1280x1024xf32, #tpu.memory_space<vmem>>, %arg3: memref<1x1024xf32, #tpu.memory_space<vmem>>, %arg4: memref<1024x100xf32, #tpu.memory_space<vmem>>, %arg5: memref<1x100xf32, #tpu.memory_space<vmem>>, %arg6: memref<100x10xf32, #tpu.memory_space<vmem>>, %arg7: memref<1x10xf32, #tpu.memory_space<vmem>>, %arg8: memref<10x2xf32, #tpu.memory_space<vmem>>, %arg9: memref<1x2xf32, #tpu.memory_space<vmem>>, %arg10: memref<8x2xf32, #tpu.memory_space<vmem>>, %arg11: memref<8x1024xf32, #tpu.memory_space<vmem>>) attributes {dimension_semantics = [#tpu.dimension_semantics<arbitrary>], iteration_bounds = array<i64: 4>, scalar_prefetch = 0 : i64, scratch_operands = 1 : i64, tpu.core_type = #tpu.core_type<tc>, window_params = [{transform_indices = @transform_0, window_bounds = array<i64: 8, 1280>}, {transform_indices = @transform_1, window_bounds = array<i64: 1280, 1024>}, {pipeline_mode = #tpu.pipeline_mode<synchronous>, transform_indices = @transform_2, window_bounds = array<i64: 1, 1024>}, {pipeline_mode = #tpu.pipeline_mode<synchronous>, transform_indices = @transform_3, window_bounds = array<i64: 1024, 100>}, {pipeline_mode = #tpu.pipeline_mode<synchronous>, transform_indices = @transform_4, window_bounds = array<i64: 1, 100>}, {pipeline_mode = #tpu.pipeline_mode<synchronous>, transform_indices = @transform_5, window_bounds = array<i64: 100, 10>}, {pipeline_mode = #tpu.pipeline_mode<synchronous>, transform_indices = @transform_6, window_bounds = array<i64: 1, 10>}, {pipeline_mode = #tpu.pipeline_mode<synchronous>, transform_indices = @transform_7, window_bounds = array<i64: 10, 2>}, {pipeline_mode = #tpu.pipeline_mode<synchronous>, transform_indices = @transform_8, window_bounds = array<i64: 1, 2>}, {pipeline_mode = #tpu.pipeline_mode<synchronous>, transform_indices = @transform_9, window_bounds = array<i64: 8, 2>}]} {
    %c0_i32 = arith.constant 0 : i32
    %0 = arith.cmpi eq, %arg0, %c0_i32 : i32
    %1 = arith.extui %0 : i1 to i32
    %c0_i32_0 = arith.constant 0 : i32
    %2 = arith.cmpi ne, %1, %c0_i32_0 : i32
    scf.if %2 {
      %cst_9 = arith.constant 0.000000e+00 : f32
      %12 = vector.broadcast %cst_9 : f32 to vector<8x1024xf32>
      %c0_10 = arith.constant 0 : index
      %c0_11 = arith.constant 0 : index
      %13 = vector.load %arg11[%c0_10, %c0_11] : memref<8x1024xf32, #tpu.memory_space<vmem>>, vector<8x1024xf32>
      tpu.vector_store %arg11[%c0_10, %c0_11], %12 {strides = array<i32>} : memref<8x1024xf32, #tpu.memory_space<vmem>>, vector<8x1024xf32>,
    } else {
    }
    %c0 = arith.constant 0 : index
    %c0_1 = arith.constant 0 : index
    %3 = vector.load %arg11[%c0, %c0_1] : memref<8x1024xf32, #tpu.memory_space<vmem>>, vector<8x1024xf32>
    %c0_2 = arith.constant 0 : index
    %c0_3 = arith.constant 0 : index
    %4 = vector.load %arg1[%c0_2, %c0_3] : memref<8x1280xf32, #tpu.memory_space<vmem>>, vector<8x1280xf32>
    %c0_4 = arith.constant 0 : index
    %c0_5 = arith.constant 0 : index
    %5 = vector.load %arg2[%c0_4, %c0_5] : memref<1280x1024xf32, #tpu.memory_space<vmem>>, vector<1280x1024xf32>
    %cst = arith.constant dense<0.000000e+00> : vector<8x1024xf32>
    %6 = tpu.matmul %4, %5, %cst {dimension_numbers = #tpu.dot_dimension_numbers<[1], [0], [0], [1], [0, 0, 1, 1], [], []>} : vector<8x1280xf32>, vector<1280x1024xf32>, vector<8x1024xf32> -> vector<8x1024xf32>
    %7 = arith.addf %3, %6 : vector<8x1024xf32>
    %c0_6 = arith.constant 0 : index
    %c0_7 = arith.constant 0 : index
    %8 = vector.load %arg11[%c0_6, %c0_7] : memref<8x1024xf32, #tpu.memory_space<vmem>>, vector<8x1024xf32>
    tpu.vector_store %arg11[%c0_6, %c0_7], %7 {strides = array<i32>} : memref<8x1024xf32, #tpu.memory_space<vmem>>, vector<8x1024xf32>,
    %c3_i32 = arith.constant 3 : i32
    %9 = arith.cmpi eq, %arg0, %c3_i32 : i32
    %10 = arith.extui %9 : i1 to i32
    %c0_i32_8 = arith.constant 0 : i32
    %11 = arith.cmpi ne, %10, %c0_i32_8 : i32
    scf.if %11 {
      %c0_9 = arith.constant 0 : index
      %c0_10 = arith.constant 0 : index
      %12 = vector.load %arg11[%c0_9, %c0_10] : memref<8x1024xf32, #tpu.memory_space<vmem>>, vector<8x1024xf32>
      %c0_11 = arith.constant 0 : index
      %c0_12 = arith.constant 0 : index
      %13 = vector.load %arg3[%c0_11, %c0_12] : memref<1x1024xf32, #tpu.memory_space<vmem>>, vector<1x1024xf32>
      %14 = vector.broadcast %13 : vector<1x1024xf32> to vector<8x1024xf32>
      %15 = arith.addf %12, %14 : vector<8x1024xf32>
      %cst_13 = arith.constant 0.000000e+00 : f32
      %16 = vector.broadcast %cst_13 : f32 to vector<8x1024xf32>
      %17 = arith.maximumf %15, %16 : vector<8x1024xf32>
      %c0_14 = arith.constant 0 : index
      %c0_15 = arith.constant 0 : index
      %18 = vector.load %arg4[%c0_14, %c0_15] : memref<1024x100xf32, #tpu.memory_space<vmem>>, vector<1024x100xf32>
      %cst_16 = arith.constant dense<0.000000e+00> : vector<8x100xf32>
      %19 = tpu.matmul %17, %18, %cst_16 {dimension_numbers = #tpu.dot_dimension_numbers<[1], [0], [0], [1], [0, 0, 1, 1], [], []>} : vector<8x1024xf32>, vector<1024x100xf32>, vector<8x100xf32> -> vector<8x100xf32>
      %c0_17 = arith.constant 0 : index
      %c0_18 = arith.constant 0 : index
      %20 = vector.load %arg5[%c0_17, %c0_18] : memref<1x100xf32, #tpu.memory_space<vmem>>, vector<1x100xf32>
      %21 = vector.broadcast %20 : vector<1x100xf32> to vector<8x100xf32>
      %22 = arith.addf %19, %21 : vector<8x100xf32>
      %cst_19 = arith.constant 0.000000e+00 : f32
      %23 = vector.broadcast %cst_19 : f32 to vector<8x100xf32>
      %24 = arith.maximumf %22, %23 : vector<8x100xf32>
      %c0_20 = arith.constant 0 : index
      %c0_21 = arith.constant 0 : index
      %25 = vector.load %arg6[%c0_20, %c0_21] : memref<100x10xf32, #tpu.memory_space<vmem>>, vector<100x10xf32>
      %cst_22 = arith.constant dense<0.000000e+00> : vector<8x10xf32>
      %26 = tpu.matmul %24, %25, %cst_22 {dimension_numbers = #tpu.dot_dimension_numbers<[1], [0], [0], [1], [0, 0, 1, 1], [], []>} : vector<8x100xf32>, vector<100x10xf32>, vector<8x10xf32> -> vector<8x10xf32>
      %c0_23 = arith.constant 0 : index
      %c0_24 = arith.constant 0 : index
      %27 = vector.load %arg7[%c0_23, %c0_24] : memref<1x10xf32, #tpu.memory_space<vmem>>, vector<1x10xf32>
      %28 = vector.broadcast %27 : vector<1x10xf32> to vector<8x10xf32>
      %29 = arith.addf %26, %28 : vector<8x10xf32>
      %cst_25 = arith.constant 0.000000e+00 : f32
      %30 = vector.broadcast %cst_25 : f32 to vector<8x10xf32>
      %31 = arith.maximumf %29, %30 : vector<8x10xf32>
      %c0_26 = arith.constant 0 : index
      %c0_27 = arith.constant 0 : index
      %32 = vector.load %arg8[%c0_26, %c0_27] : memref<10x2xf32, #tpu.memory_space<vmem>>, vector<10x2xf32>
      %cst_28 = arith.constant dense<0.000000e+00> : vector<8x2xf32>
      %33 = tpu.matmul %31, %32, %cst_28 {dimension_numbers = #tpu.dot_dimension_numbers<[1], [0], [0], [1], [0, 0, 1, 1], [], []>} : vector<8x10xf32>, vector<10x2xf32>, vector<8x2xf32> -> vector<8x2xf32>
      %c0_29 = arith.constant 0 : index
      %c0_30 = arith.constant 0 : index
      %34 = vector.load %arg9[%c0_29, %c0_30] : memref<1x2xf32, #tpu.memory_space<vmem>>, vector<1x2xf32>
      %35 = vector.broadcast %34 : vector<1x2xf32> to vector<8x2xf32>
      %36 = arith.addf %33, %35 : vector<8x2xf32>
      %c0_31 = arith.constant 0 : index
      %c0_32 = arith.constant 0 : index
      %37 = vector.load %arg10[%c0_31, %c0_32] : memref<8x2xf32, #tpu.memory_space<vmem>>, vector<8x2xf32>
      tpu.vector_store %arg10[%c0_31, %c0_32], %36 {strides = array<i32>} : memref<8x2xf32, #tpu.memory_space<vmem>>, vector<8x2xf32>,
    } else {
    }
    return
  }
  func.func @transform_0(%arg0: i32) -> (i32, i32) {
    %c0_i32 = arith.constant 0 : i32
    %c0_i32_0 = arith.constant 0 : i32
    return %c0_i32, %arg0 : i32, i32
  }
  func.func @transform_1(%arg0: i32) -> (i32, i32) {
    %c0_i32 = arith.constant 0 : i32
    %c0_i32_0 = arith.constant 0 : i32
    return %arg0, %c0_i32 : i32, i32
  }
  func.func @transform_2(%arg0: i32) -> (i32, i32) {
    %c0_i32 = arith.constant 0 : i32
    %c0_i32_0 = arith.constant 0 : i32
    %c0_i32_1 = arith.constant 0 : i32
    return %c0_i32, %c0_i32_0 : i32, i32
  }
  func.func @transform_3(%arg0: i32) -> (i32, i32) {
    %c0_i32 = arith.constant 0 : i32
    %c0_i32_0 = arith.constant 0 : i32
    %c0_i32_1 = arith.constant 0 : i32
    return %c0_i32, %c0_i32_0 : i32, i32
  }
  func.func @transform_4(%arg0: i32) -> (i32, i32) {
    %c0_i32 = arith.constant 0 : i32
    %c0_i32_0 = arith.constant 0 : i32
    %c0_i32_1 = arith.constant 0 : i32
    return %c0_i32, %c0_i32_0 : i32, i32
  }
  func.func @transform_5(%arg0: i32) -> (i32, i32) {
    %c0_i32 = arith.constant 0 : i32
    %c0_i32_0 = arith.constant 0 : i32
    %c0_i32_1 = arith.constant 0 : i32
    return %c0_i32, %c0_i32_0 : i32, i32
  }
  func.func @transform_6(%arg0: i32) -> (i32, i32) {
    %c0_i32 = arith.constant 0 : i32
    %c0_i32_0 = arith.constant 0 : i32
    %c0_i32_1 = arith.constant 0 : i32
    return %c0_i32, %c0_i32_0 : i32, i32
  }
  func.func @transform_7(%arg0: i32) -> (i32, i32) {
    %c0_i32 = arith.constant 0 : i32
    %c0_i32_0 = arith.constant 0 : i32
    %c0_i32_1 = arith.constant 0 : i32
    return %c0_i32, %c0_i32_0 : i32, i32
  }
  func.func @transform_8(%arg0: i32) -> (i32, i32) {
    %c0_i32 = arith.constant 0 : i32
    %c0_i32_0 = arith.constant 0 : i32
    %c0_i32_1 = arith.constant 0 : i32
    return %c0_i32, %c0_i32_0 : i32, i32
  }
  func.func @transform_9(%arg0: i32) -> (i32, i32) {
    %c0_i32 = arith.constant 0 : i32
    %c0_i32_0 = arith.constant 0 : i32
    %c0_i32_1 = arith.constant 0 : i32
    return %c0_i32, %c0_i32_0 : i32, i32
  }
}

</mosaic_0001>

<bundles_post_ra>
// kernel: logistic_regression_forward.1
= control target key start
LH: loop header
LB: loop body
LE: loop exit
PB: predicated region body
PF: predicated region fallthrough
CT: control target
= control target key end

     0   :  { %s6310_s0 = inlined_call_operand.vmem [shape: f32[8,5120], index: 0, kind: input, shape index: {}]   ;;  %s6311_s1 = inlined_call_operand.hbm [shape: f32[5120,1024], index: 1, kind: input, shape index: {}]   ;;  %s6312_s2 = inlined_call_operand.hbm [shape: f32[1,1024], index: 2, kind: input, shape index: {}]   ;;  %s6313_s3 = inlined_call_operand.vmem [shape: f32[1024,100], index: 3, kind: input, shape index: {}]   ;;  %s6314_s4 = inlined_call_operand.hbm [shape: f32[1,100], index: 4, kind: input, shape index: {}]   ;;  %s6315_s5 = inlined_call_operand.vmem [shape: f32[100,10], index: 5, kind: input, shape index: {}]   ;;  %s6316_s6 = inlined_call_operand.hbm [shape: f32[1,10], index: 6, kind: input, shape index: {}]   ;;  %s6317_s7 = inlined_call_operand.vmem [shape: f32[10,2], index: 7, kind: input, shape index: {}]   ;;  %s6318_s8 = inlined_call_operand.hbm [shape: f32[1,2], index: 8, kind: input, shape index: {}]   ;;  %s6319_s9 = inlined_call_operand.vmem [shape: f32[8,2], index: 9, kind: output, shape index: {}]  }
   0x1   :  { %6320 = sst [smem:[#allocation14_spill]] %s6312_s2 }
   0x2   :  { %14 = vsyncpa [#allocation4], 0 }
   0x3   :  { %16 = vsyncpa [#allocation4 + $0x1], 0 }
   0x4   :  { %17 = vsyncpa [#allocation6], 0 }
   0x5   :  { %18 = vsyncpa [#allocation9], 0  ;;  %s4253_s30 = smov 0   ;;  %s4255_s10 = smov 0  }
   0x6   :  { %s4257_s11 = smov 0   ;;  %s4259_s12 = smov 0  }
   0x7 LB: > { %s4272_s13 = sadd.s32 4294967295, %s4194_s12   ;;  %p70_p0 = scmp.ne.s32.totalorder %s4186_s10, %s4182_s30  ;;  %s4194_s12 = sphi %s4259_s12, %s6329_s12   ;;  %s4190_s11 = sphi %s4257_s11, %s6328_s11   ;;  %s4186_s10 = sphi %s4255_s10, %s6327_s10   ;;  %s4182_s30 = sphi %s4253_s30, %s6326_s30  }
   0x8   : > { %p71_p1 = scmp.eq.s32.totalorder %s4272_s13, 0  ;;  %p3859_p2 = scmp.ge.s32.totalorder %s4194_s12, 1 }
   0x9   : > { %p249_p3 = scmp.lt.s32.totalorder %s4194_s12, 5  ;;  %p3860_p4 = scmp.ne.s32.totalorder %s4272_s13, 0 }
   0xa   : > { %p4281_p5 = por %p71_p1, %p70_p0  ;;  %s6322_s2 = sld [smem:[#allocation14_spill]] }
   0xb   : > { %p4288_p6 = pnand %p3859_p2, %p249_p3  ;;  %s4196_s19 = smov [#allocation5]  }
   0xc   : > { %s263_s20 = sshll.u32 %s4196_s19, 4  ;;  %s291_s23 = sshll.u32 %s6316_s6, 4  ;;  %s264_s20 = int_to_ptr.vmem [resolvable:$true] %s263_s20  ;;  %s292_s23 = int_to_ptr.hbm [resolvable:$true] %s291_s23 }
   0xd   : > { %p3904_p7 = pneg %p4288_p6  ;;  %s276_s27 = sshll.u32 %s6314_s4, 4  ;;  %s277_s27 = int_to_ptr.hbm [resolvable:$true] %s276_s27 }
   0xe   : > { %s4197_s28 = smov [#allocation8]   ;;  %s306_s16 = sshll.u32 %s6318_s8, 4  ;;  %s307_s16 = int_to_ptr.hbm [resolvable:$true] %s306_s16 }
   0xf   : > { %p4299_p8 = pnand %p3904_p7, %p71_p1  ;;  %s293_s29 = sshll.u32 %s4197_s28, 4  ;;  %s294_s29 = int_to_ptr.vmem [resolvable:$true] %s293_s29 }
  0x10   : > { %s261_s17 = sshll.u32 %s6322_s2, 4  ;;  %s4198_s19 = smov [#allocation7]   ;;  %s262_s17 = int_to_ptr.hbm [resolvable:$true] %s261_s17 }
  0x11   : > { %3907 = dma.hbm_to_vmem [thread:$0]  (!%p4299_p8), %s262_s17, 128, %s264_s20, [#allocation6]  }
  0x12   : > { %3913 = dma.hbm_to_vmem [thread:$0]  (!%p4299_p8), %s292_s23, 16, %s294_s29, [#allocation9]  }
  0x13   : > { %s278_s21 = sshll.u32 %s4198_s19, 4  ;;  %s4199_s17 = smov [#allocation10]   ;;  %s279_s21 = int_to_ptr.vmem [resolvable:$true] %s278_s21 }
  0x14   : > { %3910 = dma.hbm_to_vmem [thread:$0]  (!%p4299_p8), %s277_s27, 16, %s279_s21, [#allocation6]  }
  0x15   : > { %s308_s20 = sshll.u32 %s4199_s17, 4  ;;  %s4318_s22 = sadd.s32 1, %s4194_s12   ;;  %s309_s20 = int_to_ptr.vmem [resolvable:$true] %s308_s20 }
  0x16   : > { %3916 = dma.hbm_to_vmem [thread:$0]  (!%p4299_p8), %s307_s16, 16, %s309_s20, [#allocation9]  }
  0x17   : > { %s57_s23 = sadd.s32 1, %s4190_s11  ;;  %s54_s25 = ssub.s32 %s4194_s12, %s4318_s22 }
  0x18   : > { %p64_p9 = scmp.ne.s32.totalorder %s4190_s11, %s4186_s10  ;;  %p55_p10 = scmp.eq.s32.totalorder %s54_s25, 0 }
  0x19   : > { %p65_p11 = scmp.eq.s32.totalorder %s4194_s12, 0  ;;  %p3925_p12 = scmp.lt.s32.totalorder %s4194_s12, 4 }
  0x1a   : > { %s328_s26 = sand.u32 1, %s4190_s11   ;;  %s3883_s29 = smul.u32 10240, %s4194_s12 }
  0x1b   : > { %s4329_s28 = scalar_select %p55_p10, %s4190_s11, %s57_s23  }
  0x1c   : > { %p66_p13 = por %p65_p11, %p64_p9  ;;  %s3884_s27 = smul.u32 10240, %s328_s26 }
  0x1d   : > { %s338_s16 = scalar_lea.hbm %s6311_s1, %s3883_s29  ;;  %s329_s20 = scalar_lea.sflag [#allocation4], %s328_s26 }
  0x1e   : > { %p4332_p0 = pnand %p3925_p12, %p66_p13  ;;  %s332_s19 = scalar_lea.vmem [#allocation3], %s3884_s27 }
  0x1f   : > { %s341_s21 = sshll.u32 %s332_s19, 4  ;;  %s339_s17 = sshll.u32 %s338_s16, 4  ;;  %s342_s21 = int_to_ptr.vmem [resolvable:$true] %s341_s21  ;;  %s340_s17 = int_to_ptr.hbm [resolvable:$true] %s339_s17 }
  0x20   : > { %s4122_s23 = sshra.s32 %s340_s17, 4  ;;  %p4126_p3 = pneg %p4332_p0  ;;  %s4123_s23 = int_to_ptr.hbm [resolvable:$true] %s4122_s23 }
  0x21   : > { %s4124_s25 = scalar_lea.hbm %s4123_s23, 10240  ;;  %s4129_s24 = scalar_lea.hbm %s6311_s1, 40960 }
  0x22   : > { %p4125_p2 = scmp.ne.s32.totalorder %s4123_s23, %s4124_s25  ;;  %p4130_p9 = scmp.lt.s32.totalorder %s4123_s23, %s6311_s1 }
  0x23   : > { %p4131_p10 = scmp.lt.s32.totalorder %s4129_s24, %s4124_s25 }
  0x24   : > { %p4127_p7 = pnand %p4126_p3, %p4125_p2 }
  0x25   : > { %p4132_p11 = por %p4131_p10, %p4130_p9 }
  0x26   : > { %p4128_p8 = pneg %p4127_p7 }
  0x28   : > { %p4133_p12 = pnand %p4132_p11, %p4128_p8 }
  0x2a   : > { %4136 = shalt.err (!%p4133_p12)
}
  0x2b   : > { %s4200_s26 = smov 1024   ;;  %s4201_s27 = smov 64  }
  0x2c   : > { %3920 = dma.hbm_to_vmem [thread:$0]  (!%p4332_p0), %s340_s17, 163840, %s342_s21, %s329_s20, %s4200_s26, %s4200_s26, %s4201_s27  }
  0x2d   : > { %353 = sbr.rel (%p4288_p6) target bundleno = 1547 (0x60b), region = 56  ;;  %s355_s2 = sand.u32 (!%p4288_p6), 1, %s4186_s10  }
  0x2e   : > { %s3885_s16 = smul.u32 (!%p4288_p6), 10240, %s355_s2  ;;  %s356_s19 = scalar_lea.sflag (!%p4288_p6), [#allocation4], %s355_s2 }
  0x30   : > { %s4352_s12 = scalar_lea.vmem (!%p4288_p6), [#allocation3], %s3885_s16 }
  0x32   : > { %4169 = dma.done.wait (%p4281_p5), %s356_s19, 163840  }
  0x33   : > { %4171 = vsyncadd (%p4281_p5), %s356_s19, 4294803456 }
  0x34   : > { %4173 = dma.done.wait (%p71_p1), [#allocation6], 144  }
  0x35   : > { %4175 = vsyncadd (%p71_p1), [#allocation6], 4294967152 }
  0x36   : > { %4177 = dma.done.wait (%p71_p1), [#allocation9], 32  }
  0x37   : > { %4179 = vsyncadd (%p71_p1), [#allocation9], 4294967264  ;;  %s415_s18 = smul.u32 10, %s4272_s13 }
  0x39   : > { %p416_p6 = scmp.lt.s32.totalorder %s415_s18, 39  ;;  %425 = sbr.rel (%p3860_p4) target bundleno = 71 (0x47), region = 80 }
  0x3b   : > { %s6331_s18 = smov (!%p416_p6, %s415_s18), 39 }
  0x3c   : > { %s3872_s30 = sshll.u32 %s6331_s18, 3 }
  0x3d   : > { %s4370_s17 = scalar_lea.vmem %s6310_s0, %s3872_s30 }
  0x3e   : > { %v4202_v0 = vmov 0.0  }
  0x3f   : > { %426 = vst [vmem:[#allocation2 + $0x30] sm:$0xff] %v4202_v0 }
  0x40   : > { %427 = vst [vmem:[#allocation2] sm:$0xff] %v4202_v0 }
  0x41   : > { %428 = vst [vmem:[#allocation2 + $0x18] sm:$0xff] %v4202_v0 }
  0x42   : > { %429 = vst [vmem:[#allocation2 + $0x10] sm:$0xff] %v4202_v0 }
  0x43   : > { %430 = vst [vmem:[#allocation2 + $0x8] sm:$0xff] %v4202_v0 }
  0x44   : > { %431 = vst [vmem:[#allocation2 + $0x20] sm:$0xff] %v4202_v0 }
  0x45   : > { %432 = vst [vmem:[#allocation2 + $0x28] sm:$0xff] %v4202_v0 }
  0x46   : > { %433 = vst [vmem:[#allocation2 + $0x38] sm:$0xff] %v4202_v0 }
  0x47 PF: > { %v572_v1 = vld [vmem:[%s4352_s12 + $0x3c0] sm:$0xff]  ;;  %p3874_p1 = scmp.ne.s32.totalorder %s4272_s13, 3 }
  0x48   : > { %v828_v2 = vld [vmem:[%s4352_s12 + $0xbc0] sm:$0xff]  ;;  %1732 = vmatpush.msra.mxu0 %v572_v1 }
  0x49   : > { %v564_v3 = vld [vmem:[%s4352_s12 + $0x380] sm:$0xff]  ;;  %1772 = vmatpush.msra.mxu2 %v828_v2 }
  0x4a   : > { %v700_v4 = vld [vmem:[%s4352_s12 + $0x7c0] sm:$0xff]  ;;  %1733 = vmatpush.msra.mxu0 %v564_v3 }
  0x4b   : > { %v820_v5 = vld [vmem:[%s4352_s12 + $0xb80] sm:$0xff]  ;;  %1752 = vmatpush.msra.mxu1 %v700_v4 }
  0x4c   : > { %v956_v6 = vld [vmem:[%s4352_s12 + $0xfc0] sm:$0xff]  ;;  %1773 = vmatpush.msra.mxu2 %v820_v5 }
  0x4d   : > { %1792 = vmatpush.msra.mxu3 %v956_v6  ;;  %v556_v7 = vld [vmem:[%s4352_s12 + $0x340] sm:$0xff] }
  0x4e   : > { %v692_v8 = vld [vmem:[%s4352_s12 + $0x780] sm:$0xff]  ;;  %1734 = vmatpush.msra.mxu0 %v556_v7 }
  0x4f   : > { %v812_v9 = vld [vmem:[%s4352_s12 + $0xb40] sm:$0xff]  ;;  %1753 = vmatpush.msra.mxu1 %v692_v8 }
  0x50   : > { %v948_v10 = vld [vmem:[%s4352_s12 + $0xf80] sm:$0xff]  ;;  %1774 = vmatpush.msra.mxu2 %v812_v9 }
  0x51   : > { %v684_v11 = vld [vmem:[%s4352_s12 + $0x740] sm:$0xff]  ;;  %1793 = vmatpush.msra.mxu3 %v948_v10 }
  0x52   : > { %v548_v12 = vld [vmem:[%s4352_s12 + $0x300] sm:$0xff]  ;;  %1754 = vmatpush.msra.mxu1 %v684_v11 }
  0x53   : > { %v804_v13 = vld [vmem:[%s4352_s12 + $0xb00] sm:$0xff]  ;;  %1735 = vmatpush.msra.mxu0 %v548_v12 }
  0x54   : > { %v940_v14 = vld [vmem:[%s4352_s12 + $0xf40] sm:$0xff]  ;;  %1775 = vmatpush.msra.mxu2 %v804_v13 }
  0x55   : > { %v676_v15 = vld [vmem:[%s4352_s12 + $0x700] sm:$0xff]  ;;  %1794 = vmatpush.msra.mxu3 %v940_v14 }
  0x56   : > { %v932_v16 = vld [vmem:[%s4352_s12 + $0xf00] sm:$0xff]  ;;  %1755 = vmatpush.msra.mxu1 %v676_v15 }
  0x57   : > { %v540_v17 = vld [vmem:[%s4352_s12 + $0x2c0] sm:$0xff]  ;;  %1795 = vmatpush.msra.mxu3 %v932_v16 }
  0x58   : > { %v796_v18 = vld [vmem:[%s4352_s12 + $0xac0] sm:$0xff]  ;;  %1736 = vmatpush.msra.mxu0 %v540_v17 }
  0x59   : > { %v668_v19 = vld [vmem:[%s4352_s12 + $0x6c0] sm:$0xff]  ;;  %1776 = vmatpush.msra.mxu2 %v796_v18 }
  0x5a   : > { %v924_v20 = vld [vmem:[%s4352_s12 + $0xec0] sm:$0xff]  ;;  %1756 = vmatpush.msra.mxu1 %v668_v19 }
  0x5b   : > { %v532_v21 = vld [vmem:[%s4352_s12 + $0x280] sm:$0xff]  ;;  %1796 = vmatpush.msra.mxu3 %v924_v20 }
  0x5c   : > { %v788_v22 = vld [vmem:[%s4352_s12 + $0xa80] sm:$0xff]  ;;  %1737 = vmatpush.msra.mxu0 %v532_v21 }
  0x5d   : > { %v660_v23 = vld [vmem:[%s4352_s12 + $0x680] sm:$0xff]  ;;  %1777 = vmatpush.msra.mxu2 %v788_v22 }
  0x5e   : > { %v916_v24 = vld [vmem:[%s4352_s12 + $0xe80] sm:$0xff]  ;;  %1757 = vmatpush.msra.mxu1 %v660_v23 }
  0x5f   : > { %v524_v25 = vld [vmem:[%s4352_s12 + $0x240] sm:$0xff]  ;;  %1797 = vmatpush.msra.mxu3 %v916_v24 }
  0x60   : > { %v780_v26 = vld [vmem:[%s4352_s12 + $0xa40] sm:$0xff]  ;;  %1738 = vmatpush.msra.mxu0 %v524_v25 }
  0x61   : > { %v652_v27 = vld [vmem:[%s4352_s12 + $0x640] sm:$0xff]  ;;  %1778 = vmatpush.msra.mxu2 %v780_v26 }
  0x62   : > { %v908_v28 = vld [vmem:[%s4352_s12 + $0xe40] sm:$0xff]  ;;  %1758 = vmatpush.msra.mxu1 %v652_v27 }
  0x63   : > { %v516_v29 = vld [vmem:[%s4352_s12 + $0x200] sm:$0xff]  ;;  %1798 = vmatpush.msra.mxu3 %v908_v28 }
  0x64   : > { %v772_v30 = vld [vmem:[%s4352_s12 + $0xa00] sm:$0xff]  ;;  %1739 = vmatpush.msra.mxu0 %v516_v29 }
  0x65   : > { %v644_v31 = vld [vmem:[%s4352_s12 + $0x600] sm:$0xff]  ;;  %1779 = vmatpush.msra.mxu2 %v772_v30 }
  0x66   : > { %v900_v32 = vld [vmem:[%s4352_s12 + $0xe00] sm:$0xff]  ;;  %1759 = vmatpush.msra.mxu1 %v644_v31 }
  0x67   : > { %v508_v33 = vld [vmem:[%s4352_s12 + $0x1c0] sm:$0xff]  ;;  %1799 = vmatpush.msra.mxu3 %v900_v32 }
  0x68   : > { %v764_v34 = vld [vmem:[%s4352_s12 + $0x9c0] sm:$0xff]  ;;  %1740 = vmatpush.msra.mxu0 %v508_v33 }
  0x69   : > { %v636_v35 = vld [vmem:[%s4352_s12 + $0x5c0] sm:$0xff]  ;;  %1780 = vmatpush.msra.mxu2 %v764_v34 }
  0x6a   : > { %v892_v36 = vld [vmem:[%s4352_s12 + $0xdc0] sm:$0xff]  ;;  %1760 = vmatpush.msra.mxu1 %v636_v35 }
  0x6b   : > { %v500_v37 = vld [vmem:[%s4352_s12 + $0x180] sm:$0xff]  ;;  %1800 = vmatpush.msra.mxu3 %v892_v36 }
  0x6c   : > { %v756_v38 = vld [vmem:[%s4352_s12 + $0x980] sm:$0xff]  ;;  %1741 = vmatpush.msra.mxu0 %v500_v37 }
  0x6d   : > { %v628_v39 = vld [vmem:[%s4352_s12 + $0x580] sm:$0xff]  ;;  %1781 = vmatpush.msra.mxu2 %v756_v38 }
  0x6e   : > { %v884_v40 = vld [vmem:[%s4352_s12 + $0xd80] sm:$0xff]  ;;  %1761 = vmatpush.msra.mxu1 %v628_v39 }
  0x6f   : > { %v492_v41 = vld [vmem:[%s4352_s12 + $0x140] sm:$0xff]  ;;  %1801 = vmatpush.msra.mxu3 %v884_v40 }
  0x70   : > { %v748_v42 = vld [vmem:[%s4352_s12 + $0x940] sm:$0xff]  ;;  %1742 = vmatpush.msra.mxu0 %v492_v41 }
  0x71   : > { %v620_v43 = vld [vmem:[%s4352_s12 + $0x540] sm:$0xff]  ;;  %1782 = vmatpush.msra.mxu2 %v748_v42 }
  0x72   : > { %v876_v44 = vld [vmem:[%s4352_s12 + $0xd40] sm:$0xff]  ;;  %1762 = vmatpush.msra.mxu1 %v620_v43 }
  0x73   : > { %v484_v45 = vld [vmem:[%s4352_s12 + $0x100] sm:$0xff]  ;;  %1802 = vmatpush.msra.mxu3 %v876_v44 }
  0x74   : > { %v740_v46 = vld [vmem:[%s4352_s12 + $0x900] sm:$0xff]  ;;  %1743 = vmatpush.msra.mxu0 %v484_v45 }
  0x75   : > { %v612_v47 = vld [vmem:[%s4352_s12 + $0x500] sm:$0xff]  ;;  %1783 = vmatpush.msra.mxu2 %v740_v46 }
  0x76   : > { %v868_v48 = vld [vmem:[%s4352_s12 + $0xd00] sm:$0xff]  ;;  %1763 = vmatpush.msra.mxu1 %v612_v47 }
  0x77   : > { %v476_v49 = vld [vmem:[%s4352_s12 + $0xc0] sm:$0xff]  ;;  %1803 = vmatpush.msra.mxu3 %v868_v48 }
  0x78   : > { %v732_v50 = vld [vmem:[%s4352_s12 + $0x8c0] sm:$0xff]  ;;  %1744 = vmatpush.msra.mxu0 %v476_v49 }
  0x79   : > { %v604_v51 = vld [vmem:[%s4352_s12 + $0x4c0] sm:$0xff]  ;;  %1784 = vmatpush.msra.mxu2 %v732_v50 }
  0x7a   : > { %v860_v52 = vld [vmem:[%s4352_s12 + $0xcc0] sm:$0xff]  ;;  %1764 = vmatpush.msra.mxu1 %v604_v51 }
  0x7b   : > { %v468_v53 = vld [vmem:[%s4352_s12 + $0x80] sm:$0xff]  ;;  %1804 = vmatpush.msra.mxu3 %v860_v52 }
  0x7c   : > { %v724_v54 = vld [vmem:[%s4352_s12 + $0x880] sm:$0xff]  ;;  %1745 = vmatpush.msra.mxu0 %v468_v53 }
  0x7d   : > { %v596_v55 = vld [vmem:[%s4352_s12 + $0x480] sm:$0xff]  ;;  %1785 = vmatpush.msra.mxu2 %v724_v54 }
  0x7e   : > { %v852_v56 = vld [vmem:[%s4352_s12 + $0xc80] sm:$0xff]  ;;  %1765 = vmatpush.msra.mxu1 %v596_v55 }
  0x7f   : > { %v460_v57 = vld [vmem:[%s4352_s12 + $0x40] sm:$0xff]  ;;  %1805 = vmatpush.msra.mxu3 %v852_v56 }
  0x80   : > { %v716_v58 = vld [vmem:[%s4352_s12 + $0x840] sm:$0xff]  ;;  %1746 = vmatpush.msra.mxu0 %v460_v57 }
  0x81   : > { %v588_v59 = vld [vmem:[%s4352_s12 + $0x440] sm:$0xff]  ;;  %1786 = vmatpush.msra.mxu2 %v716_v58 }
  0x82   : > { %v844_v60 = vld [vmem:[%s4352_s12 + $0xc40] sm:$0xff]  ;;  %1766 = vmatpush.msra.mxu1 %v588_v59  ;;  %v4497_v59 = vld [vmem:[%s4370_s17 + $0x10] sm:$0xff] }
  0x83   : > { %v452_v61 = vld [vmem:[%s4352_s12] sm:$0xff]  ;;  %1806 = vmatpush.msra.mxu3 %v844_v60 }
  0x84   : > { %v708_v62 = vld [vmem:[%s4352_s12 + $0x800] sm:$0xff]  ;;  %1747 = vmatpush.msra.mxu0 %v452_v61 }
  0x85   : > { %v1084_v63 = vld [vmem:[%s4352_s12 + $0x13c0] sm:$0xff]  ;;  %1787 = vmatpush.msra.mxu2 %v708_v62 }
  0x86   : > { %v1340_v0 = vld [vmem:[%s4352_s12 + $0x1bc0] sm:$0xff]  ;;  %1812 = vmatpush.msrb.mxu0 %v1084_v63  ;;  %1788 = vmatmul.f32.vlgmr.msra.gmra.mxu2 %v4497_v59 }
  0x87   : > { %v580_v1 = vld [vmem:[%s4352_s12 + $0x400] sm:$0xff]  ;;  %1852 = vmatpush.msrb.mxu2 %v1340_v0 }
  0x88   : > { %v836_v2 = vld [vmem:[%s4352_s12 + $0xc00] sm:$0xff]  ;;  %1767 = vmatpush.msra.mxu1 %v580_v1  ;;  %v4508_v1 = vld [vmem:[%s4370_s17 + $0x18] sm:$0xff] }
  0x89   : > { %v1076_v3 = vld [vmem:[%s4352_s12 + $0x1380] sm:$0xff]  ;;  %1807 = vmatpush.msra.mxu3 %v836_v2 }
  0x8a   : > { %v1212_v4 = vld [vmem:[%s4352_s12 + $0x17c0] sm:$0xff]  ;;  %1813 = vmatpush.msrb.mxu0 %v1076_v3  ;;  %v573_v3 = vld [vmem:[%s4352_s12 + $0x3c8] sm:$0xff]  ;;  %1808 = vmatmul.f32.vlgmr.msra.gmra.mxu3 %v4508_v1 }
  0x8b   : > { %v1332_v5 = vld [vmem:[%s4352_s12 + $0x1b80] sm:$0xff]  ;;  %1832 = vmatpush.msrb.mxu1 %v1212_v4 }
  0x8c   : > { %v1468_v6 = vld [vmem:[%s4352_s12 + $0x1fc0] sm:$0xff]  ;;  %1853 = vmatpush.msrb.mxu2 %v1332_v5 }
  0x8d   : > { %v1068_v7 = vld [vmem:[%s4352_s12 + $0x1340] sm:$0xff]  ;;  %1872 = vmatpush.msrb.mxu3 %v1468_v6  ;;  %v4516_v6 = vld [vmem:[%s4370_s17 + $0x8] sm:$0xff] }
  0x8e   : > { %v1204_v8 = vld [vmem:[%s4352_s12 + $0x1780] sm:$0xff]  ;;  %1814 = vmatpush.msrb.mxu0 %v1068_v7  ;;  %1768 = vmatmul.f32.vlgmr.msra.gmra.mxu1 %v4516_v6 }
  0x8f   : > { %v1324_v9 = vld [vmem:[%s4352_s12 + $0x1b40] sm:$0xff]  ;;  %1833 = vmatpush.msrb.mxu1 %v1204_v8 }
  0x90   : > { %v1460_v10 = vld [vmem:[%s4352_s12 + $0x1f80] sm:$0xff]  ;;  %1854 = vmatpush.msrb.mxu2 %v1324_v9  ;;  %v565_v9 = vld [vmem:[%s4352_s12 + $0x388] sm:$0xff] }
  0x91   : > { %v1060_v11 = vld [vmem:[%s4352_s12 + $0x1300] sm:$0xff]  ;;  %1873 = vmatpush.msrb.mxu3 %v1460_v10  ;;  %v701_v10 = vld [vmem:[%s4352_s12 + $0x7c8] sm:$0xff] }
  0x92   : > { %v1196_v12 = vld [vmem:[%s4352_s12 + $0x1740] sm:$0xff]  ;;  %1815 = vmatpush.msrb.mxu0 %v1060_v11 }
  0x93   : > { %v1316_v13 = vld [vmem:[%s4352_s12 + $0x1b00] sm:$0xff]  ;;  %1834 = vmatpush.msrb.mxu1 %v1196_v12 }
  0x94   : > { %v1452_v14 = vld [vmem:[%s4352_s12 + $0x1f40] sm:$0xff]  ;;  %1855 = vmatpush.msrb.mxu2 %v1316_v13  ;;  %v557_v13 = vld [vmem:[%s4352_s12 + $0x348] sm:$0xff] }
  0x95   : > { %v1052_v15 = vld [vmem:[%s4352_s12 + $0x12c0] sm:$0xff]  ;;  %1874 = vmatpush.msrb.mxu3 %v1452_v14  ;;  %v693_v14 = vld [vmem:[%s4352_s12 + $0x788] sm:$0xff] }
  0x96   : > { %v1188_v16 = vld [vmem:[%s4352_s12 + $0x1700] sm:$0xff]  ;;  %1816 = vmatpush.msrb.mxu0 %v1052_v15  ;;  %v4529_v15 = vld [vmem:[%s4370_s17 + $0x30] sm:$0xff] }
  0x97   : > { %v1308_v17 = vld [vmem:[%s4352_s12 + $0x1ac0] sm:$0xff]  ;;  %1835 = vmatpush.msrb.mxu1 %v1188_v16 }
  0x98   : > { %v1444_v18 = vld [vmem:[%s4352_s12 + $0x1f00] sm:$0xff]  ;;  %1856 = vmatpush.msrb.mxu2 %v1308_v17 }
  0x99   : > { %v1044_v19 = vld [vmem:[%s4352_s12 + $0x1280] sm:$0xff]  ;;  %1875 = vmatpush.msrb.mxu3 %v1444_v18  ;;  %v549_v18 = vld [vmem:[%s4352_s12 + $0x308] sm:$0xff] }
  0x9a   : > { %v1180_v20 = vld [vmem:[%s4352_s12 + $0x16c0] sm:$0xff]  ;;  %1817 = vmatpush.msrb.mxu0 %v1044_v19  ;;  %v685_v19 = vld [vmem:[%s4352_s12 + $0x748] sm:$0xff] }
  0x9b   : > { %v1300_v21 = vld [vmem:[%s4352_s12 + $0x1a80] sm:$0xff]  ;;  %1836 = vmatpush.msrb.mxu1 %v1180_v20 }
  0x9c   : > { %v1436_v22 = vld [vmem:[%s4352_s12 + $0x1ec0] sm:$0xff]  ;;  %1857 = vmatpush.msrb.mxu2 %v1300_v21  ;;  %v4540_v21 = vld [vmem:[%s4370_s17 + $0x38] sm:$0xff] }
  0x9d   : > { %v1036_v23 = vld [vmem:[%s4352_s12 + $0x1240] sm:$0xff]  ;;  %1876 = vmatpush.msrb.mxu3 %v1436_v22 }
  0x9e   : > { %v1172_v24 = vld [vmem:[%s4352_s12 + $0x1680] sm:$0xff]  ;;  %1818 = vmatpush.msrb.mxu0 %v1036_v23 }
  0x9f   : > { %v1292_v25 = vld [vmem:[%s4352_s12 + $0x1a40] sm:$0xff]  ;;  %1837 = vmatpush.msrb.mxu1 %v1172_v24  ;;  %v541_v24 = vld [vmem:[%s4352_s12 + $0x2c8] sm:$0xff] }
  0xa0   : > { %v1428_v26 = vld [vmem:[%s4352_s12 + $0x1e80] sm:$0xff]  ;;  %1858 = vmatpush.msrb.mxu2 %v1292_v25  ;;  %v677_v25 = vld [vmem:[%s4352_s12 + $0x708] sm:$0xff] }
  0xa1   : > { %v1028_v27 = vld [vmem:[%s4352_s12 + $0x1200] sm:$0xff]  ;;  %1877 = vmatpush.msrb.mxu3 %v1428_v26  ;;  %v4548_v26 = vld [vmem:[%s4370_s17 + $0x28] sm:$0xff] }
  0xa2   : > { %v1164_v28 = vld [vmem:[%s4352_s12 + $0x1640] sm:$0xff]  ;;  %1819 = vmatpush.msrb.mxu0 %v1028_v27 }
  0xa3   : > { %v1284_v29 = vld [vmem:[%s4352_s12 + $0x1a00] sm:$0xff]  ;;  %1838 = vmatpush.msrb.mxu1 %v1164_v28 }
  0xa4   : > { %v1420_v30 = vld [vmem:[%s4352_s12 + $0x1e40] sm:$0xff]  ;;  %1859 = vmatpush.msrb.mxu2 %v1284_v29  ;;  %v533_v29 = vld [vmem:[%s4352_s12 + $0x288] sm:$0xff] }
  0xa5   : > { %v1020_v31 = vld [vmem:[%s4352_s12 + $0x11c0] sm:$0xff]  ;;  %1878 = vmatpush.msrb.mxu3 %v1420_v30  ;;  %v669_v30 = vld [vmem:[%s4352_s12 + $0x6c8] sm:$0xff] }
  0xa6   : > { %v1156_v32 = vld [vmem:[%s4352_s12 + $0x1600] sm:$0xff]  ;;  %1820 = vmatpush.msrb.mxu0 %v1020_v31 }
  0xa7   : > { %v1276_v33 = vld [vmem:[%s4352_s12 + $0x19c0] sm:$0xff]  ;;  %1839 = vmatpush.msrb.mxu1 %v1156_v32 }
  0xa8   : > { %v1412_v34 = vld [vmem:[%s4352_s12 + $0x1e00] sm:$0xff]  ;;  %1860 = vmatpush.msrb.mxu2 %v1276_v33  ;;  %v525_v33 = vld [vmem:[%s4352_s12 + $0x248] sm:$0xff] }
  0xa9   : > { %v1012_v35 = vld [vmem:[%s4352_s12 + $0x1180] sm:$0xff]  ;;  %1879 = vmatpush.msrb.mxu3 %v1412_v34  ;;  %v661_v34 = vld [vmem:[%s4352_s12 + $0x688] sm:$0xff] }
  0xaa   : > { %v1148_v36 = vld [vmem:[%s4352_s12 + $0x15c0] sm:$0xff]  ;;  %1821 = vmatpush.msrb.mxu0 %v1012_v35 }
  0xab   : > { %v1268_v37 = vld [vmem:[%s4352_s12 + $0x1980] sm:$0xff]  ;;  %1840 = vmatpush.msrb.mxu1 %v1148_v36 }
  0xac   : > { %v1404_v38 = vld [vmem:[%s4352_s12 + $0x1dc0] sm:$0xff]  ;;  %1861 = vmatpush.msrb.mxu2 %v1268_v37  ;;  %v517_v37 = vld [vmem:[%s4352_s12 + $0x208] sm:$0xff] }
  0xad   : > { %v1004_v39 = vld [vmem:[%s4352_s12 + $0x1140] sm:$0xff]  ;;  %1880 = vmatpush.msrb.mxu3 %v1404_v38  ;;  %v653_v38 = vld [vmem:[%s4352_s12 + $0x648] sm:$0xff] }
  0xae   : > { %v1140_v40 = vld [vmem:[%s4352_s12 + $0x1580] sm:$0xff]  ;;  %1822 = vmatpush.msrb.mxu0 %v1004_v39 }
  0xaf   : > { %v1260_v41 = vld [vmem:[%s4352_s12 + $0x1940] sm:$0xff]  ;;  %1841 = vmatpush.msrb.mxu1 %v1140_v40 }
  0xb0   : > { %v1396_v42 = vld [vmem:[%s4352_s12 + $0x1d80] sm:$0xff]  ;;  %1862 = vmatpush.msrb.mxu2 %v1260_v41  ;;  %v509_v41 = vld [vmem:[%s4352_s12 + $0x1c8] sm:$0xff] }
  0xb1   : > { %v996_v43 = vld [vmem:[%s4352_s12 + $0x1100] sm:$0xff]  ;;  %1881 = vmatpush.msrb.mxu3 %v1396_v42  ;;  %v645_v42 = vld [vmem:[%s4352_s12 + $0x608] sm:$0xff] }
  0xb2   : > { %v1132_v44 = vld [vmem:[%s4352_s12 + $0x1540] sm:$0xff]  ;;  %1823 = vmatpush.msrb.mxu0 %v996_v43 }
  0xb3   : > { %v1252_v45 = vld [vmem:[%s4352_s12 + $0x1900] sm:$0xff]  ;;  %1842 = vmatpush.msrb.mxu1 %v1132_v44 }
  0xb4   : > { %v1388_v46 = vld [vmem:[%s4352_s12 + $0x1d40] sm:$0xff]  ;;  %1863 = vmatpush.msrb.mxu2 %v1252_v45  ;;  %v501_v45 = vld [vmem:[%s4352_s12 + $0x188] sm:$0xff] }
  0xb5   : > { %v988_v47 = vld [vmem:[%s4352_s12 + $0x10c0] sm:$0xff]  ;;  %1882 = vmatpush.msrb.mxu3 %v1388_v46  ;;  %v637_v46 = vld [vmem:[%s4352_s12 + $0x5c8] sm:$0xff] }
  0xb6   : > { %v1124_v48 = vld [vmem:[%s4352_s12 + $0x1500] sm:$0xff]  ;;  %1824 = vmatpush.msrb.mxu0 %v988_v47 }
  0xb7   : > { %v1244_v49 = vld [vmem:[%s4352_s12 + $0x18c0] sm:$0xff]  ;;  %1843 = vmatpush.msrb.mxu1 %v1124_v48 }
  0xb8   : > { %v1380_v50 = vld [vmem:[%s4352_s12 + $0x1d00] sm:$0xff]  ;;  %1864 = vmatpush.msrb.mxu2 %v1244_v49  ;;  %v493_v49 = vld [vmem:[%s4352_s12 + $0x148] sm:$0xff] }
  0xb9   : > { %v980_v51 = vld [vmem:[%s4352_s12 + $0x1080] sm:$0xff]  ;;  %1883 = vmatpush.msrb.mxu3 %v1380_v50  ;;  %v629_v50 = vld [vmem:[%s4352_s12 + $0x588] sm:$0xff] }
  0xba   : > { %v1116_v52 = vld [vmem:[%s4352_s12 + $0x14c0] sm:$0xff]  ;;  %1825 = vmatpush.msrb.mxu0 %v980_v51 }
  0xbb   : > { %v1236_v53 = vld [vmem:[%s4352_s12 + $0x1880] sm:$0xff]  ;;  %1844 = vmatpush.msrb.mxu1 %v1116_v52 }
  0xbc   : > { %v1372_v54 = vld [vmem:[%s4352_s12 + $0x1cc0] sm:$0xff]  ;;  %1865 = vmatpush.msrb.mxu2 %v1236_v53  ;;  %v485_v53 = vld [vmem:[%s4352_s12 + $0x108] sm:$0xff] }
  0xbd   : > { %v972_v55 = vld [vmem:[%s4352_s12 + $0x1040] sm:$0xff]  ;;  %1884 = vmatpush.msrb.mxu3 %v1372_v54  ;;  %v621_v54 = vld [vmem:[%s4352_s12 + $0x548] sm:$0xff] }
  0xbe   : > { %v1108_v56 = vld [vmem:[%s4352_s12 + $0x1480] sm:$0xff]  ;;  %1826 = vmatpush.msrb.mxu0 %v972_v55 }
  0xbf   : > { %v1228_v57 = vld [vmem:[%s4352_s12 + $0x1840] sm:$0xff]  ;;  %1845 = vmatpush.msrb.mxu1 %v1108_v56 }
  0xc0   : > { %v1364_v58 = vld [vmem:[%s4352_s12 + $0x1c80] sm:$0xff]  ;;  %1866 = vmatpush.msrb.mxu2 %v1228_v57  ;;  %v477_v57 = vld [vmem:[%s4352_s12 + $0xc8] sm:$0xff] }
  0xc1   : > { %v964_v60 = vld [vmem:[%s4352_s12 + $0x1000] sm:$0xff]  ;;  %1885 = vmatpush.msrb.mxu3 %v1364_v58  ;;  %v613_v58 = vld [vmem:[%s4352_s12 + $0x508] sm:$0xff] }
  0xc2   : > { %v1100_v61 = vld [vmem:[%s4352_s12 + $0x1440] sm:$0xff]  ;;  %1827 = vmatpush.msrb.mxu0 %v964_v60 }
  0xc3   : > { %v1220_v62 = vld [vmem:[%s4352_s12 + $0x1800] sm:$0xff]  ;;  %1846 = vmatpush.msrb.mxu1 %v1100_v61 }
  0xc4   : > { %v1356_v63 = vld [vmem:[%s4352_s12 + $0x1c40] sm:$0xff]  ;;  %1867 = vmatpush.msrb.mxu2 %v1220_v62  ;;  %v469_v62 = vld [vmem:[%s4352_s12 + $0x88] sm:$0xff] }
  0xc5   : > { %v4504_v0 = vld [vmem:[%s4370_s17] sm:$0xff]  ;;  %1886 = vmatpush.msrb.mxu3 %v1356_v63  ;;  %1868 = vmatmul.f32.vlgmr.msrb.gmra.mxu2 %v4529_v15  ;;  %v605_v63 = vld [vmem:[%s4352_s12 + $0x4c8] sm:$0xff] }
  0xc6   : > { %v1596_v2 = vld [vmem:[%s4352_s12 + $0x23c0] sm:$0xff]  ;;  %1748 = vmatmul.f32.vlgmr.msra.gmra.mxu0 %v4504_v0  ;;  %1932 = vmatpush.msra.mxu2 %v573_v3 }
  0xc7   : > { %v1092_v4 = vld [vmem:[%s4352_s12 + $0x1400] sm:$0xff]  ;;  %1892 = vmatpush.msra.mxu0 %v1596_v2 }
  0xc8   : > { %v1348_v5 = vld [vmem:[%s4352_s12 + $0x1c00] sm:$0xff]  ;;  %1847 = vmatpush.msrb.mxu1 %v1092_v4  ;;  %1933 = vmatpush.msra.mxu2 %v565_v9  ;;  %v461_v4 = vld [vmem:[%s4352_s12 + $0x48] sm:$0xff] }
  0xc9   : > { %v1588_v7 = vld [vmem:[%s4352_s12 + $0x2380] sm:$0xff]  ;;  %1887 = vmatpush.msrb.mxu3 %v1348_v5  ;;  %1848 = vmatmul.f32.vlgmr.msrb.gmra.mxu1 %v4548_v26  ;;  %v597_v5 = vld [vmem:[%s4352_s12 + $0x488] sm:$0xff] }
  0xca   : > { %v1724_v8 = vld [vmem:[%s4352_s12 + $0x27c0] sm:$0xff]  ;;  %1893 = vmatpush.msra.mxu0 %v1588_v7  ;;  %1934 = vmatpush.msra.mxu2 %v557_v13  ;;  %v453_v9 = vld [vmem:[%s4352_s12 + $0x8] sm:$0xff] }
  0xcb   : > { %v1580_v11 = vld [vmem:[%s4352_s12 + $0x2340] sm:$0xff]  ;;  %1912 = vmatpush.msra.mxu1 %v1724_v8  ;;  %1952 = vmatpush.msra.mxu3 %v701_v10  ;;  %v589_v10 = vld [vmem:[%s4352_s12 + $0x448] sm:$0xff] }
  0xcc   : > { %v1716_v12 = vld [vmem:[%s4352_s12 + $0x2780] sm:$0xff]  ;;  %1894 = vmatpush.msra.mxu0 %v1580_v11  ;;  %1935 = vmatpush.msra.mxu2 %v549_v18  ;;  %v829_v13 = vld [vmem:[%s4352_s12 + $0xbc8] sm:$0xff] }
  0xcd   : > { %v1572_v16 = vld [vmem:[%s4352_s12 + $0x2300] sm:$0xff]  ;;  %1913 = vmatpush.msra.mxu1 %v1716_v12  ;;  %1953 = vmatpush.msra.mxu3 %v693_v14  ;;  %v1085_v12 = vld [vmem:[%s4352_s12 + $0x13c8] sm:$0xff] }
  0xce   : > { %v1708_v17 = vld [vmem:[%s4352_s12 + $0x2740] sm:$0xff]  ;;  %1895 = vmatpush.msra.mxu0 %v1572_v16  ;;  %1888 = vmatmul.f32.vlgmr.msrb.gmra.mxu3 %v4540_v21  ;;  %v581_v16 = vld [vmem:[%s4352_s12 + $0x408] sm:$0xff] }
  0xcf   : > { %v4536_v20 = vld [vmem:[%s4370_s17 + $0x20] sm:$0xff]  ;;  %1914 = vmatpush.msra.mxu1 %v1708_v17  ;;  %1954 = vmatpush.msra.mxu3 %v685_v19  ;;  %v4604_v17 = vld [vmem:[%s4370_s17 + $0x48] sm:$0xff] }
  0xd0   : > { %v1564_v22 = vld [vmem:[%s4352_s12 + $0x22c0] sm:$0xff]  ;;  %1828 = vmatmul.f32.vlgmr.msrb.gmra.mxu0 %v4536_v20  ;;  %1936 = vmatpush.msra.mxu2 %v541_v24  ;;  %v821_v18 = vld [vmem:[%s4352_s12 + $0xb88] sm:$0xff] }
  0xd1   : > { %v1700_v23 = vld [vmem:[%s4352_s12 + $0x2700] sm:$0xff]  ;;  %1896 = vmatpush.msra.mxu0 %v1564_v22  ;;  %1955 = vmatpush.msra.mxu3 %v677_v25  ;;  %v957_v19 = vld [vmem:[%s4352_s12 + $0xfc8] sm:$0xff] }
  0xd2   : > { %v1556_v27 = vld [vmem:[%s4352_s12 + $0x2280] sm:$0xff]  ;;  %1915 = vmatpush.msra.mxu1 %v1700_v23  ;;  %1937 = vmatpush.msra.mxu2 %v533_v29  ;;  %v1077_v22 = vld [vmem:[%s4352_s12 + $0x1388] sm:$0xff] }
  0xd3   : > { %v1692_v28 = vld [vmem:[%s4352_s12 + $0x26c0] sm:$0xff]  ;;  %1897 = vmatpush.msra.mxu0 %v1556_v27  ;;  %1956 = vmatpush.msra.mxu3 %v669_v30  ;;  %v1213_v23 = vld [vmem:[%s4352_s12 + $0x17c8] sm:$0xff] }
  0xd4   : > { %v1548_v31 = vld [vmem:[%s4352_s12 + $0x2240] sm:$0xff]  ;;  %1916 = vmatpush.msra.mxu1 %v1692_v28  ;;  %1938 = vmatpush.msra.mxu2 %v525_v33  ;;  %v813_v24 = vld [vmem:[%s4352_s12 + $0xb48] sm:$0xff] }
  0xd5   : > { %v1684_v32 = vld [vmem:[%s4352_s12 + $0x2680] sm:$0xff]  ;;  %1898 = vmatpush.msra.mxu0 %v1548_v31  ;;  %1957 = vmatpush.msra.mxu3 %v661_v34  ;;  %v949_v25 = vld [vmem:[%s4352_s12 + $0xf88] sm:$0xff] }
  0xd6   : > { %v1540_v35 = vld [vmem:[%s4352_s12 + $0x2200] sm:$0xff]  ;;  %1917 = vmatpush.msra.mxu1 %v1684_v32  ;;  %1939 = vmatpush.msra.mxu2 %v517_v37  ;;  %v1069_v27 = vld [vmem:[%s4352_s12 + $0x1348] sm:$0xff] }
  0xd7   : > { %v1676_v36 = vld [vmem:[%s4352_s12 + $0x2640] sm:$0xff]  ;;  %1899 = vmatpush.msra.mxu0 %v1540_v35  ;;  %1958 = vmatpush.msra.mxu3 %v653_v38  ;;  %v1205_v28 = vld [vmem:[%s4352_s12 + $0x1788] sm:$0xff] }
  0xd8   : > { %v1532_v39 = vld [vmem:[%s4352_s12 + $0x21c0] sm:$0xff]  ;;  %1918 = vmatpush.msra.mxu1 %v1676_v36  ;;  %1940 = vmatpush.msra.mxu2 %v509_v41  ;;  %v805_v29 = vld [vmem:[%s4352_s12 + $0xb08] sm:$0xff] }
  0xd9   : > { %v1668_v40 = vld [vmem:[%s4352_s12 + $0x2600] sm:$0xff]  ;;  %1900 = vmatpush.msra.mxu0 %v1532_v39  ;;  %1959 = vmatpush.msra.mxu3 %v645_v42  ;;  %v941_v30 = vld [vmem:[%s4352_s12 + $0xf48] sm:$0xff] }
  0xda   : > { %v1524_v43 = vld [vmem:[%s4352_s12 + $0x2180] sm:$0xff]  ;;  %1919 = vmatpush.msra.mxu1 %v1668_v40  ;;  %1941 = vmatpush.msra.mxu2 %v501_v45  ;;  %v1061_v31 = vld [vmem:[%s4352_s12 + $0x1308] sm:$0xff] }
  0xdb   : > { %v1660_v44 = vld [vmem:[%s4352_s12 + $0x25c0] sm:$0xff]  ;;  %1901 = vmatpush.msra.mxu0 %v1524_v43  ;;  %1960 = vmatpush.msra.mxu3 %v637_v46  ;;  %v1197_v32 = vld [vmem:[%s4352_s12 + $0x1748] sm:$0xff] }
  0xdc   : > { %v1516_v47 = vld [vmem:[%s4352_s12 + $0x2140] sm:$0xff]  ;;  %1920 = vmatpush.msra.mxu1 %v1660_v44  ;;  %1942 = vmatpush.msra.mxu2 %v493_v49  ;;  %v797_v33 = vld [vmem:[%s4352_s12 + $0xac8] sm:$0xff] }
  0xdd   : > { %v1652_v48 = vld [vmem:[%s4352_s12 + $0x2580] sm:$0xff]  ;;  %1902 = vmatpush.msra.mxu0 %v1516_v47  ;;  %1961 = vmatpush.msra.mxu3 %v629_v50  ;;  %v933_v34 = vld [vmem:[%s4352_s12 + $0xf08] sm:$0xff] }
  0xde   : > { %v1508_v51 = vld [vmem:[%s4352_s12 + $0x2100] sm:$0xff]  ;;  %1921 = vmatpush.msra.mxu1 %v1652_v48  ;;  %1943 = vmatpush.msra.mxu2 %v485_v53  ;;  %v1053_v35 = vld [vmem:[%s4352_s12 + $0x12c8] sm:$0xff] }
  0xdf   : > { %v1644_v52 = vld [vmem:[%s4352_s12 + $0x2540] sm:$0xff]  ;;  %1903 = vmatpush.msra.mxu0 %v1508_v51  ;;  %1962 = vmatpush.msra.mxu3 %v621_v54  ;;  %v1189_v36 = vld [vmem:[%s4352_s12 + $0x1708] sm:$0xff] }
  0xe0   : > { %v1500_v55 = vld [vmem:[%s4352_s12 + $0x20c0] sm:$0xff]  ;;  %1922 = vmatpush.msra.mxu1 %v1644_v52  ;;  %1944 = vmatpush.msra.mxu2 %v477_v57  ;;  %v789_v37 = vld [vmem:[%s4352_s12 + $0xa88] sm:$0xff] }
  0xe1   : > { %v1636_v56 = vld [vmem:[%s4352_s12 + $0x2500] sm:$0xff]  ;;  %1904 = vmatpush.msra.mxu0 %v1500_v55  ;;  %1963 = vmatpush.msra.mxu3 %v613_v58  ;;  %v925_v38 = vld [vmem:[%s4352_s12 + $0xec8] sm:$0xff] }
  0xe2   : > { %v1492_v60 = vld [vmem:[%s4352_s12 + $0x2080] sm:$0xff]  ;;  %1923 = vmatpush.msra.mxu1 %v1636_v56  ;;  %1945 = vmatpush.msra.mxu2 %v469_v62  ;;  %v1045_v39 = vld [vmem:[%s4352_s12 + $0x1288] sm:$0xff] }
  0xe3   : > { %v1628_v61 = vld [vmem:[%s4352_s12 + $0x24c0] sm:$0xff]  ;;  %1905 = vmatpush.msra.mxu0 %v1492_v60  ;;  %1964 = vmatpush.msra.mxu3 %v605_v63  ;;  %v1181_v40 = vld [vmem:[%s4352_s12 + $0x16c8] sm:$0xff] }
  0xe4   : > { %v1484_v2 = vld [vmem:[%s4352_s12 + $0x2040] sm:$0xff]  ;;  %1924 = vmatpush.msra.mxu1 %v1628_v61  ;;  %1946 = vmatpush.msra.mxu2 %v461_v4  ;;  %v781_v41 = vld [vmem:[%s4352_s12 + $0xa48] sm:$0xff] }
  0xe5   : > { %v1620_v3 = vld [vmem:[%s4352_s12 + $0x2480] sm:$0xff]  ;;  %1906 = vmatpush.msra.mxu0 %v1484_v2  ;;  %1965 = vmatpush.msra.mxu3 %v597_v5  ;;  %v917_v42 = vld [vmem:[%s4352_s12 + $0xe88] sm:$0xff] }
  0xe6   : > { %v1476_v7 = vld [vmem:[%s4352_s12 + $0x2000] sm:$0xff]  ;;  %1925 = vmatpush.msra.mxu1 %v1620_v3  ;;  %1947 = vmatpush.msra.mxu2 %v453_v9  ;;  %v1037_v43 = vld [vmem:[%s4352_s12 + $0x1248] sm:$0xff] }
  0xe7   : > { %v1612_v8 = vld [vmem:[%s4352_s12 + $0x2440] sm:$0xff]  ;;  %1907 = vmatpush.msra.mxu0 %v1476_v7  ;;  %1966 = vmatpush.msra.mxu3 %v589_v10  ;;  %v1173_v44 = vld [vmem:[%s4352_s12 + $0x1688] sm:$0xff] }
  0xe8   : > { %v4597_v11 = vld [vmem:[%s4370_s17 + $0x40] sm:$0xff]  ;;  %1926 = vmatpush.msra.mxu1 %v1612_v8  ;;  %2012 = vmatpush.msrb.mxu2 %v1085_v12  ;;  %v773_v45 = vld [vmem:[%s4352_s12 + $0xa08] sm:$0xff] }
  0xe9   : > { %v1604_v14 = vld [vmem:[%s4352_s12 + $0x2400] sm:$0xff]  ;;  %1908 = vmatmul.f32.vlgmr.msra.gmra.mxu0 %v4597_v11  ;;  %1967 = vmatpush.msra.mxu3 %v581_v16  ;;  %v909_v46 = vld [vmem:[%s4352_s12 + $0xe48] sm:$0xff] }
  0xea   : > { %1972 = vmatpush.msrb.mxu0 %v829_v13  ;;  %1927 = vmatpush.msra.mxu1 %v1604_v14  ;;  %v1029_v47 = vld [vmem:[%s4352_s12 + $0x1208] sm:$0xff] }
  0xeb   : > { %1928 = vmatmul.f32.vlgmr.msra.gmra.mxu1 %v4604_v17  ;;  %2013 = vmatpush.msrb.mxu2 %v1077_v22  ;;  %v1165_v48 = vld [vmem:[%s4352_s12 + $0x1648] sm:$0xff] }
  0xec   : > { %1973 = vmatpush.msrb.mxu0 %v821_v18  ;;  %1992 = vmatpush.msrb.mxu1 %v957_v19  ;;  %v765_v49 = vld [vmem:[%s4352_s12 + $0x9c8] sm:$0xff] }
  0xed   : > { %2032 = vmatpush.msrb.mxu3 %v1213_v23  ;;  %2014 = vmatpush.msrb.mxu2 %v1069_v27  ;;  %v901_v50 = vld [vmem:[%s4352_s12 + $0xe08] sm:$0xff] }
  0xee   : > { %1974 = vmatpush.msrb.mxu0 %v813_v24  ;;  %1993 = vmatpush.msrb.mxu1 %v949_v25  ;;  %v1021_v51 = vld [vmem:[%s4352_s12 + $0x11c8] sm:$0xff] }
  0xef   : > { %2033 = vmatpush.msrb.mxu3 %v1205_v28  ;;  %2015 = vmatpush.msrb.mxu2 %v1061_v31  ;;  %v1157_v52 = vld [vmem:[%s4352_s12 + $0x1608] sm:$0xff] }
  0xf0   : > { %1975 = vmatpush.msrb.mxu0 %v805_v29  ;;  %1994 = vmatpush.msrb.mxu1 %v941_v30  ;;  %v757_v53 = vld [vmem:[%s4352_s12 + $0x988] sm:$0xff] }
  0xf1   : > { %2034 = vmatpush.msrb.mxu3 %v1197_v32  ;;  %2016 = vmatpush.msrb.mxu2 %v1053_v35  ;;  %v893_v54 = vld [vmem:[%s4352_s12 + $0xdc8] sm:$0xff] }
  0xf2   : > { %1976 = vmatpush.msrb.mxu0 %v797_v33  ;;  %1995 = vmatpush.msrb.mxu1 %v933_v34  ;;  %v1013_v55 = vld [vmem:[%s4352_s12 + $0x1188] sm:$0xff] }
  0xf3   : > { %2035 = vmatpush.msrb.mxu3 %v1189_v36  ;;  %2017 = vmatpush.msrb.mxu2 %v1045_v39  ;;  %v1149_v56 = vld [vmem:[%s4352_s12 + $0x15c8] sm:$0xff] }
  0xf4   : > { %1977 = vmatpush.msrb.mxu0 %v789_v37  ;;  %1996 = vmatpush.msrb.mxu1 %v925_v38  ;;  %v749_v57 = vld [vmem:[%s4352_s12 + $0x948] sm:$0xff] }
  0xf5   : > { %2036 = vmatpush.msrb.mxu3 %v1181_v40  ;;  %2018 = vmatpush.msrb.mxu2 %v1037_v43  ;;  %v885_v58 = vld [vmem:[%s4352_s12 + $0xd88] sm:$0xff] }
  0xf6   : > { %1978 = vmatpush.msrb.mxu0 %v781_v41  ;;  %1997 = vmatpush.msrb.mxu1 %v917_v42  ;;  %v1005_v60 = vld [vmem:[%s4352_s12 + $0x1148] sm:$0xff] }
  0xf7   : > { %2037 = vmatpush.msrb.mxu3 %v1173_v44  ;;  %2019 = vmatpush.msrb.mxu2 %v1029_v47  ;;  %v1141_v61 = vld [vmem:[%s4352_s12 + $0x1588] sm:$0xff] }
  0xf8   : > { %1979 = vmatpush.msrb.mxu0 %v773_v45  ;;  %1998 = vmatpush.msrb.mxu1 %v909_v46  ;;  %v741_v62 = vld [vmem:[%s4352_s12 + $0x908] sm:$0xff] }
  0xf9   : > { %2038 = vmatpush.msrb.mxu3 %v1165_v48  ;;  %2020 = vmatpush.msrb.mxu2 %v1021_v51  ;;  %v877_v63 = vld [vmem:[%s4352_s12 + $0xd48] sm:$0xff] }
  0xfa   : > { %1980 = vmatpush.msrb.mxu0 %v765_v49  ;;  %1999 = vmatpush.msrb.mxu1 %v901_v50  ;;  %v997_v2 = vld [vmem:[%s4352_s12 + $0x1108] sm:$0xff] }
  0xfb   : > { %2039 = vmatpush.msrb.mxu3 %v1157_v52  ;;  %2021 = vmatpush.msrb.mxu2 %v1013_v55  ;;  %v1133_v3 = vld [vmem:[%s4352_s12 + $0x1548] sm:$0xff] }
  0xfc   : > { %1981 = vmatpush.msrb.mxu0 %v757_v53  ;;  %2000 = vmatpush.msrb.mxu1 %v893_v54  ;;  %v733_v4 = vld [vmem:[%s4352_s12 + $0x8c8] sm:$0xff] }
  0xfd   : > { %2040 = vmatpush.msrb.mxu3 %v1149_v56  ;;  %2022 = vmatpush.msrb.mxu2 %v1005_v60  ;;  %v869_v5 = vld [vmem:[%s4352_s12 + $0xd08] sm:$0xff] }
  0xfe   : > { %1982 = vmatpush.msrb.mxu0 %v749_v57  ;;  %2001 = vmatpush.msrb.mxu1 %v885_v58  ;;  %v989_v7 = vld [vmem:[%s4352_s12 + $0x10c8] sm:$0xff] }
  0xff   : > { %2041 = vmatpush.msrb.mxu3 %v1141_v61  ;;  %v1125_v8 = vld [vmem:[%s4352_s12 + $0x1508] sm:$0xff]  ;;  %2023 = vmatpush.msrb.mxu2 %v997_v2 }
 0x100   : > { %1983 = vmatpush.msrb.mxu0 %v741_v62  ;;  %2002 = vmatpush.msrb.mxu1 %v877_v63  ;;  %v725_v9 = vld [vmem:[%s4352_s12 + $0x888] sm:$0xff] }
 0x101   : > { %2042 = vmatpush.msrb.mxu3 %v1133_v3  ;;  %v861_v10 = vld [vmem:[%s4352_s12 + $0xcc8] sm:$0xff]  ;;  %2024 = vmatpush.msrb.mxu2 %v989_v7 }
 0x102   : > { %1984 = vmatpush.msrb.mxu0 %v733_v4  ;;  %2003 = vmatpush.msrb.mxu1 %v869_v5  ;;  %v981_v12 = vld [vmem:[%s4352_s12 + $0x1088] sm:$0xff] }
 0x103   : > { %v1117_v13 = vld [vmem:[%s4352_s12 + $0x14c8] sm:$0xff]  ;;  %2043 = vmatpush.msrb.mxu3 %v1125_v8  ;;  %2025 = vmatpush.msrb.mxu2 %v981_v12 }
 0x104   : > { %v717_v14 = vld [vmem:[%s4352_s12 + $0x848] sm:$0xff]  ;;  %1985 = vmatpush.msrb.mxu0 %v725_v9  ;;  %2004 = vmatpush.msrb.mxu1 %v861_v10 }
 0x105   : > { %v853_v16 = vld [vmem:[%s4352_s12 + $0xc88] sm:$0xff]  ;;  %2044 = vmatpush.msrb.mxu3 %v1117_v13  ;;  %1948 = vmatmul.f32.vlgmr.msra.gmra.mxu2 %v4504_v0 }
 0x106   : > { %v973_v18 = vld [vmem:[%s4352_s12 + $0x1048] sm:$0xff]  ;;  %1986 = vmatpush.msrb.mxu0 %v717_v14  ;;  %2005 = vmatpush.msrb.mxu1 %v853_v16 }
 0x107   : > { %v1109_v19 = vld [vmem:[%s4352_s12 + $0x1488] sm:$0xff]  ;;  %2026 = vmatpush.msrb.mxu2 %v973_v18  ;;  %1968 = vmatmul.f32.vlgmr.msra.gmra.mxu3 %v4516_v6 }
 0x108   : > { %v709_v22 = vld [vmem:[%s4352_s12 + $0x808] sm:$0xff]  ;;  %2045 = vmatpush.msrb.mxu3 %v1109_v19 }
 0x109   : > { %v845_v23 = vld [vmem:[%s4352_s12 + $0xc48] sm:$0xff]  ;;  %1987 = vmatpush.msrb.mxu0 %v709_v22 }
 0x10a   : > { %v965_v24 = vld [vmem:[%s4352_s12 + $0x1008] sm:$0xff]  ;;  %2006 = vmatpush.msrb.mxu1 %v845_v23  ;;  %1988 = vmatmul.f32.vlgmr.msrb.gmra.mxu0 %v4497_v59 }
 0x10b   : > { %v1101_v25 = vld [vmem:[%s4352_s12 + $0x1448] sm:$0xff]  ;;  %2027 = vmatpush.msrb.mxu2 %v965_v24 }
 0x10c   : > { %v1341_v27 = vld [vmem:[%s4352_s12 + $0x1bc8] sm:$0xff]  ;;  %2046 = vmatpush.msrb.mxu3 %v1101_v25 }
 0x10d   : > { %v1597_v28 = vld [vmem:[%s4352_s12 + $0x23c8] sm:$0xff]  ;;  %2052 = vmatpush.msra.mxu0 %v1341_v27  ;;  %2028 = vmatmul.f32.vlgmr.msrb.gmra.mxu2 %v4536_v20 }
 0x10e   : > { %v837_v29 = vld [vmem:[%s4352_s12 + $0xc08] sm:$0xff]  ;;  %2092 = vmatpush.msra.mxu2 %v1597_v28 }
 0x10f   : > { %v1093_v30 = vld [vmem:[%s4352_s12 + $0x1408] sm:$0xff]  ;;  %2007 = vmatpush.msrb.mxu1 %v837_v29 }
 0x110   : > { %v1333_v31 = vld [vmem:[%s4352_s12 + $0x1b88] sm:$0xff]  ;;  %2047 = vmatpush.msrb.mxu3 %v1093_v30  ;;  %2008 = vmatmul.f32.vlgmr.msrb.gmra.mxu1 %v4508_v1 }
 0x111   : > { %v1469_v32 = vld [vmem:[%s4352_s12 + $0x1fc8] sm:$0xff]  ;;  %2053 = vmatpush.msra.mxu0 %v1333_v31  ;;  %2048 = vmatmul.f32.vlgmr.msrb.gmra.mxu3 %v4548_v26  ;;  %v574_v31 = vld [vmem:[%s4352_s12 + $0x3d0] sm:$0xff] }
 0x112   : > { %v1589_v0 = vld [vmem:[%s4352_s12 + $0x2388] sm:$0xff]  ;;  %2072 = vmatpush.msra.mxu1 %v1469_v32  ;;  %v830_v32 = vld [vmem:[%s4352_s12 + $0xbd0] sm:$0xff] }
 0x113   : > { %v1725_v33 = vld [vmem:[%s4352_s12 + $0x27c8] sm:$0xff]  ;;  %2093 = vmatpush.msra.mxu2 %v1589_v0 }
 0x114   : > { %v1325_v34 = vld [vmem:[%s4352_s12 + $0x1b48] sm:$0xff]  ;;  %2112 = vmatpush.msra.mxu3 %v1725_v33 }
 0x115   : > { %v1461_v35 = vld [vmem:[%s4352_s12 + $0x1f88] sm:$0xff]  ;;  %2054 = vmatpush.msra.mxu0 %v1325_v34  ;;  %v566_v34 = vld [vmem:[%s4352_s12 + $0x390] sm:$0xff] }
 0x116   : > { %v1581_v36 = vld [vmem:[%s4352_s12 + $0x2348] sm:$0xff]  ;;  %2073 = vmatpush.msra.mxu1 %v1461_v35  ;;  %v702_v35 = vld [vmem:[%s4352_s12 + $0x7d0] sm:$0xff] }
 0x117   : > { %v1717_v37 = vld [vmem:[%s4352_s12 + $0x2788] sm:$0xff]  ;;  %2094 = vmatpush.msra.mxu2 %v1581_v36  ;;  %v822_v36 = vld [vmem:[%s4352_s12 + $0xb90] sm:$0xff] }
 0x118   : > { %v1317_v6 = vld [vmem:[%s4352_s12 + $0x1b08] sm:$0xff]  ;;  %2113 = vmatpush.msra.mxu3 %v1717_v37  ;;  %v958_v37 = vld [vmem:[%s4352_s12 + $0xfd0] sm:$0xff] }
 0x119   : > { %v1453_v38 = vld [vmem:[%s4352_s12 + $0x1f48] sm:$0xff]  ;;  %2055 = vmatpush.msra.mxu0 %v1317_v6  ;;  %v814_v6 = vld [vmem:[%s4352_s12 + $0xb50] sm:$0xff] }
 0x11a   : > { %v1573_v39 = vld [vmem:[%s4352_s12 + $0x2308] sm:$0xff]  ;;  %2074 = vmatpush.msra.mxu1 %v1453_v38  ;;  %v950_v38 = vld [vmem:[%s4352_s12 + $0xf90] sm:$0xff] }
 0x11b   : > { %v1709_v40 = vld [vmem:[%s4352_s12 + $0x2748] sm:$0xff]  ;;  %2095 = vmatpush.msra.mxu2 %v1573_v39  ;;  %v550_v39 = vld [vmem:[%s4352_s12 + $0x310] sm:$0xff] }
 0x11c   : > { %v1309_v41 = vld [vmem:[%s4352_s12 + $0x1ac8] sm:$0xff]  ;;  %2114 = vmatpush.msra.mxu3 %v1709_v40  ;;  %v686_v40 = vld [vmem:[%s4352_s12 + $0x750] sm:$0xff] }
 0x11d   : > { %v1445_v42 = vld [vmem:[%s4352_s12 + $0x1f08] sm:$0xff]  ;;  %2056 = vmatpush.msra.mxu0 %v1309_v41  ;;  %v542_v41 = vld [vmem:[%s4352_s12 + $0x2d0] sm:$0xff] }
 0x11e   : > { %v1565_v43 = vld [vmem:[%s4352_s12 + $0x22c8] sm:$0xff]  ;;  %2075 = vmatpush.msra.mxu1 %v1445_v42  ;;  %v678_v42 = vld [vmem:[%s4352_s12 + $0x710] sm:$0xff] }
 0x11f   : > { %v1701_v44 = vld [vmem:[%s4352_s12 + $0x2708] sm:$0xff]  ;;  %2096 = vmatpush.msra.mxu2 %v1565_v43  ;;  %v798_v43 = vld [vmem:[%s4352_s12 + $0xad0] sm:$0xff] }
 0x120   : > { %v1301_v20 = vld [vmem:[%s4352_s12 + $0x1a88] sm:$0xff]  ;;  %2115 = vmatpush.msra.mxu3 %v1701_v44  ;;  %v934_v44 = vld [vmem:[%s4352_s12 + $0xf10] sm:$0xff] }
 0x121   : > { %v1437_v45 = vld [vmem:[%s4352_s12 + $0x1ec8] sm:$0xff]  ;;  %2057 = vmatpush.msra.mxu0 %v1301_v20  ;;  %v534_v20 = vld [vmem:[%s4352_s12 + $0x290] sm:$0xff] }
 0x122   : > { %v1557_v46 = vld [vmem:[%s4352_s12 + $0x2288] sm:$0xff]  ;;  %2076 = vmatpush.msra.mxu1 %v1437_v45  ;;  %v670_v45 = vld [vmem:[%s4352_s12 + $0x6d0] sm:$0xff] }
 0x123   : > { %v1693_v47 = vld [vmem:[%s4352_s12 + $0x26c8] sm:$0xff]  ;;  %2097 = vmatpush.msra.mxu2 %v1557_v46  ;;  %v790_v46 = vld [vmem:[%s4352_s12 + $0xa90] sm:$0xff] }
 0x124   : > { %v1293_v59 = vld [vmem:[%s4352_s12 + $0x1a48] sm:$0xff]  ;;  %2116 = vmatpush.msra.mxu3 %v1693_v47  ;;  %v926_v47 = vld [vmem:[%s4352_s12 + $0xed0] sm:$0xff] }
 0x125   : > { %v1429_v48 = vld [vmem:[%s4352_s12 + $0x1e88] sm:$0xff]  ;;  %2058 = vmatpush.msra.mxu0 %v1293_v59  ;;  %v526_v59 = vld [vmem:[%s4352_s12 + $0x250] sm:$0xff] }
 0x126   : > { %v1549_v26 = vld [vmem:[%s4352_s12 + $0x2248] sm:$0xff]  ;;  %2077 = vmatpush.msra.mxu1 %v1429_v48  ;;  %v662_v48 = vld [vmem:[%s4352_s12 + $0x690] sm:$0xff] }
 0x127   : > { %v1685_v49 = vld [vmem:[%s4352_s12 + $0x2688] sm:$0xff]  ;;  %2098 = vmatpush.msra.mxu2 %v1549_v26  ;;  %v782_v26 = vld [vmem:[%s4352_s12 + $0xa50] sm:$0xff] }
 0x128   : > { %v1285_v50 = vld [vmem:[%s4352_s12 + $0x1a08] sm:$0xff]  ;;  %2117 = vmatpush.msra.mxu3 %v1685_v49  ;;  %v918_v49 = vld [vmem:[%s4352_s12 + $0xe90] sm:$0xff] }
 0x129   : > { %v1421_v51 = vld [vmem:[%s4352_s12 + $0x1e48] sm:$0xff]  ;;  %2059 = vmatpush.msra.mxu0 %v1285_v50  ;;  %v518_v50 = vld [vmem:[%s4352_s12 + $0x210] sm:$0xff] }
 0x12a   : > { %v1541_v52 = vld [vmem:[%s4352_s12 + $0x2208] sm:$0xff]  ;;  %2078 = vmatpush.msra.mxu1 %v1421_v51  ;;  %v654_v51 = vld [vmem:[%s4352_s12 + $0x650] sm:$0xff] }
 0x12b   : > { %v1677_v1 = vld [vmem:[%s4352_s12 + $0x2648] sm:$0xff]  ;;  %2099 = vmatpush.msra.mxu2 %v1541_v52  ;;  %v774_v52 = vld [vmem:[%s4352_s12 + $0xa10] sm:$0xff] }
 0x12c   : > { %v1277_v53 = vld [vmem:[%s4352_s12 + $0x19c8] sm:$0xff]  ;;  %2118 = vmatpush.msra.mxu3 %v1677_v1  ;;  %v910_v1 = vld [vmem:[%s4352_s12 + $0xe50] sm:$0xff] }
 0x12d   : > { %v1413_v54 = vld [vmem:[%s4352_s12 + $0x1e08] sm:$0xff]  ;;  %2060 = vmatpush.msra.mxu0 %v1277_v53  ;;  %v510_v53 = vld [vmem:[%s4352_s12 + $0x1d0] sm:$0xff] }
 0x12e   : > { %v1533_v55 = vld [vmem:[%s4352_s12 + $0x21c8] sm:$0xff]  ;;  %2079 = vmatpush.msra.mxu1 %v1413_v54  ;;  %v646_v54 = vld [vmem:[%s4352_s12 + $0x610] sm:$0xff] }
 0x12f   : > { %v1669_v56 = vld [vmem:[%s4352_s12 + $0x2608] sm:$0xff]  ;;  %2100 = vmatpush.msra.mxu2 %v1533_v55  ;;  %v766_v55 = vld [vmem:[%s4352_s12 + $0x9d0] sm:$0xff] }
 0x130   : > { %v1269_v57 = vld [vmem:[%s4352_s12 + $0x1988] sm:$0xff]  ;;  %2119 = vmatpush.msra.mxu3 %v1669_v56  ;;  %v902_v56 = vld [vmem:[%s4352_s12 + $0xe10] sm:$0xff] }
 0x131   : > { %v1405_v58 = vld [vmem:[%s4352_s12 + $0x1dc8] sm:$0xff]  ;;  %2061 = vmatpush.msra.mxu0 %v1269_v57  ;;  %v502_v57 = vld [vmem:[%s4352_s12 + $0x190] sm:$0xff] }
 0x132   : > { %v1525_v60 = vld [vmem:[%s4352_s12 + $0x2188] sm:$0xff]  ;;  %2080 = vmatpush.msra.mxu1 %v1405_v58  ;;  %v638_v58 = vld [vmem:[%s4352_s12 + $0x5d0] sm:$0xff] }
 0x133   : > { %v1661_v61 = vld [vmem:[%s4352_s12 + $0x25c8] sm:$0xff]  ;;  %2101 = vmatpush.msra.mxu2 %v1525_v60  ;;  %v758_v60 = vld [vmem:[%s4352_s12 + $0x990] sm:$0xff] }
 0x134   : > { %v1261_v62 = vld [vmem:[%s4352_s12 + $0x1948] sm:$0xff]  ;;  %2120 = vmatpush.msra.mxu3 %v1661_v61  ;;  %v894_v61 = vld [vmem:[%s4352_s12 + $0xdd0] sm:$0xff] }
 0x135   : > { %v1397_v63 = vld [vmem:[%s4352_s12 + $0x1d88] sm:$0xff]  ;;  %2062 = vmatpush.msra.mxu0 %v1261_v62  ;;  %v494_v62 = vld [vmem:[%s4352_s12 + $0x150] sm:$0xff] }
 0x136   : > { %v1517_v2 = vld [vmem:[%s4352_s12 + $0x2148] sm:$0xff]  ;;  %2081 = vmatpush.msra.mxu1 %v1397_v63  ;;  %v630_v63 = vld [vmem:[%s4352_s12 + $0x590] sm:$0xff] }
 0x137   : > { %v1653_v3 = vld [vmem:[%s4352_s12 + $0x2588] sm:$0xff]  ;;  %2102 = vmatpush.msra.mxu2 %v1517_v2  ;;  %v750_v2 = vld [vmem:[%s4352_s12 + $0x950] sm:$0xff] }
 0x138   : > { %v1253_v4 = vld [vmem:[%s4352_s12 + $0x1908] sm:$0xff]  ;;  %2121 = vmatpush.msra.mxu3 %v1653_v3  ;;  %v886_v3 = vld [vmem:[%s4352_s12 + $0xd90] sm:$0xff] }
 0x139   : > { %v1389_v5 = vld [vmem:[%s4352_s12 + $0x1d48] sm:$0xff]  ;;  %2063 = vmatpush.msra.mxu0 %v1253_v4  ;;  %v486_v4 = vld [vmem:[%s4352_s12 + $0x110] sm:$0xff] }
 0x13a   : > { %v1509_v7 = vld [vmem:[%s4352_s12 + $0x2108] sm:$0xff]  ;;  %2082 = vmatpush.msra.mxu1 %v1389_v5  ;;  %v622_v5 = vld [vmem:[%s4352_s12 + $0x550] sm:$0xff] }
 0x13b   : > { %v1645_v8 = vld [vmem:[%s4352_s12 + $0x2548] sm:$0xff]  ;;  %2103 = vmatpush.msra.mxu2 %v1509_v7  ;;  %v742_v7 = vld [vmem:[%s4352_s12 + $0x910] sm:$0xff] }
 0x13c   : > { %v1245_v9 = vld [vmem:[%s4352_s12 + $0x18c8] sm:$0xff]  ;;  %2122 = vmatpush.msra.mxu3 %v1645_v8  ;;  %v878_v8 = vld [vmem:[%s4352_s12 + $0xd50] sm:$0xff] }
 0x13d   : > { %v1381_v10 = vld [vmem:[%s4352_s12 + $0x1d08] sm:$0xff]  ;;  %2064 = vmatpush.msra.mxu0 %v1245_v9  ;;  %v478_v9 = vld [vmem:[%s4352_s12 + $0xd0] sm:$0xff] }
 0x13e   : > { %v1501_v12 = vld [vmem:[%s4352_s12 + $0x20c8] sm:$0xff]  ;;  %2083 = vmatpush.msra.mxu1 %v1381_v10  ;;  %v614_v10 = vld [vmem:[%s4352_s12 + $0x510] sm:$0xff] }
 0x13f   : > { %v1637_v13 = vld [vmem:[%s4352_s12 + $0x2508] sm:$0xff]  ;;  %2104 = vmatpush.msra.mxu2 %v1501_v12  ;;  %v734_v12 = vld [vmem:[%s4352_s12 + $0x8d0] sm:$0xff] }
 0x140   : > { %v1237_v14 = vld [vmem:[%s4352_s12 + $0x1888] sm:$0xff]  ;;  %2123 = vmatpush.msra.mxu3 %v1637_v13  ;;  %v870_v13 = vld [vmem:[%s4352_s12 + $0xd10] sm:$0xff] }
 0x141   : > { %v1373_v16 = vld [vmem:[%s4352_s12 + $0x1cc8] sm:$0xff]  ;;  %2065 = vmatpush.msra.mxu0 %v1237_v14  ;;  %v470_v14 = vld [vmem:[%s4352_s12 + $0x90] sm:$0xff] }
 0x142   : > { %v1493_v18 = vld [vmem:[%s4352_s12 + $0x2088] sm:$0xff]  ;;  %2084 = vmatpush.msra.mxu1 %v1373_v16  ;;  %v606_v16 = vld [vmem:[%s4352_s12 + $0x4d0] sm:$0xff] }
 0x143   : > { %v1629_v19 = vld [vmem:[%s4352_s12 + $0x24c8] sm:$0xff]  ;;  %2105 = vmatpush.msra.mxu2 %v1493_v18  ;;  %v726_v18 = vld [vmem:[%s4352_s12 + $0x890] sm:$0xff] }
 0x144   : > { %v1229_v22 = vld [vmem:[%s4352_s12 + $0x1848] sm:$0xff]  ;;  %2124 = vmatpush.msra.mxu3 %v1629_v19  ;;  %v862_v19 = vld [vmem:[%s4352_s12 + $0xcd0] sm:$0xff] }
 0x145   : > { %v1365_v23 = vld [vmem:[%s4352_s12 + $0x1c88] sm:$0xff]  ;;  %2066 = vmatpush.msra.mxu0 %v1229_v22  ;;  %v462_v22 = vld [vmem:[%s4352_s12 + $0x50] sm:$0xff] }
 0x146   : > { %v1485_v24 = vld [vmem:[%s4352_s12 + $0x2048] sm:$0xff]  ;;  %2085 = vmatpush.msra.mxu1 %v1365_v23  ;;  %v598_v23 = vld [vmem:[%s4352_s12 + $0x490] sm:$0xff] }
 0x147   : > { %v1621_v25 = vld [vmem:[%s4352_s12 + $0x2488] sm:$0xff]  ;;  %2106 = vmatpush.msra.mxu2 %v1485_v24  ;;  %v718_v24 = vld [vmem:[%s4352_s12 + $0x850] sm:$0xff] }
 0x148   : > { %v1221_v27 = vld [vmem:[%s4352_s12 + $0x1808] sm:$0xff]  ;;  %2125 = vmatpush.msra.mxu3 %v1621_v25  ;;  %v854_v25 = vld [vmem:[%s4352_s12 + $0xc90] sm:$0xff] }
 0x149   : > { %v1357_v28 = vld [vmem:[%s4352_s12 + $0x1c48] sm:$0xff]  ;;  %2067 = vmatpush.msra.mxu0 %v1221_v27  ;;  %v454_v27 = vld [vmem:[%s4352_s12 + $0x10] sm:$0xff] }
 0x14a   : > { %v1477_v29 = vld [vmem:[%s4352_s12 + $0x2008] sm:$0xff]  ;;  %2086 = vmatpush.msra.mxu1 %v1357_v28  ;;  %2068 = vmatmul.f32.vlgmr.msra.gmra.mxu0 %v4529_v15  ;;  %v558_v15 = vld [vmem:[%s4352_s12 + $0x350] sm:$0xff] }
 0x14b   : > { %v1613_v30 = vld [vmem:[%s4352_s12 + $0x2448] sm:$0xff]  ;;  %2107 = vmatpush.msra.mxu2 %v1477_v29  ;;  %2132 = vmatpush.msrb.mxu0 %v574_v31  ;;  %v590_v28 = vld [vmem:[%s4352_s12 + $0x450] sm:$0xff]  ;;  %v1769_v29 = vpop.f32.mrf.mxu1 }
 0x14c   : > { %2126 = vmatpush.msra.mxu3 %v1613_v30  ;;  %v1349_v0 = vld [vmem:[%s4352_s12 + $0x1c08] sm:$0xff]  ;;  %2108 = vmatmul.f32.vlgmr.msra.gmra.mxu2 %v4597_v11  ;;  %v694_v11 = vld [vmem:[%s4352_s12 + $0x790] sm:$0xff] }
 0x14d   : > { %v1605_v33 = vld [vmem:[%s4352_s12 + $0x2408] sm:$0xff]  ;;  %2172 = vmatpush.msrb.mxu2 %v830_v32  ;;  %2087 = vmatpush.msra.mxu1 %v1349_v0  ;;  %v710_v30 = vld [vmem:[%s4352_s12 + $0x810] sm:$0xff] }
 0x14e   : > { %2127 = vmatpush.msra.mxu3 %v1605_v33  ;;  %2088 = vmatmul.f32.vlgmr.msra.gmra.mxu1 %v4540_v21  ;;  %v806_v21 = vld [vmem:[%s4352_s12 + $0xb10] sm:$0xff]  ;;  %v1749_v33 = vpop.f32.mrf.mxu0 }
 0x14f   : > { %2128 = vmatmul.f32.vlgmr.msra.gmra.mxu3 %v4604_v17  ;;  %2133 = vmatpush.msrb.mxu0 %v566_v34  ;;  %v942_v17 = vld [vmem:[%s4352_s12 + $0xf50] sm:$0xff] }
 0x150   : > { %2152 = vmatpush.msrb.mxu1 %v702_v35  ;;  %2173 = vmatpush.msrb.mxu2 %v822_v36  ;;  %v846_v31 = vld [vmem:[%s4352_s12 + $0xc50] sm:$0xff]  ;;  %v1770_v36 = vadd.f32 %v1769_v29, %v1749_v33 }
 0x151   : > { %2192 = vmatpush.msrb.mxu3 %v958_v37  ;;  %2134 = vmatpush.msrb.mxu0 %v558_v15  ;;  %v1086_v32 = vld [vmem:[%s4352_s12 + $0x13d0] sm:$0xff] }
 0x152   : > { %2153 = vmatpush.msrb.mxu1 %v694_v11  ;;  %2174 = vmatpush.msrb.mxu2 %v814_v6  ;;  %v1342_v0 = vld [vmem:[%s4352_s12 + $0x1bd0] sm:$0xff]  ;;  %v1789_v11 = vpop.f32.mrf.mxu2 }
 0x153   : > { %2193 = vmatpush.msrb.mxu3 %v950_v38  ;;  %2135 = vmatpush.msrb.mxu0 %v550_v39  ;;  %v582_v34 = vld [vmem:[%s4352_s12 + $0x410] sm:$0xff] }
 0x154   : > { %2154 = vmatpush.msrb.mxu1 %v686_v40  ;;  %2175 = vmatpush.msrb.mxu2 %v806_v21  ;;  %v838_v35 = vld [vmem:[%s4352_s12 + $0xc10] sm:$0xff] }
 0x155   : > { %2194 = vmatpush.msrb.mxu3 %v942_v17  ;;  %2136 = vmatpush.msrb.mxu0 %v542_v41  ;;  %v1078_v37 = vld [vmem:[%s4352_s12 + $0x1390] sm:$0xff]  ;;  %v1790_v41 = vadd.f32 %v1789_v11, %v1770_v36 }
 0x156   : > { %2155 = vmatpush.msrb.mxu1 %v678_v42  ;;  %2176 = vmatpush.msrb.mxu2 %v798_v43  ;;  %v1214_v15 = vld [vmem:[%s4352_s12 + $0x17d0] sm:$0xff] }
 0x157   : > { %2195 = vmatpush.msrb.mxu3 %v934_v44  ;;  %2137 = vmatpush.msrb.mxu0 %v534_v20  ;;  %v1334_v6 = vld [vmem:[%s4352_s12 + $0x1b90] sm:$0xff]  ;;  %v1809_v44 = vpop.f32.mrf.mxu3 }
 0x158   : > { %2156 = vmatpush.msrb.mxu1 %v670_v45  ;;  %2177 = vmatpush.msrb.mxu2 %v790_v46  ;;  %v1470_v38 = vld [vmem:[%s4352_s12 + $0x1fd0] sm:$0xff] }
 0x159   : > { %2196 = vmatpush.msrb.mxu3 %v926_v47  ;;  %2138 = vmatpush.msrb.mxu0 %v526_v59  ;;  %v1070_v39 = vld [vmem:[%s4352_s12 + $0x1350] sm:$0xff]  ;;  %v1810_v59 = vadd.f32 %v1809_v44, %v1790_v41 }
 0x15a   : > { %2157 = vmatpush.msrb.mxu1 %v662_v48  ;;  %2178 = vmatpush.msrb.mxu2 %v782_v26  ;;  %v1206_v40 = vld [vmem:[%s4352_s12 + $0x1790] sm:$0xff] }
 0x15b   : > { %2197 = vmatpush.msrb.mxu3 %v918_v49  ;;  %2139 = vmatpush.msrb.mxu0 %v518_v50  ;;  %v1326_v21 = vld [vmem:[%s4352_s12 + $0x1b50] sm:$0xff]  ;;  %v1829_v49 = vpop.f32.mrf.mxu0 }
 0x15c   : > { %2158 = vmatpush.msrb.mxu1 %v654_v51  ;;  %2179 = vmatpush.msrb.mxu2 %v774_v52  ;;  %v1462_v17 = vld [vmem:[%s4352_s12 + $0x1f90] sm:$0xff] }
 0x15d   : > { %2198 = vmatpush.msrb.mxu3 %v910_v1  ;;  %2140 = vmatpush.msrb.mxu0 %v510_v53  ;;  %v1062_v42 = vld [vmem:[%s4352_s12 + $0x1310] sm:$0xff] }
 0x15e   : > { %2159 = vmatpush.msrb.mxu1 %v646_v54  ;;  %2180 = vmatpush.msrb.mxu2 %v766_v55  ;;  %v1198_v43 = vld [vmem:[%s4352_s12 + $0x1750] sm:$0xff]  ;;  %v1830_v55 = vadd.f32 %v1829_v49, %v1810_v59  ;;  %v4883_v49 = vld [vmem:[%s4370_s17 + $0x18] sm:$0xff] }
 0x15f   : > { %2199 = vmatpush.msrb.mxu3 %v902_v56  ;;  %2141 = vmatpush.msrb.mxu0 %v502_v57  ;;  %v1318_v20 = vld [vmem:[%s4352_s12 + $0x1b10] sm:$0xff] }
 0x160   : > { %2160 = vmatpush.msrb.mxu1 %v638_v58  ;;  %2181 = vmatpush.msrb.mxu2 %v758_v60  ;;  %v1454_v45 = vld [vmem:[%s4352_s12 + $0x1f50] sm:$0xff]  ;;  %v1849_v58 = vpop.f32.mrf.mxu1 }
 0x161   : > { %2200 = vmatpush.msrb.mxu3 %v894_v61  ;;  %2142 = vmatpush.msrb.mxu0 %v494_v62  ;;  %v1054_v46 = vld [vmem:[%s4352_s12 + $0x12d0] sm:$0xff] }
 0x162   : > { %2161 = vmatpush.msrb.mxu1 %v630_v63  ;;  %2182 = vmatpush.msrb.mxu2 %v750_v2  ;;  %v1190_v47 = vld [vmem:[%s4352_s12 + $0x1710] sm:$0xff] }
 0x163   : > { %2201 = vmatpush.msrb.mxu3 %v886_v3  ;;  %2143 = vmatpush.msrb.mxu0 %v486_v4  ;;  %v1310_v48 = vld [vmem:[%s4352_s12 + $0x1ad0] sm:$0xff]  ;;  %v1850_v4 = vadd.f32 %v1849_v58, %v1830_v55 }
 0x164   : > { %2162 = vmatpush.msrb.mxu1 %v622_v5  ;;  %2183 = vmatpush.msrb.mxu2 %v742_v7  ;;  %v1446_v26 = vld [vmem:[%s4352_s12 + $0x1f10] sm:$0xff] }
 0x165   : > { %2202 = vmatpush.msrb.mxu3 %v878_v8  ;;  %2144 = vmatpush.msrb.mxu0 %v478_v9  ;;  %v1046_v50 = vld [vmem:[%s4352_s12 + $0x1290] sm:$0xff]  ;;  %v1869_v8 = vpop.f32.mrf.mxu2 }
 0x166   : > { %2163 = vmatpush.msrb.mxu1 %v614_v10  ;;  %2184 = vmatpush.msrb.mxu2 %v734_v12  ;;  %v1182_v51 = vld [vmem:[%s4352_s12 + $0x16d0] sm:$0xff] }
 0x167   : > { %2203 = vmatpush.msrb.mxu3 %v870_v13  ;;  %2145 = vmatpush.msrb.mxu0 %v470_v14  ;;  %v1302_v52 = vld [vmem:[%s4352_s12 + $0x1a90] sm:$0xff] }
 0x168   : > { %2164 = vmatpush.msrb.mxu1 %v606_v16  ;;  %2185 = vmatpush.msrb.mxu2 %v726_v18  ;;  %v1438_v1 = vld [vmem:[%s4352_s12 + $0x1ed0] sm:$0xff]  ;;  %v1870_v18 = vadd.f32 %v1869_v8, %v1850_v4  ;;  %v543_v4 = vld [vmem:[%s4352_s12 + $0x2d8] sm:$0xff] }
 0x169   : > { %2204 = vmatpush.msrb.mxu3 %v862_v19  ;;  %2146 = vmatpush.msrb.mxu0 %v462_v22  ;;  %v1038_v53 = vld [vmem:[%s4352_s12 + $0x1250] sm:$0xff]  ;;  %v4915_v8 = vld [vmem:[%s4370_s17 + $0x38] sm:$0xff] }
 0x16a   : > { %2165 = vmatpush.msrb.mxu1 %v598_v23  ;;  %2186 = vmatpush.msrb.mxu2 %v718_v24  ;;  %v1174_v54 = vld [vmem:[%s4352_s12 + $0x1690] sm:$0xff]  ;;  %v1889_v23 = vpop.f32.mrf.mxu3 }
 0x16b   : > { %2205 = vmatpush.msrb.mxu3 %v854_v25  ;;  %2147 = vmatpush.msrb.mxu0 %v454_v27  ;;  %v1294_v56 = vld [vmem:[%s4352_s12 + $0x1a50] sm:$0xff] }
 0x16c   : > { %2166 = vmatpush.msrb.mxu1 %v590_v28  ;;  %2187 = vmatpush.msrb.mxu2 %v710_v30  ;;  %v1430_v57 = vld [vmem:[%s4352_s12 + $0x1e90] sm:$0xff] }
 0x16d   : > { %2206 = vmatpush.msrb.mxu3 %v846_v31  ;;  %2212 = vmatpush.msra.mxu0 %v1086_v32  ;;  %v1030_v60 = vld [vmem:[%s4352_s12 + $0x1210] sm:$0xff]  ;;  %v1890_v31 = vadd.f32 %v1889_v23, %v1870_v18 }
 0x16e   : > { %2252 = vmatpush.msra.mxu2 %v1342_v0  ;;  %2167 = vmatpush.msrb.mxu1 %v582_v34  ;;  %v1166_v61 = vld [vmem:[%s4352_s12 + $0x1650] sm:$0xff] }
 0x16f   : > { %2207 = vmatpush.msrb.mxu3 %v838_v35  ;;  %2213 = vmatpush.msra.mxu0 %v1078_v37  ;;  %v1286_v62 = vld [vmem:[%s4352_s12 + $0x1a10] sm:$0xff]  ;;  %v1909_v35 = vpop.f32.mrf.mxu0 }
 0x170   : > { %2232 = vmatpush.msra.mxu1 %v1214_v15  ;;  %2253 = vmatpush.msra.mxu2 %v1334_v6  ;;  %v1422_v63 = vld [vmem:[%s4352_s12 + $0x1e50] sm:$0xff]  ;;  %v1910_v15 = vadd.f32 %v1909_v35, %v1890_v31  ;;  %v647_v31 = vld [vmem:[%s4352_s12 + $0x618] sm:$0xff] }
 0x171   : > { %2272 = vmatpush.msra.mxu3 %v1470_v38  ;;  %2214 = vmatpush.msra.mxu0 %v1070_v39  ;;  %v1022_v2 = vld [vmem:[%s4352_s12 + $0x11d0] sm:$0xff]  ;;  %v1929_v39 = vpop.f32.mrf.mxu1 }
 0x172   : > { %2233 = vmatpush.msra.mxu1 %v1206_v40  ;;  %2254 = vmatpush.msra.mxu2 %v1326_v21  ;;  %v1158_v3 = vld [vmem:[%s4352_s12 + $0x1610] sm:$0xff] }
 0x173   : > { %2273 = vmatpush.msra.mxu3 %v1462_v17  ;;  %2215 = vmatpush.msra.mxu0 %v1062_v42  ;;  %v1278_v5 = vld [vmem:[%s4352_s12 + $0x19d0] sm:$0xff]  ;;  %v1930_v17 = vadd.f32 %v1929_v39, %v1910_v15  ;;  %v631_v15 = vld [vmem:[%s4352_s12 + $0x598] sm:$0xff] }
 0x174   : > { %2234 = vmatpush.msra.mxu1 %v1198_v43  ;;  %2255 = vmatpush.msra.mxu2 %v1318_v20  ;;  %v1414_v7 = vld [vmem:[%s4352_s12 + $0x1e10] sm:$0xff]  ;;  %v623_v39 = vld [vmem:[%s4352_s12 + $0x558] sm:$0xff] }
 0x175   : > { %2274 = vmatpush.msra.mxu3 %v1454_v45  ;;  %2216 = vmatpush.msra.mxu0 %v1054_v46  ;;  %v1014_v9 = vld [vmem:[%s4352_s12 + $0x1190] sm:$0xff] }
 0x176   : > { %2235 = vmatpush.msra.mxu1 %v1190_v47  ;;  %2256 = vmatpush.msra.mxu2 %v1310_v48  ;;  %v1150_v10 = vld [vmem:[%s4352_s12 + $0x15d0] sm:$0xff]  ;;  %v575_v47 = vld [vmem:[%s4352_s12 + $0x3d8] sm:$0xff]  ;;  %v4878_v48 = vld [vmem:[%s4370_s17] sm:$0xff] }
 0x177   : > { %2275 = vmatpush.msra.mxu3 %v1446_v26  ;;  %2217 = vmatpush.msra.mxu0 %v1046_v50  ;;  %v1270_v12 = vld [vmem:[%s4352_s12 + $0x1990] sm:$0xff] }
 0x178   : > { %2236 = vmatpush.msra.mxu1 %v1182_v51  ;;  %2257 = vmatpush.msra.mxu2 %v1302_v52  ;;  %v1406_v13 = vld [vmem:[%s4352_s12 + $0x1dd0] sm:$0xff]  ;;  %v567_v52 = vld [vmem:[%s4352_s12 + $0x398] sm:$0xff] }
 0x179   : > { %2276 = vmatpush.msra.mxu3 %v1438_v1  ;;  %2218 = vmatpush.msra.mxu0 %v1038_v53  ;;  %v1006_v14 = vld [vmem:[%s4352_s12 + $0x1150] sm:$0xff]  ;;  %v703_v1 = vld [vmem:[%s4352_s12 + $0x7d8] sm:$0xff]  ;;  %v4891_v53 = vld [vmem:[%s4370_s17 + $0x8] sm:$0xff] }
 0x17a   : > { %2237 = vmatpush.msra.mxu1 %v1174_v54  ;;  %2258 = vmatpush.msra.mxu2 %v1294_v56  ;;  %v1142_v16 = vld [vmem:[%s4352_s12 + $0x1590] sm:$0xff]  ;;  %v559_v56 = vld [vmem:[%s4352_s12 + $0x358] sm:$0xff] }
 0x17b   : > { %2277 = vmatpush.msra.mxu3 %v1430_v57  ;;  %2219 = vmatpush.msra.mxu0 %v1030_v60  ;;  %v1262_v19 = vld [vmem:[%s4352_s12 + $0x1950] sm:$0xff]  ;;  %v695_v57 = vld [vmem:[%s4352_s12 + $0x798] sm:$0xff] }
 0x17c   : > { %2238 = vmatpush.msra.mxu1 %v1166_v61  ;;  %2259 = vmatpush.msra.mxu2 %v1286_v62  ;;  %v1398_v22 = vld [vmem:[%s4352_s12 + $0x1d90] sm:$0xff]  ;;  %v551_v61 = vld [vmem:[%s4352_s12 + $0x318] sm:$0xff] }
 0x17d   : > { %2278 = vmatpush.msra.mxu3 %v1422_v63  ;;  %2220 = vmatpush.msra.mxu0 %v1022_v2  ;;  %v998_v24 = vld [vmem:[%s4352_s12 + $0x1110] sm:$0xff]  ;;  %v687_v62 = vld [vmem:[%s4352_s12 + $0x758] sm:$0xff] }
 0x17e   : > { %2239 = vmatpush.msra.mxu1 %v1158_v3  ;;  %2260 = vmatpush.msra.mxu2 %v1278_v5  ;;  %v1134_v25 = vld [vmem:[%s4352_s12 + $0x1550] sm:$0xff]  ;;  %v4910_v5 = vld [vmem:[%s4370_s17 + $0x20] sm:$0xff] }
 0x17f   : > { %2279 = vmatpush.msra.mxu3 %v1414_v7  ;;  %2221 = vmatpush.msra.mxu0 %v1014_v9  ;;  %v1254_v27 = vld [vmem:[%s4352_s12 + $0x1910] sm:$0xff]  ;;  %v679_v7 = vld [vmem:[%s4352_s12 + $0x718] sm:$0xff] }
 0x180   : > { %2240 = vmatpush.msra.mxu1 %v1150_v10  ;;  %2261 = vmatpush.msra.mxu2 %v1270_v12  ;;  %v1390_v28 = vld [vmem:[%s4352_s12 + $0x1d50] sm:$0xff]  ;;  %v535_v12 = vld [vmem:[%s4352_s12 + $0x298] sm:$0xff] }
 0x181   : > { %2280 = vmatpush.msra.mxu3 %v1406_v13  ;;  %2222 = vmatpush.msra.mxu0 %v1006_v14  ;;  %v990_v29 = vld [vmem:[%s4352_s12 + $0x10d0] sm:$0xff]  ;;  %v671_v13 = vld [vmem:[%s4352_s12 + $0x6d8] sm:$0xff]  ;;  %v4923_v14 = vld [vmem:[%s4370_s17 + $0x28] sm:$0xff] }
 0x182   : > { %2241 = vmatpush.msra.mxu1 %v1142_v16  ;;  %2262 = vmatpush.msra.mxu2 %v1262_v19  ;;  %v1126_v30 = vld [vmem:[%s4352_s12 + $0x1510] sm:$0xff]  ;;  %v527_v19 = vld [vmem:[%s4352_s12 + $0x258] sm:$0xff] }
 0x183   : > { %2281 = vmatpush.msra.mxu3 %v1398_v22  ;;  %2223 = vmatpush.msra.mxu0 %v998_v24  ;;  %v1246_v32 = vld [vmem:[%s4352_s12 + $0x18d0] sm:$0xff]  ;;  %v663_v22 = vld [vmem:[%s4352_s12 + $0x698] sm:$0xff] }
 0x184   : > { %2242 = vmatpush.msra.mxu1 %v1134_v25  ;;  %v1382_v0 = vld [vmem:[%s4352_s12 + $0x1d10] sm:$0xff]  ;;  %2263 = vmatpush.msra.mxu2 %v1254_v27  ;;  %v519_v25 = vld [vmem:[%s4352_s12 + $0x218] sm:$0xff] }
 0x185   : > { %2282 = vmatpush.msra.mxu3 %v1390_v28  ;;  %v982_v33 = vld [vmem:[%s4352_s12 + $0x1090] sm:$0xff]  ;;  %2224 = vmatpush.msra.mxu0 %v990_v29  ;;  %v655_v27 = vld [vmem:[%s4352_s12 + $0x658] sm:$0xff] }
 0x186   : > { %v1118_v34 = vld [vmem:[%s4352_s12 + $0x14d0] sm:$0xff]  ;;  %2243 = vmatpush.msra.mxu1 %v1126_v30  ;;  %2264 = vmatpush.msra.mxu2 %v1246_v32  ;;  %v511_v30 = vld [vmem:[%s4352_s12 + $0x1d8] sm:$0xff] }
 0x187   : > { %v1238_v36 = vld [vmem:[%s4352_s12 + $0x1890] sm:$0xff]  ;;  %2283 = vmatpush.msra.mxu3 %v1382_v0  ;;  %2225 = vmatpush.msra.mxu0 %v982_v33  ;;  %v503_v33 = vld [vmem:[%s4352_s12 + $0x198] sm:$0xff] }
 0x188   : > { %v1374_v37 = vld [vmem:[%s4352_s12 + $0x1cd0] sm:$0xff]  ;;  %2244 = vmatpush.msra.mxu1 %v1118_v34  ;;  %2265 = vmatpush.msra.mxu2 %v1238_v36  ;;  %v639_v34 = vld [vmem:[%s4352_s12 + $0x5d8] sm:$0xff] }
 0x189   : > { %v974_v11 = vld [vmem:[%s4352_s12 + $0x1050] sm:$0xff]  ;;  %2284 = vmatpush.msra.mxu3 %v1374_v37  ;;  %2148 = vmatmul.f32.vlgmr.msrb.gmra.mxu0 %v4878_v48  ;;  %v495_v37 = vld [vmem:[%s4352_s12 + $0x158] sm:$0xff] }
 0x18a   : > { %v1110_v6 = vld [vmem:[%s4352_s12 + $0x1490] sm:$0xff]  ;;  %2226 = vmatpush.msra.mxu0 %v974_v11  ;;  %2208 = vmatmul.f32.vlgmr.msrb.gmra.mxu3 %v4883_v49 }
 0x18b   : > { %v434_v38 = vld [vmem:[#allocation2 + $0x30] sm:$0xff]  ;;  %2245 = vmatpush.msra.mxu1 %v1110_v6 }
 0x18c   : > { %v1230_v40 = vld [vmem:[%s4352_s12 + $0x1850] sm:$0xff]  ;;  %v3332_v44 = vadd.f32 %v1930_v17, %v434_v38  ;;  %2168 = vmatmul.f32.vlgmr.msrb.gmra.mxu1 %v4891_v53  ;;  %v487_v38 = vld [vmem:[%s4352_s12 + $0x118] sm:$0xff] }
 0x18d   : > { %v1366_v21 = vld [vmem:[%s4352_s12 + $0x1c90] sm:$0xff]  ;;  %2266 = vmatpush.msra.mxu2 %v1230_v40  ;;  %v479_v17 = vld [vmem:[%s4352_s12 + $0xd8] sm:$0xff] }
 0x18e   : > { %v966_v41 = vld [vmem:[%s4352_s12 + $0x1010] sm:$0xff]  ;;  %2285 = vmatpush.msra.mxu3 %v1366_v21  ;;  %3340 = vst [vmem:[#allocation2 + $0x30] sm:$0xff] %v3332_v44  ;;  %v471_v44 = vld [vmem:[%s4352_s12 + $0x98] sm:$0xff] }
 0x18f   : > { %v1102_v42 = vld [vmem:[%s4352_s12 + $0x1450] sm:$0xff]  ;;  %2227 = vmatpush.msra.mxu0 %v966_v41  ;;  %v615_v41 = vld [vmem:[%s4352_s12 + $0x518] sm:$0xff] }
 0x190   : > { %v1222_v43 = vld [vmem:[%s4352_s12 + $0x1810] sm:$0xff]  ;;  %2246 = vmatpush.msra.mxu1 %v1102_v42 }
 0x191   : > { %v1358_v20 = vld [vmem:[%s4352_s12 + $0x1c50] sm:$0xff]  ;;  %2267 = vmatpush.msra.mxu2 %v1222_v43  ;;  %2228 = vmatmul.f32.vlgmr.msra.gmra.mxu0 %v4910_v5 }
 0x192   : > { %v4871_v45 = vld [vmem:[%s4370_s17 + $0x10] sm:$0xff]  ;;  %2286 = vmatpush.msra.mxu3 %v1358_v20  ;;  %v607_v20 = vld [vmem:[%s4352_s12 + $0x4d8] sm:$0xff] }
 0x193   : > { %2188 = vmatmul.f32.vlgmr.msrb.gmra.mxu2 %v4871_v45  ;;  %v1598_v46 = vld [vmem:[%s4352_s12 + $0x23d0] sm:$0xff] }
 0x194   : > { %v1094_v59 = vld [vmem:[%s4352_s12 + $0x1410] sm:$0xff]  ;;  %2292 = vmatpush.msrb.mxu0 %v1598_v46  ;;  %2332 = vmatpush.msrb.mxu2 %v575_v47 }
 0x195   : > { %v1350_v26 = vld [vmem:[%s4352_s12 + $0x1c10] sm:$0xff]  ;;  %2247 = vmatpush.msra.mxu1 %v1094_v59  ;;  %v463_v59 = vld [vmem:[%s4352_s12 + $0x58] sm:$0xff] }
 0x196   : > { %v1590_v50 = vld [vmem:[%s4352_s12 + $0x2390] sm:$0xff]  ;;  %2287 = vmatpush.msra.mxu3 %v1350_v26  ;;  %2333 = vmatpush.msrb.mxu2 %v567_v52  ;;  %v599_v26 = vld [vmem:[%s4352_s12 + $0x498] sm:$0xff] }
 0x197   : > { %v1726_v51 = vld [vmem:[%s4352_s12 + $0x27d0] sm:$0xff]  ;;  %2293 = vmatpush.msrb.mxu0 %v1590_v50  ;;  %2288 = vmatmul.f32.vlgmr.msra.gmra.mxu3 %v4915_v8  ;;  %v455_v52 = vld [vmem:[%s4352_s12 + $0x18] sm:$0xff] }
 0x198   : > { %v1582_v54 = vld [vmem:[%s4352_s12 + $0x2350] sm:$0xff]  ;;  %2312 = vmatpush.msrb.mxu1 %v1726_v51  ;;  %2352 = vmatpush.msrb.mxu3 %v703_v1  ;;  %v591_v1 = vld [vmem:[%s4352_s12 + $0x458] sm:$0xff] }
 0x199   : > { %v1718_v55 = vld [vmem:[%s4352_s12 + $0x2790] sm:$0xff]  ;;  %2294 = vmatpush.msrb.mxu0 %v1582_v54  ;;  %2334 = vmatpush.msrb.mxu2 %v559_v56  ;;  %v1087_v54 = vld [vmem:[%s4352_s12 + $0x13d8] sm:$0xff] }
 0x19a   : > { %v1574_v58 = vld [vmem:[%s4352_s12 + $0x2310] sm:$0xff]  ;;  %2313 = vmatpush.msrb.mxu1 %v1718_v55  ;;  %2353 = vmatpush.msrb.mxu3 %v695_v57  ;;  %v831_v55 = vld [vmem:[%s4352_s12 + $0xbd8] sm:$0xff] }
 0x19b   : > { %v1710_v60 = vld [vmem:[%s4352_s12 + $0x2750] sm:$0xff]  ;;  %2295 = vmatpush.msrb.mxu0 %v1574_v58  ;;  %2335 = vmatpush.msrb.mxu2 %v551_v61  ;;  %v583_v57 = vld [vmem:[%s4352_s12 + $0x418] sm:$0xff]  ;;  %v4971_v58 = vld [vmem:[%s4370_s17 + $0x40] sm:$0xff] }
 0x19c   : > { %v4903_v63 = vld [vmem:[%s4370_s17 + $0x30] sm:$0xff]  ;;  %2314 = vmatpush.msrb.mxu1 %v1710_v60  ;;  %2354 = vmatpush.msrb.mxu3 %v687_v62  ;;  %v823_v60 = vld [vmem:[%s4352_s12 + $0xb98] sm:$0xff] }
 0x19d   : > { %2268 = vmatmul.f32.vlgmr.msra.gmra.mxu2 %v4903_v63  ;;  %v1566_v2 = vld [vmem:[%s4352_s12 + $0x22d0] sm:$0xff]  ;;  %2248 = vmatmul.f32.vlgmr.msra.gmra.mxu1 %v4923_v14  ;;  %v959_v61 = vld [vmem:[%s4352_s12 + $0xfd8] sm:$0xff] }
 0x19e   : > { %v1702_v3 = vld [vmem:[%s4352_s12 + $0x2710] sm:$0xff]  ;;  %2296 = vmatpush.msrb.mxu0 %v1566_v2  ;;  %2336 = vmatpush.msrb.mxu2 %v543_v4  ;;  %v1079_v62 = vld [vmem:[%s4352_s12 + $0x1398] sm:$0xff] }
 0x19f   : > { %v1558_v9 = vld [vmem:[%s4352_s12 + $0x2290] sm:$0xff]  ;;  %2315 = vmatpush.msrb.mxu1 %v1702_v3  ;;  %2355 = vmatpush.msrb.mxu3 %v679_v7  ;;  %v1215_v2 = vld [vmem:[%s4352_s12 + $0x17d8] sm:$0xff]  ;;  %v4979_v3 = vld [vmem:[%s4370_s17 + $0x48] sm:$0xff] }
 0x1a0   : > { %v1694_v10 = vld [vmem:[%s4352_s12 + $0x26d0] sm:$0xff]  ;;  %2297 = vmatpush.msrb.mxu0 %v1558_v9  ;;  %2337 = vmatpush.msrb.mxu2 %v535_v12  ;;  %v815_v4 = vld [vmem:[%s4352_s12 + $0xb58] sm:$0xff]  ;;  %v1969_v12 = vpop.f32.mrf.mxu3 }
 0x1a1   : > { %v1550_v16 = vld [vmem:[%s4352_s12 + $0x2250] sm:$0xff]  ;;  %2316 = vmatpush.msrb.mxu1 %v1694_v10  ;;  %2356 = vmatpush.msrb.mxu3 %v671_v13  ;;  %v951_v7 = vld [vmem:[%s4352_s12 + $0xf98] sm:$0xff] }
 0x1a2   : > { %v1686_v18 = vld [vmem:[%s4352_s12 + $0x2690] sm:$0xff]  ;;  %2298 = vmatpush.msrb.mxu0 %v1550_v16  ;;  %2338 = vmatpush.msrb.mxu2 %v527_v19  ;;  %v1071_v9 = vld [vmem:[%s4352_s12 + $0x1358] sm:$0xff] }
 0x1a3   : > { %v1542_v23 = vld [vmem:[%s4352_s12 + $0x2210] sm:$0xff]  ;;  %2317 = vmatpush.msrb.mxu1 %v1686_v18  ;;  %2357 = vmatpush.msrb.mxu3 %v663_v22  ;;  %v1207_v10 = vld [vmem:[%s4352_s12 + $0x1798] sm:$0xff]  ;;  %v1949_v18 = vpop.f32.mrf.mxu2 }
 0x1a4   : > { %v1678_v24 = vld [vmem:[%s4352_s12 + $0x2650] sm:$0xff]  ;;  %2299 = vmatpush.msrb.mxu0 %v1542_v23  ;;  %2339 = vmatpush.msrb.mxu2 %v519_v25  ;;  %v807_v13 = vld [vmem:[%s4352_s12 + $0xb18] sm:$0xff]  ;;  %v1970_v23 = vadd.f32 %v1969_v12, %v1949_v18 }
 0x1a5   : > { %v1534_v28 = vld [vmem:[%s4352_s12 + $0x21d0] sm:$0xff]  ;;  %2318 = vmatpush.msrb.mxu1 %v1678_v24  ;;  %2358 = vmatpush.msrb.mxu3 %v655_v27  ;;  %v943_v16 = vld [vmem:[%s4352_s12 + $0xf58] sm:$0xff] }
 0x1a6   : > { %v1670_v29 = vld [vmem:[%s4352_s12 + $0x2610] sm:$0xff]  ;;  %2300 = vmatpush.msrb.mxu0 %v1534_v28  ;;  %2340 = vmatpush.msrb.mxu2 %v511_v30  ;;  %v1063_v19 = vld [vmem:[%s4352_s12 + $0x1318] sm:$0xff] }
 0x1a7   : > { %v1526_v32 = vld [vmem:[%s4352_s12 + $0x2190] sm:$0xff]  ;;  %2319 = vmatpush.msrb.mxu1 %v1670_v29  ;;  %2359 = vmatpush.msrb.mxu3 %v647_v31  ;;  %v1199_v22 = vld [vmem:[%s4352_s12 + $0x1758] sm:$0xff]  ;;  %v1989_v29 = vpop.f32.mrf.mxu0 }
 0x1a8   : > { %v1662_v0 = vld [vmem:[%s4352_s12 + $0x25d0] sm:$0xff]  ;;  %2301 = vmatpush.msrb.mxu0 %v1526_v32  ;;  %2341 = vmatpush.msrb.mxu2 %v503_v33  ;;  %v799_v24 = vld [vmem:[%s4352_s12 + $0xad8] sm:$0xff]  ;;  %v1990_v33 = vadd.f32 %v1989_v29, %v1970_v23 }
 0x1a9   : > { %v1518_v35 = vld [vmem:[%s4352_s12 + $0x2150] sm:$0xff]  ;;  %2320 = vmatpush.msrb.mxu1 %v1662_v0  ;;  %2360 = vmatpush.msrb.mxu3 %v639_v34  ;;  %v935_v25 = vld [vmem:[%s4352_s12 + $0xf18] sm:$0xff] }
 0x1aa   : > { %v1654_v36 = vld [vmem:[%s4352_s12 + $0x2590] sm:$0xff]  ;;  %2302 = vmatpush.msrb.mxu0 %v1518_v35  ;;  %2342 = vmatpush.msrb.mxu2 %v495_v37  ;;  %v1055_v27 = vld [vmem:[%s4352_s12 + $0x12d8] sm:$0xff] }
 0x1ab   : > { %v1510_v11 = vld [vmem:[%s4352_s12 + $0x2110] sm:$0xff]  ;;  %2321 = vmatpush.msrb.mxu1 %v1654_v36  ;;  %2361 = vmatpush.msrb.mxu3 %v631_v15  ;;  %v1191_v28 = vld [vmem:[%s4352_s12 + $0x1718] sm:$0xff]  ;;  %v2009_v36 = vpop.f32.mrf.mxu1 }
 0x1ac   : > { %v1646_v6 = vld [vmem:[%s4352_s12 + $0x2550] sm:$0xff]  ;;  %2303 = vmatpush.msrb.mxu0 %v1510_v11  ;;  %2343 = vmatpush.msrb.mxu2 %v487_v38  ;;  %v791_v30 = vld [vmem:[%s4352_s12 + $0xa98] sm:$0xff] }
 0x1ad   : > { %v1502_v40 = vld [vmem:[%s4352_s12 + $0x20d0] sm:$0xff]  ;;  %2322 = vmatpush.msrb.mxu1 %v1646_v6  ;;  %2362 = vmatpush.msrb.mxu3 %v623_v39  ;;  %v927_v31 = vld [vmem:[%s4352_s12 + $0xed8] sm:$0xff] }
 0x1ae   : > { %v1638_v21 = vld [vmem:[%s4352_s12 + $0x2510] sm:$0xff]  ;;  %2304 = vmatpush.msrb.mxu0 %v1502_v40  ;;  %2344 = vmatpush.msrb.mxu2 %v479_v17  ;;  %v1047_v32 = vld [vmem:[%s4352_s12 + $0x1298] sm:$0xff]  ;;  %v2010_v40 = vadd.f32 %v2009_v36, %v1990_v33  ;;  %v435_v36 = vld [vmem:[#allocation2] sm:$0xff] }
 0x1af   : > { %v1494_v42 = vld [vmem:[%s4352_s12 + $0x2090] sm:$0xff]  ;;  %2323 = vmatpush.msrb.mxu1 %v1638_v21  ;;  %2363 = vmatpush.msrb.mxu3 %v615_v41  ;;  %v1183_v0 = vld [vmem:[%s4352_s12 + $0x16d8] sm:$0xff]  ;;  %v2029_v41 = vpop.f32.mrf.mxu2 }
 0x1b0   : > { %v1630_v43 = vld [vmem:[%s4352_s12 + $0x24d0] sm:$0xff]  ;;  %2305 = vmatpush.msrb.mxu0 %v1494_v42  ;;  %2345 = vmatpush.msrb.mxu2 %v471_v44  ;;  %v783_v34 = vld [vmem:[%s4352_s12 + $0xa58] sm:$0xff] }
 0x1b1   : > { %v1486_v46 = vld [vmem:[%s4352_s12 + $0x2050] sm:$0xff]  ;;  %2324 = vmatpush.msrb.mxu1 %v1630_v43  ;;  %2364 = vmatpush.msrb.mxu3 %v607_v20  ;;  %v919_v35 = vld [vmem:[%s4352_s12 + $0xe98] sm:$0xff] }
 0x1b2   : > { %v1622_v47 = vld [vmem:[%s4352_s12 + $0x2490] sm:$0xff]  ;;  %2306 = vmatpush.msrb.mxu0 %v1486_v46  ;;  %2346 = vmatpush.msrb.mxu2 %v463_v59  ;;  %v1039_v37 = vld [vmem:[%s4352_s12 + $0x1258] sm:$0xff]  ;;  %v2030_v59 = vadd.f32 %v2029_v41, %v2010_v40 }
 0x1b3   : > { %v1478_v50 = vld [vmem:[%s4352_s12 + $0x2010] sm:$0xff]  ;;  %2325 = vmatpush.msrb.mxu1 %v1622_v47  ;;  %2365 = vmatpush.msrb.mxu3 %v599_v26  ;;  %v1175_v15 = vld [vmem:[%s4352_s12 + $0x1698] sm:$0xff] }
 0x1b4   : > { %v1614_v51 = vld [vmem:[%s4352_s12 + $0x2450] sm:$0xff]  ;;  %2307 = vmatpush.msrb.mxu0 %v1478_v50  ;;  %2347 = vmatpush.msrb.mxu2 %v455_v52  ;;  %v775_v11 = vld [vmem:[%s4352_s12 + $0xa18] sm:$0xff] }
 0x1b5   : > { %2326 = vmatpush.msrb.mxu1 %v1614_v51  ;;  %v1606_v56 = vld [vmem:[%s4352_s12 + $0x2410] sm:$0xff]  ;;  %2366 = vmatpush.msrb.mxu3 %v591_v1  ;;  %v911_v6 = vld [vmem:[%s4352_s12 + $0xe58] sm:$0xff]  ;;  %v2049_v51 = vpop.f32.mrf.mxu3 }
 0x1b6   : > { %2308 = vmatmul.f32.vlgmr.msrb.gmra.mxu0 %v4971_v58  ;;  %2412 = vmatpush.msra.mxu2 %v1087_v54  ;;  %v1031_v38 = vld [vmem:[%s4352_s12 + $0x1218] sm:$0xff] }
 0x1b7   : > { %2372 = vmatpush.msra.mxu0 %v831_v55  ;;  %2327 = vmatpush.msrb.mxu1 %v1606_v56  ;;  %v1167_v39 = vld [vmem:[%s4352_s12 + $0x1658] sm:$0xff] }
 0x1b8   : > { %2367 = vmatpush.msrb.mxu3 %v583_v57  ;;  %2328 = vmatmul.f32.vlgmr.msrb.gmra.mxu1 %v4979_v3  ;;  %v767_v21 = vld [vmem:[%s4352_s12 + $0x9d8] sm:$0xff] }
 0x1b9   : > { %2373 = vmatpush.msra.mxu0 %v823_v60  ;;  %2392 = vmatpush.msra.mxu1 %v959_v61  ;;  %v903_v17 = vld [vmem:[%s4352_s12 + $0xe18] sm:$0xff]  ;;  %v2050_v60 = vadd.f32 %v2049_v51, %v2030_v59 }
 0x1ba   : > { %2413 = vmatpush.msra.mxu2 %v1079_v62  ;;  %2432 = vmatpush.msra.mxu3 %v1215_v2  ;;  %v1023_v42 = vld [vmem:[%s4352_s12 + $0x11d8] sm:$0xff] }
 0x1bb   : > { %2374 = vmatpush.msra.mxu0 %v815_v4  ;;  %2393 = vmatpush.msra.mxu1 %v951_v7  ;;  %v1159_v43 = vld [vmem:[%s4352_s12 + $0x1618] sm:$0xff] }
 0x1bc   : > { %2414 = vmatpush.msra.mxu2 %v1071_v9  ;;  %2433 = vmatpush.msra.mxu3 %v1207_v10  ;;  %v759_v44 = vld [vmem:[%s4352_s12 + $0x998] sm:$0xff] }
 0x1bd   : > { %2375 = vmatpush.msra.mxu0 %v807_v13  ;;  %2394 = vmatpush.msra.mxu1 %v943_v16  ;;  %v895_v20 = vld [vmem:[%s4352_s12 + $0xdd8] sm:$0xff] }
 0x1be   : > { %2415 = vmatpush.msra.mxu2 %v1063_v19  ;;  %2434 = vmatpush.msra.mxu3 %v1199_v22  ;;  %v1015_v46 = vld [vmem:[%s4352_s12 + $0x1198] sm:$0xff] }
 0x1bf   : > { %2376 = vmatpush.msra.mxu0 %v799_v24  ;;  %2395 = vmatpush.msra.mxu1 %v935_v25  ;;  %v1151_v47 = vld [vmem:[%s4352_s12 + $0x15d8] sm:$0xff] }
 0x1c0   : > { %2416 = vmatpush.msra.mxu2 %v1055_v27  ;;  %2435 = vmatpush.msra.mxu3 %v1191_v28  ;;  %v751_v26 = vld [vmem:[%s4352_s12 + $0x958] sm:$0xff] }
 0x1c1   : > { %2377 = vmatpush.msra.mxu0 %v791_v30  ;;  %2396 = vmatpush.msra.mxu1 %v927_v31  ;;  %v887_v50 = vld [vmem:[%s4352_s12 + $0xd98] sm:$0xff] }
 0x1c2   : > { %2417 = vmatpush.msra.mxu2 %v1047_v32  ;;  %2436 = vmatpush.msra.mxu3 %v1183_v0  ;;  %v1007_v52 = vld [vmem:[%s4352_s12 + $0x1158] sm:$0xff] }
 0x1c3   : > { %2378 = vmatpush.msra.mxu0 %v783_v34  ;;  %2397 = vmatpush.msra.mxu1 %v919_v35  ;;  %v1143_v1 = vld [vmem:[%s4352_s12 + $0x1598] sm:$0xff] }
 0x1c4   : > { %2418 = vmatpush.msra.mxu2 %v1039_v37  ;;  %2437 = vmatpush.msra.mxu3 %v1175_v15  ;;  %v743_v54 = vld [vmem:[%s4352_s12 + $0x918] sm:$0xff] }
 0x1c5   : > { %2379 = vmatpush.msra.mxu0 %v775_v11  ;;  %2398 = vmatpush.msra.mxu1 %v911_v6  ;;  %v879_v55 = vld [vmem:[%s4352_s12 + $0xd58] sm:$0xff] }
 0x1c6   : > { %2419 = vmatpush.msra.mxu2 %v1031_v38  ;;  %2438 = vmatpush.msra.mxu3 %v1167_v39  ;;  %v999_v56 = vld [vmem:[%s4352_s12 + $0x1118] sm:$0xff] }
 0x1c7   : > { %2380 = vmatpush.msra.mxu0 %v767_v21  ;;  %2399 = vmatpush.msra.mxu1 %v903_v17  ;;  %v1135_v57 = vld [vmem:[%s4352_s12 + $0x1558] sm:$0xff]  ;;  %v2069_v7 = vpop.f32.mrf.mxu0 }
 0x1c8   : > { %2420 = vmatpush.msra.mxu2 %v1023_v42  ;;  %2439 = vmatpush.msra.mxu3 %v1159_v43  ;;  %v735_v61 = vld [vmem:[%s4352_s12 + $0x8d8] sm:$0xff]  ;;  %v2070_v12 = vadd.f32 %v2069_v7, %v2050_v60 }
 0x1c9   : > { %2381 = vmatpush.msra.mxu0 %v759_v44  ;;  %2400 = vmatpush.msra.mxu1 %v895_v20  ;;  %v871_v62 = vld [vmem:[%s4352_s12 + $0xd18] sm:$0xff] }
 0x1ca   : > { %2421 = vmatpush.msra.mxu2 %v1015_v46  ;;  %2440 = vmatpush.msra.mxu3 %v1151_v47  ;;  %v991_v2 = vld [vmem:[%s4352_s12 + $0x10d8] sm:$0xff] }
 0x1cb   : > { %2382 = vmatpush.msra.mxu0 %v751_v26  ;;  %2401 = vmatpush.msra.mxu1 %v887_v50  ;;  %v1127_v4 = vld [vmem:[%s4352_s12 + $0x1518] sm:$0xff]  ;;  %v2089_v22 = vpop.f32.mrf.mxu1 }
 0x1cc   : > { %2422 = vmatpush.msra.mxu2 %v1007_v52  ;;  %2441 = vmatpush.msra.mxu3 %v1143_v1  ;;  %v727_v9 = vld [vmem:[%s4352_s12 + $0x898] sm:$0xff]  ;;  %v2090_v27 = vadd.f32 %v2089_v22, %v2070_v12 }
 0x1cd   : > { %2383 = vmatpush.msra.mxu0 %v743_v54  ;;  %2402 = vmatpush.msra.mxu1 %v879_v55  ;;  %v863_v10 = vld [vmem:[%s4352_s12 + $0xcd8] sm:$0xff] }
 0x1ce   : > { %2423 = vmatpush.msra.mxu2 %v999_v56  ;;  %2442 = vmatpush.msra.mxu3 %v1135_v57  ;;  %v983_v13 = vld [vmem:[%s4352_s12 + $0x1098] sm:$0xff] }
 0x1cf   : > { %2384 = vmatpush.msra.mxu0 %v735_v61  ;;  %2403 = vmatpush.msra.mxu1 %v871_v62  ;;  %v1119_v16 = vld [vmem:[%s4352_s12 + $0x14d8] sm:$0xff]  ;;  %v2109_v30 = vpop.f32.mrf.mxu2 }
 0x1d0   : > { %2424 = vmatpush.msra.mxu2 %v991_v2  ;;  %2443 = vmatpush.msra.mxu3 %v1127_v4  ;;  %v719_v18 = vld [vmem:[%s4352_s12 + $0x858] sm:$0xff]  ;;  %v2110_v0 = vadd.f32 %v2109_v30, %v2090_v27 }
 0x1d1   : > { %v855_v19 = vld [vmem:[%s4352_s12 + $0xc98] sm:$0xff]  ;;  %2385 = vmatpush.msra.mxu0 %v727_v9  ;;  %2404 = vmatpush.msra.mxu1 %v863_v10 }
 0x1d2   : > { %v975_v23 = vld [vmem:[%s4352_s12 + $0x1058] sm:$0xff]  ;;  %2425 = vmatpush.msra.mxu2 %v983_v13  ;;  %2444 = vmatpush.msra.mxu3 %v1119_v16  ;;  %v2129_v37 = vpop.f32.mrf.mxu3 }
 0x1d3   : > { %v1111_v24 = vld [vmem:[%s4352_s12 + $0x1498] sm:$0xff]  ;;  %2386 = vmatpush.msra.mxu0 %v719_v18  ;;  %2405 = vmatpush.msra.mxu1 %v855_v19  ;;  %v2130_v6 = vadd.f32 %v2129_v37, %v2110_v0 }
 0x1d4   : > { %v711_v25 = vld [vmem:[%s4352_s12 + $0x818] sm:$0xff]  ;;  %2426 = vmatpush.msra.mxu2 %v975_v23  ;;  %2445 = vmatpush.msra.mxu3 %v1111_v24 }
 0x1d5   : > { %v847_v28 = vld [vmem:[%s4352_s12 + $0xc58] sm:$0xff]  ;;  %2348 = vmatmul.f32.vlgmr.msrb.gmra.mxu2 %v4878_v48  ;;  %2387 = vmatpush.msra.mxu0 %v711_v25  ;;  %v3333_v21 = vadd.f32 %v2130_v6, %v435_v36  ;;  %v576_v6 = vld [vmem:[%s4352_s12 + $0x3e0] sm:$0xff] }
 0x1d6   : > { %v967_v29 = vld [vmem:[%s4352_s12 + $0x1018] sm:$0xff]  ;;  %2406 = vmatpush.msra.mxu1 %v847_v28  ;;  %2368 = vmatmul.f32.vlgmr.msrb.gmra.mxu3 %v4891_v53 }
 0x1d7   : > { %v1103_v31 = vld [vmem:[%s4352_s12 + $0x1458] sm:$0xff]  ;;  %2427 = vmatpush.msra.mxu2 %v967_v29  ;;  %3341 = vst [vmem:[#allocation2] sm:$0xff] %v3333_v21  ;;  %2388 = vmatmul.f32.vlgmr.msra.gmra.mxu0 %v4871_v45  ;;  %v704_v21 = vld [vmem:[%s4352_s12 + $0x7e0] sm:$0xff] }
 0x1d8   : > { %v1343_v32 = vld [vmem:[%s4352_s12 + $0x1bd8] sm:$0xff]  ;;  %2446 = vmatpush.msra.mxu3 %v1103_v31 }
 0x1d9   : > { %v1599_v33 = vld [vmem:[%s4352_s12 + $0x23d8] sm:$0xff]  ;;  %2452 = vmatpush.msrb.mxu0 %v1343_v32 }
 0x1da   : > { %v839_v34 = vld [vmem:[%s4352_s12 + $0xc18] sm:$0xff]  ;;  %2492 = vmatpush.msrb.mxu2 %v1599_v33 }
 0x1db   : > { %v1095_v35 = vld [vmem:[%s4352_s12 + $0x1418] sm:$0xff]  ;;  %2407 = vmatpush.msra.mxu1 %v839_v34 }
 0x1dc   : > { %v1335_v15 = vld [vmem:[%s4352_s12 + $0x1b98] sm:$0xff]  ;;  %2447 = vmatpush.msra.mxu3 %v1095_v35  ;;  %2408 = vmatmul.f32.vlgmr.msra.gmra.mxu1 %v4883_v49 }
 0x1dd   : > { %v1471_v11 = vld [vmem:[%s4352_s12 + $0x1fd8] sm:$0xff]  ;;  %2453 = vmatpush.msrb.mxu0 %v1335_v15  ;;  %2428 = vmatmul.f32.vlgmr.msra.gmra.mxu2 %v4910_v5 }
 0x1de   : > { %v1591_v48 = vld [vmem:[%s4352_s12 + $0x2398] sm:$0xff]  ;;  %2472 = vmatpush.msrb.mxu1 %v1471_v11  ;;  %2448 = vmatmul.f32.vlgmr.msra.gmra.mxu3 %v4923_v14 }
 0x1df   : > { %v1727_v38 = vld [vmem:[%s4352_s12 + $0x27d8] sm:$0xff]  ;;  %2493 = vmatpush.msrb.mxu2 %v1591_v48  ;;  %v832_v48 = vld [vmem:[%s4352_s12 + $0xbe0] sm:$0xff] }
 0x1e0   : > { %v1327_v39 = vld [vmem:[%s4352_s12 + $0x1b58] sm:$0xff]  ;;  %2512 = vmatpush.msrb.mxu3 %v1727_v38 }
 0x1e1   : > { %v1463_v40 = vld [vmem:[%s4352_s12 + $0x1f98] sm:$0xff]  ;;  %2454 = vmatpush.msrb.mxu0 %v1327_v39 }
 0x1e2   : > { %v1583_v17 = vld [vmem:[%s4352_s12 + $0x2358] sm:$0xff]  ;;  %2473 = vmatpush.msrb.mxu1 %v1463_v40  ;;  %v568_v40 = vld [vmem:[%s4352_s12 + $0x3a0] sm:$0xff] }
 0x1e3   : > { %v1719_v41 = vld [vmem:[%s4352_s12 + $0x2798] sm:$0xff]  ;;  %2494 = vmatpush.msrb.mxu2 %v1583_v17  ;;  %v824_v17 = vld [vmem:[%s4352_s12 + $0xba0] sm:$0xff] }
 0x1e4   : > { %v1319_v53 = vld [vmem:[%s4352_s12 + $0x1b18] sm:$0xff]  ;;  %2513 = vmatpush.msrb.mxu3 %v1719_v41  ;;  %v960_v41 = vld [vmem:[%s4352_s12 + $0xfe0] sm:$0xff] }
 0x1e5   : > { %v1455_v42 = vld [vmem:[%s4352_s12 + $0x1f58] sm:$0xff]  ;;  %2455 = vmatpush.msrb.mxu0 %v1319_v53  ;;  %v816_v53 = vld [vmem:[%s4352_s12 + $0xb60] sm:$0xff] }
 0x1e6   : > { %v1575_v43 = vld [vmem:[%s4352_s12 + $0x2318] sm:$0xff]  ;;  %2474 = vmatpush.msrb.mxu1 %v1455_v42  ;;  %v952_v42 = vld [vmem:[%s4352_s12 + $0xfa0] sm:$0xff] }
 0x1e7   : > { %v1711_v44 = vld [vmem:[%s4352_s12 + $0x2758] sm:$0xff]  ;;  %2495 = vmatpush.msrb.mxu2 %v1575_v43  ;;  %v552_v43 = vld [vmem:[%s4352_s12 + $0x320] sm:$0xff] }
 0x1e8   : > { %v1311_v20 = vld [vmem:[%s4352_s12 + $0x1ad8] sm:$0xff]  ;;  %2514 = vmatpush.msrb.mxu3 %v1711_v44  ;;  %v688_v44 = vld [vmem:[%s4352_s12 + $0x760] sm:$0xff] }
 0x1e9   : > { %v1447_v46 = vld [vmem:[%s4352_s12 + $0x1f18] sm:$0xff]  ;;  %2456 = vmatpush.msrb.mxu0 %v1311_v20  ;;  %v544_v20 = vld [vmem:[%s4352_s12 + $0x2e0] sm:$0xff] }
 0x1ea   : > { %v1567_v47 = vld [vmem:[%s4352_s12 + $0x22d8] sm:$0xff]  ;;  %2475 = vmatpush.msrb.mxu1 %v1447_v46  ;;  %v680_v46 = vld [vmem:[%s4352_s12 + $0x720] sm:$0xff] }
 0x1eb   : > { %v1703_v59 = vld [vmem:[%s4352_s12 + $0x2718] sm:$0xff]  ;;  %2496 = vmatpush.msrb.mxu2 %v1567_v47  ;;  %v800_v47 = vld [vmem:[%s4352_s12 + $0xae0] sm:$0xff] }
 0x1ec   : > { %v1303_v5 = vld [vmem:[%s4352_s12 + $0x1a98] sm:$0xff]  ;;  %2515 = vmatpush.msrb.mxu3 %v1703_v59  ;;  %v936_v59 = vld [vmem:[%s4352_s12 + $0xf20] sm:$0xff] }
 0x1ed   : > { %v1439_v26 = vld [vmem:[%s4352_s12 + $0x1ed8] sm:$0xff]  ;;  %2457 = vmatpush.msrb.mxu0 %v1303_v5  ;;  %v536_v5 = vld [vmem:[%s4352_s12 + $0x2a0] sm:$0xff] }
 0x1ee   : > { %v1559_v50 = vld [vmem:[%s4352_s12 + $0x2298] sm:$0xff]  ;;  %2476 = vmatpush.msrb.mxu1 %v1439_v26  ;;  %v672_v26 = vld [vmem:[%s4352_s12 + $0x6e0] sm:$0xff] }
 0x1ef   : > { %v1695_v51 = vld [vmem:[%s4352_s12 + $0x26d8] sm:$0xff]  ;;  %2497 = vmatpush.msrb.mxu2 %v1559_v50  ;;  %v792_v50 = vld [vmem:[%s4352_s12 + $0xaa0] sm:$0xff] }
 0x1f0   : > { %v1295_v45 = vld [vmem:[%s4352_s12 + $0x1a58] sm:$0xff]  ;;  %2516 = vmatpush.msrb.mxu3 %v1695_v51  ;;  %v928_v51 = vld [vmem:[%s4352_s12 + $0xee0] sm:$0xff] }
 0x1f1   : > { %v1431_v52 = vld [vmem:[%s4352_s12 + $0x1e98] sm:$0xff]  ;;  %2458 = vmatpush.msrb.mxu0 %v1295_v45  ;;  %v528_v45 = vld [vmem:[%s4352_s12 + $0x260] sm:$0xff] }
 0x1f2   : > { %v1551_v14 = vld [vmem:[%s4352_s12 + $0x2258] sm:$0xff]  ;;  %2477 = vmatpush.msrb.mxu1 %v1431_v52  ;;  %v664_v52 = vld [vmem:[%s4352_s12 + $0x6a0] sm:$0xff] }
 0x1f3   : > { %v1687_v1 = vld [vmem:[%s4352_s12 + $0x2698] sm:$0xff]  ;;  %2498 = vmatpush.msrb.mxu2 %v1551_v14  ;;  %v784_v14 = vld [vmem:[%s4352_s12 + $0xa60] sm:$0xff] }
 0x1f4   : > { %v1287_v54 = vld [vmem:[%s4352_s12 + $0x1a18] sm:$0xff]  ;;  %2517 = vmatpush.msrb.mxu3 %v1687_v1  ;;  %v920_v1 = vld [vmem:[%s4352_s12 + $0xea0] sm:$0xff] }
 0x1f5   : > { %v1423_v55 = vld [vmem:[%s4352_s12 + $0x1e58] sm:$0xff]  ;;  %2459 = vmatpush.msrb.mxu0 %v1287_v54  ;;  %v520_v54 = vld [vmem:[%s4352_s12 + $0x220] sm:$0xff] }
 0x1f6   : > { %v1543_v56 = vld [vmem:[%s4352_s12 + $0x2218] sm:$0xff]  ;;  %2478 = vmatpush.msrb.mxu1 %v1423_v55  ;;  %v656_v55 = vld [vmem:[%s4352_s12 + $0x660] sm:$0xff] }
 0x1f7   : > { %v1679_v49 = vld [vmem:[%s4352_s12 + $0x2658] sm:$0xff]  ;;  %2499 = vmatpush.msrb.mxu2 %v1543_v56  ;;  %v776_v56 = vld [vmem:[%s4352_s12 + $0xa20] sm:$0xff] }
 0x1f8   : > { %v1279_v57 = vld [vmem:[%s4352_s12 + $0x19d8] sm:$0xff]  ;;  %2518 = vmatpush.msrb.mxu3 %v1679_v49  ;;  %v912_v49 = vld [vmem:[%s4352_s12 + $0xe60] sm:$0xff] }
 0x1f9   : > { %v1415_v60 = vld [vmem:[%s4352_s12 + $0x1e18] sm:$0xff]  ;;  %2460 = vmatpush.msrb.mxu0 %v1279_v57  ;;  %v512_v57 = vld [vmem:[%s4352_s12 + $0x1e0] sm:$0xff] }
 0x1fa   : > { %v1535_v61 = vld [vmem:[%s4352_s12 + $0x21d8] sm:$0xff]  ;;  %2479 = vmatpush.msrb.mxu1 %v1415_v60  ;;  %v648_v60 = vld [vmem:[%s4352_s12 + $0x620] sm:$0xff] }
 0x1fb   : > { %v1671_v62 = vld [vmem:[%s4352_s12 + $0x2618] sm:$0xff]  ;;  %2500 = vmatpush.msrb.mxu2 %v1535_v61  ;;  %v768_v61 = vld [vmem:[%s4352_s12 + $0x9e0] sm:$0xff] }
 0x1fc   : > { %v1271_v2 = vld [vmem:[%s4352_s12 + $0x1998] sm:$0xff]  ;;  %2519 = vmatpush.msrb.mxu3 %v1671_v62  ;;  %v904_v62 = vld [vmem:[%s4352_s12 + $0xe20] sm:$0xff] }
 0x1fd   : > { %v1407_v4 = vld [vmem:[%s4352_s12 + $0x1dd8] sm:$0xff]  ;;  %2461 = vmatpush.msrb.mxu0 %v1271_v2  ;;  %v504_v2 = vld [vmem:[%s4352_s12 + $0x1a0] sm:$0xff] }
 0x1fe   : > { %v1527_v7 = vld [vmem:[%s4352_s12 + $0x2198] sm:$0xff]  ;;  %2480 = vmatpush.msrb.mxu1 %v1407_v4  ;;  %v640_v4 = vld [vmem:[%s4352_s12 + $0x5e0] sm:$0xff] }
 0x1ff   : > { %v1663_v9 = vld [vmem:[%s4352_s12 + $0x25d8] sm:$0xff]  ;;  %2501 = vmatpush.msrb.mxu2 %v1527_v7  ;;  %v760_v7 = vld [vmem:[%s4352_s12 + $0x9a0] sm:$0xff] }
 0x200   : > { %v1263_v10 = vld [vmem:[%s4352_s12 + $0x1958] sm:$0xff]  ;;  %2520 = vmatpush.msrb.mxu3 %v1663_v9  ;;  %v896_v9 = vld [vmem:[%s4352_s12 + $0xde0] sm:$0xff] }
 0x201   : > { %v1399_v12 = vld [vmem:[%s4352_s12 + $0x1d98] sm:$0xff]  ;;  %2462 = vmatpush.msrb.mxu0 %v1263_v10  ;;  %v496_v10 = vld [vmem:[%s4352_s12 + $0x160] sm:$0xff] }
 0x202   : > { %v1519_v13 = vld [vmem:[%s4352_s12 + $0x2158] sm:$0xff]  ;;  %2481 = vmatpush.msrb.mxu1 %v1399_v12  ;;  %v632_v12 = vld [vmem:[%s4352_s12 + $0x5a0] sm:$0xff] }
 0x203   : > { %v1655_v16 = vld [vmem:[%s4352_s12 + $0x2598] sm:$0xff]  ;;  %2502 = vmatpush.msrb.mxu2 %v1519_v13  ;;  %v752_v13 = vld [vmem:[%s4352_s12 + $0x960] sm:$0xff] }
 0x204   : > { %v1255_v18 = vld [vmem:[%s4352_s12 + $0x1918] sm:$0xff]  ;;  %2521 = vmatpush.msrb.mxu3 %v1655_v16  ;;  %v888_v16 = vld [vmem:[%s4352_s12 + $0xda0] sm:$0xff] }
 0x205   : > { %v1391_v19 = vld [vmem:[%s4352_s12 + $0x1d58] sm:$0xff]  ;;  %2463 = vmatpush.msrb.mxu0 %v1255_v18  ;;  %v488_v18 = vld [vmem:[%s4352_s12 + $0x120] sm:$0xff] }
 0x206   : > { %v1511_v22 = vld [vmem:[%s4352_s12 + $0x2118] sm:$0xff]  ;;  %2482 = vmatpush.msrb.mxu1 %v1391_v19  ;;  %v624_v19 = vld [vmem:[%s4352_s12 + $0x560] sm:$0xff] }
 0x207   : > { %v1647_v23 = vld [vmem:[%s4352_s12 + $0x2558] sm:$0xff]  ;;  %2503 = vmatpush.msrb.mxu2 %v1511_v22  ;;  %v744_v22 = vld [vmem:[%s4352_s12 + $0x920] sm:$0xff] }
 0x208   : > { %v1247_v24 = vld [vmem:[%s4352_s12 + $0x18d8] sm:$0xff]  ;;  %2522 = vmatpush.msrb.mxu3 %v1647_v23  ;;  %v880_v23 = vld [vmem:[%s4352_s12 + $0xd60] sm:$0xff] }
 0x209   : > { %v1383_v25 = vld [vmem:[%s4352_s12 + $0x1d18] sm:$0xff]  ;;  %2464 = vmatpush.msrb.mxu0 %v1247_v24  ;;  %v480_v24 = vld [vmem:[%s4352_s12 + $0xe0] sm:$0xff] }
 0x20a   : > { %v1503_v27 = vld [vmem:[%s4352_s12 + $0x20d8] sm:$0xff]  ;;  %2483 = vmatpush.msrb.mxu1 %v1383_v25  ;;  %v616_v25 = vld [vmem:[%s4352_s12 + $0x520] sm:$0xff] }
 0x20b   : > { %v1639_v28 = vld [vmem:[%s4352_s12 + $0x2518] sm:$0xff]  ;;  %2504 = vmatpush.msrb.mxu2 %v1503_v27  ;;  %v736_v27 = vld [vmem:[%s4352_s12 + $0x8e0] sm:$0xff] }
 0x20c   : > { %v1239_v29 = vld [vmem:[%s4352_s12 + $0x1898] sm:$0xff]  ;;  %2523 = vmatpush.msrb.mxu3 %v1639_v28  ;;  %v872_v28 = vld [vmem:[%s4352_s12 + $0xd20] sm:$0xff] }
 0x20d   : > { %v1375_v30 = vld [vmem:[%s4352_s12 + $0x1cd8] sm:$0xff]  ;;  %2465 = vmatpush.msrb.mxu0 %v1239_v29  ;;  %v472_v29 = vld [vmem:[%s4352_s12 + $0xa0] sm:$0xff] }
 0x20e   : > { %v1495_v31 = vld [vmem:[%s4352_s12 + $0x2098] sm:$0xff]  ;;  %2484 = vmatpush.msrb.mxu1 %v1375_v30  ;;  %v608_v30 = vld [vmem:[%s4352_s12 + $0x4e0] sm:$0xff] }
 0x20f   : > { %v1631_v32 = vld [vmem:[%s4352_s12 + $0x24d8] sm:$0xff]  ;;  %2505 = vmatpush.msrb.mxu2 %v1495_v31  ;;  %v728_v31 = vld [vmem:[%s4352_s12 + $0x8a0] sm:$0xff] }
 0x210   : > { %v1231_v0 = vld [vmem:[%s4352_s12 + $0x1858] sm:$0xff]  ;;  %2524 = vmatpush.msrb.mxu3 %v1631_v32  ;;  %v864_v32 = vld [vmem:[%s4352_s12 + $0xce0] sm:$0xff] }
 0x211   : > { %v1367_v33 = vld [vmem:[%s4352_s12 + $0x1c98] sm:$0xff]  ;;  %2466 = vmatpush.msrb.mxu0 %v1231_v0  ;;  %v464_v0 = vld [vmem:[%s4352_s12 + $0x60] sm:$0xff] }
 0x212   : > { %v1487_v34 = vld [vmem:[%s4352_s12 + $0x2058] sm:$0xff]  ;;  %2485 = vmatpush.msrb.mxu1 %v1367_v33  ;;  %v600_v33 = vld [vmem:[%s4352_s12 + $0x4a0] sm:$0xff] }
 0x213   : > { %v1623_v35 = vld [vmem:[%s4352_s12 + $0x2498] sm:$0xff]  ;;  %2506 = vmatpush.msrb.mxu2 %v1487_v34  ;;  %v720_v34 = vld [vmem:[%s4352_s12 + $0x860] sm:$0xff] }
 0x214   : > { %v1223_v36 = vld [vmem:[%s4352_s12 + $0x1818] sm:$0xff]  ;;  %2525 = vmatpush.msrb.mxu3 %v1623_v35  ;;  %v856_v35 = vld [vmem:[%s4352_s12 + $0xca0] sm:$0xff] }
 0x215   : > { %v1359_v37 = vld [vmem:[%s4352_s12 + $0x1c58] sm:$0xff]  ;;  %2467 = vmatpush.msrb.mxu0 %v1223_v36  ;;  %v456_v36 = vld [vmem:[%s4352_s12 + $0x20] sm:$0xff] }
 0x216   : > { %v1479_v15 = vld [vmem:[%s4352_s12 + $0x2018] sm:$0xff]  ;;  %2486 = vmatpush.msrb.mxu1 %v1359_v37  ;;  %2468 = vmatmul.f32.vlgmr.msrb.gmra.mxu0 %v4903_v63  ;;  %v560_v63 = vld [vmem:[%s4352_s12 + $0x360] sm:$0xff] }
 0x217   : > { %v1615_v11 = vld [vmem:[%s4352_s12 + $0x2458] sm:$0xff]  ;;  %2507 = vmatpush.msrb.mxu2 %v1479_v15  ;;  %2532 = vmatpush.msra.mxu0 %v576_v6  ;;  %v592_v37 = vld [vmem:[%s4352_s12 + $0x460] sm:$0xff]  ;;  %v2169_v15 = vpop.f32.mrf.mxu1 }
 0x218   : > { %2526 = vmatpush.msrb.mxu3 %v1615_v11  ;;  %v1351_v38 = vld [vmem:[%s4352_s12 + $0x1c18] sm:$0xff]  ;;  %2508 = vmatmul.f32.vlgmr.msrb.gmra.mxu2 %v4971_v58  ;;  %v696_v58 = vld [vmem:[%s4352_s12 + $0x7a0] sm:$0xff] }
 0x219   : > { %v1607_v39 = vld [vmem:[%s4352_s12 + $0x2418] sm:$0xff]  ;;  %2572 = vmatpush.msra.mxu2 %v832_v48  ;;  %2487 = vmatpush.msrb.mxu1 %v1351_v38  ;;  %v712_v11 = vld [vmem:[%s4352_s12 + $0x820] sm:$0xff] }
 0x21a   : > { %2527 = vmatpush.msrb.mxu3 %v1607_v39  ;;  %2488 = vmatmul.f32.vlgmr.msrb.gmra.mxu1 %v4915_v8  ;;  %v808_v8 = vld [vmem:[%s4352_s12 + $0xb20] sm:$0xff]  ;;  %v2149_v39 = vpop.f32.mrf.mxu0 }
 0x21b   : > { %2528 = vmatmul.f32.vlgmr.msrb.gmra.mxu3 %v4979_v3  ;;  %2533 = vmatpush.msra.mxu0 %v568_v40  ;;  %v944_v3 = vld [vmem:[%s4352_s12 + $0xf60] sm:$0xff] }
 0x21c   : > { %2552 = vmatpush.msra.mxu1 %v704_v21  ;;  %2573 = vmatpush.msra.mxu2 %v824_v17  ;;  %v848_v6 = vld [vmem:[%s4352_s12 + $0xc60] sm:$0xff]  ;;  %v2170_v17 = vadd.f32 %v2169_v15, %v2149_v39 }
 0x21d   : > { %2592 = vmatpush.msra.mxu3 %v960_v41  ;;  %2534 = vmatpush.msra.mxu0 %v560_v63  ;;  %v1088_v48 = vld [vmem:[%s4352_s12 + $0x13e0] sm:$0xff] }
 0x21e   : > { %2553 = vmatpush.msra.mxu1 %v696_v58  ;;  %2574 = vmatpush.msra.mxu2 %v816_v53  ;;  %v1344_v38 = vld [vmem:[%s4352_s12 + $0x1be0] sm:$0xff]  ;;  %v2189_v58 = vpop.f32.mrf.mxu2 }
 0x21f   : > { %2593 = vmatpush.msra.mxu3 %v952_v42  ;;  %2535 = vmatpush.msra.mxu0 %v552_v43  ;;  %v584_v40 = vld [vmem:[%s4352_s12 + $0x420] sm:$0xff] }
 0x220   : > { %2554 = vmatpush.msra.mxu1 %v688_v44  ;;  %2575 = vmatpush.msra.mxu2 %v808_v8  ;;  %v840_v21 = vld [vmem:[%s4352_s12 + $0xc20] sm:$0xff] }
 0x221   : > { %2594 = vmatpush.msra.mxu3 %v944_v3  ;;  %2536 = vmatpush.msra.mxu0 %v544_v20  ;;  %v1080_v41 = vld [vmem:[%s4352_s12 + $0x13a0] sm:$0xff]  ;;  %v2190_v20 = vadd.f32 %v2189_v58, %v2170_v17 }
 0x222   : > { %2555 = vmatpush.msra.mxu1 %v680_v46  ;;  %2576 = vmatpush.msra.mxu2 %v800_v47  ;;  %v1216_v63 = vld [vmem:[%s4352_s12 + $0x17e0] sm:$0xff] }
 0x223   : > { %2595 = vmatpush.msra.mxu3 %v936_v59  ;;  %2537 = vmatpush.msra.mxu0 %v536_v5  ;;  %v1336_v53 = vld [vmem:[%s4352_s12 + $0x1ba0] sm:$0xff]  ;;  %v2209_v59 = vpop.f32.mrf.mxu3 }
 0x224   : > { %2556 = vmatpush.msra.mxu1 %v672_v26  ;;  %2577 = vmatpush.msra.mxu2 %v792_v50  ;;  %v1472_v42 = vld [vmem:[%s4352_s12 + $0x1fe0] sm:$0xff] }
 0x225   : > { %2596 = vmatpush.msra.mxu3 %v928_v51  ;;  %2538 = vmatpush.msra.mxu0 %v528_v45  ;;  %v1072_v43 = vld [vmem:[%s4352_s12 + $0x1360] sm:$0xff]  ;;  %v2210_v45 = vadd.f32 %v2209_v59, %v2190_v20 }
 0x226   : > { %2557 = vmatpush.msra.mxu1 %v664_v52  ;;  %2578 = vmatpush.msra.mxu2 %v784_v14  ;;  %v1208_v44 = vld [vmem:[%s4352_s12 + $0x17a0] sm:$0xff] }
 0x227   : > { %2597 = vmatpush.msra.mxu3 %v920_v1  ;;  %2539 = vmatpush.msra.mxu0 %v520_v54  ;;  %v1328_v8 = vld [vmem:[%s4352_s12 + $0x1b60] sm:$0xff]  ;;  %v2229_v1 = vpop.f32.mrf.mxu0 }
 0x228   : > { %2558 = vmatpush.msra.mxu1 %v656_v55  ;;  %2579 = vmatpush.msra.mxu2 %v776_v56  ;;  %v1464_v3 = vld [vmem:[%s4352_s12 + $0x1fa0] sm:$0xff] }
 0x229   : > { %2598 = vmatpush.msra.mxu3 %v912_v49  ;;  %2540 = vmatpush.msra.mxu0 %v512_v57  ;;  %v1064_v46 = vld [vmem:[%s4352_s12 + $0x1320] sm:$0xff] }
 0x22a   : > { %2559 = vmatpush.msra.mxu1 %v648_v60  ;;  %2580 = vmatpush.msra.mxu2 %v768_v61  ;;  %v1200_v47 = vld [vmem:[%s4352_s12 + $0x1760] sm:$0xff]  ;;  %v2230_v61 = vadd.f32 %v2229_v1, %v2210_v45  ;;  %v5253_v1 = vld [vmem:[%s4370_s17 + $0x18] sm:$0xff] }
 0x22b   : > { %2599 = vmatpush.msra.mxu3 %v904_v62  ;;  %2541 = vmatpush.msra.mxu0 %v504_v2  ;;  %v1320_v5 = vld [vmem:[%s4352_s12 + $0x1b20] sm:$0xff] }
 0x22c   : > { %2560 = vmatpush.msra.mxu1 %v640_v4  ;;  %2581 = vmatpush.msra.mxu2 %v760_v7  ;;  %v1456_v26 = vld [vmem:[%s4352_s12 + $0x1f60] sm:$0xff]  ;;  %v2249_v4 = vpop.f32.mrf.mxu1 }
 0x22d   : > { %2600 = vmatpush.msra.mxu3 %v896_v9  ;;  %2542 = vmatpush.msra.mxu0 %v496_v10  ;;  %v1056_v50 = vld [vmem:[%s4352_s12 + $0x12e0] sm:$0xff] }
 0x22e   : > { %2561 = vmatpush.msra.mxu1 %v632_v12  ;;  %2582 = vmatpush.msra.mxu2 %v752_v13  ;;  %v1192_v51 = vld [vmem:[%s4352_s12 + $0x1720] sm:$0xff] }
 0x22f   : > { %2601 = vmatpush.msra.mxu3 %v888_v16  ;;  %2543 = vmatpush.msra.mxu0 %v488_v18  ;;  %v1312_v52 = vld [vmem:[%s4352_s12 + $0x1ae0] sm:$0xff]  ;;  %v2250_v18 = vadd.f32 %v2249_v4, %v2230_v61 }
 0x230   : > { %2562 = vmatpush.msra.mxu1 %v624_v19  ;;  %2583 = vmatpush.msra.mxu2 %v744_v22  ;;  %v1448_v14 = vld [vmem:[%s4352_s12 + $0x1f20] sm:$0xff] }
 0x231   : > { %2602 = vmatpush.msra.mxu3 %v880_v23  ;;  %2544 = vmatpush.msra.mxu0 %v480_v24  ;;  %v1048_v54 = vld [vmem:[%s4352_s12 + $0x12a0] sm:$0xff]  ;;  %v2269_v23 = vpop.f32.mrf.mxu2 }
 0x232   : > { %2563 = vmatpush.msra.mxu1 %v616_v25  ;;  %2584 = vmatpush.msra.mxu2 %v736_v27  ;;  %v1184_v55 = vld [vmem:[%s4352_s12 + $0x16e0] sm:$0xff] }
 0x233   : > { %2603 = vmatpush.msra.mxu3 %v872_v28  ;;  %2545 = vmatpush.msra.mxu0 %v472_v29  ;;  %v1304_v56 = vld [vmem:[%s4352_s12 + $0x1aa0] sm:$0xff] }
 0x234   : > { %2564 = vmatpush.msra.mxu1 %v608_v30  ;;  %2585 = vmatpush.msra.mxu2 %v728_v31  ;;  %v1440_v49 = vld [vmem:[%s4352_s12 + $0x1ee0] sm:$0xff]  ;;  %v2270_v31 = vadd.f32 %v2269_v23, %v2250_v18  ;;  %v545_v18 = vld [vmem:[%s4352_s12 + $0x2e8] sm:$0xff]  ;;  %v5285_v23 = vld [vmem:[%s4370_s17 + $0x38] sm:$0xff] }
 0x235   : > { %2604 = vmatpush.msra.mxu3 %v864_v32  ;;  %2546 = vmatpush.msra.mxu0 %v464_v0  ;;  %v1040_v57 = vld [vmem:[%s4352_s12 + $0x1260] sm:$0xff] }
 0x236   : > { %2565 = vmatpush.msra.mxu1 %v600_v33  ;;  %2586 = vmatpush.msra.mxu2 %v720_v34  ;;  %v1176_v60 = vld [vmem:[%s4352_s12 + $0x16a0] sm:$0xff]  ;;  %v2289_v33 = vpop.f32.mrf.mxu3 }
 0x237   : > { %2605 = vmatpush.msra.mxu3 %v856_v35  ;;  %2547 = vmatpush.msra.mxu0 %v456_v36  ;;  %v1296_v62 = vld [vmem:[%s4352_s12 + $0x1a60] sm:$0xff] }
 0x238   : > { %2566 = vmatpush.msra.mxu1 %v592_v37  ;;  %2587 = vmatpush.msra.mxu2 %v712_v11  ;;  %v1432_v2 = vld [vmem:[%s4352_s12 + $0x1ea0] sm:$0xff] }
 0x239   : > { %2606 = vmatpush.msra.mxu3 %v848_v6  ;;  %2612 = vmatpush.msrb.mxu0 %v1088_v48  ;;  %v1032_v7 = vld [vmem:[%s4352_s12 + $0x1220] sm:$0xff]  ;;  %v2290_v6 = vadd.f32 %v2289_v33, %v2270_v31 }
 0x23a   : > { %2652 = vmatpush.msrb.mxu2 %v1344_v38  ;;  %2567 = vmatpush.msra.mxu1 %v584_v40  ;;  %v1168_v9 = vld [vmem:[%s4352_s12 + $0x1660] sm:$0xff] }
 0x23b   : > { %2607 = vmatpush.msra.mxu3 %v840_v21  ;;  %2613 = vmatpush.msrb.mxu0 %v1080_v41  ;;  %v1288_v10 = vld [vmem:[%s4352_s12 + $0x1a20] sm:$0xff]  ;;  %v2309_v21 = vpop.f32.mrf.mxu0 }
 0x23c   : > { %2632 = vmatpush.msrb.mxu1 %v1216_v63  ;;  %2653 = vmatpush.msrb.mxu2 %v1336_v53  ;;  %v1424_v12 = vld [vmem:[%s4352_s12 + $0x1e60] sm:$0xff]  ;;  %v2310_v63 = vadd.f32 %v2309_v21, %v2290_v6  ;;  %v649_v6 = vld [vmem:[%s4352_s12 + $0x628] sm:$0xff] }
 0x23d   : > { %2672 = vmatpush.msrb.mxu3 %v1472_v42  ;;  %2614 = vmatpush.msrb.mxu0 %v1072_v43  ;;  %v1024_v13 = vld [vmem:[%s4352_s12 + $0x11e0] sm:$0xff]  ;;  %v436_v42 = vld [vmem:[#allocation2 + $0x18] sm:$0xff]  ;;  %v2329_v43 = vpop.f32.mrf.mxu1 }
 0x23e   : > { %2633 = vmatpush.msrb.mxu1 %v1208_v44  ;;  %2654 = vmatpush.msrb.mxu2 %v1328_v8  ;;  %v1160_v16 = vld [vmem:[%s4352_s12 + $0x1620] sm:$0xff] }
 0x23f   : > { %2673 = vmatpush.msrb.mxu3 %v1464_v3  ;;  %2615 = vmatpush.msrb.mxu0 %v1064_v46  ;;  %v1280_v19 = vld [vmem:[%s4352_s12 + $0x19e0] sm:$0xff]  ;;  %v2330_v3 = vadd.f32 %v2329_v43, %v2310_v63  ;;  %v633_v63 = vld [vmem:[%s4352_s12 + $0x5a8] sm:$0xff] }
 0x240   : > { %2634 = vmatpush.msrb.mxu1 %v1200_v47  ;;  %2655 = vmatpush.msrb.mxu2 %v1320_v5  ;;  %v1416_v22 = vld [vmem:[%s4352_s12 + $0x1e20] sm:$0xff]  ;;  %v625_v43 = vld [vmem:[%s4352_s12 + $0x568] sm:$0xff] }
 0x241   : > { %2674 = vmatpush.msrb.mxu3 %v1456_v26  ;;  %2616 = vmatpush.msrb.mxu0 %v1056_v50  ;;  %v1016_v24 = vld [vmem:[%s4352_s12 + $0x11a0] sm:$0xff]  ;;  %v3334_v59 = vadd.f32 %v2330_v3, %v436_v42  ;;  %v5241_v26 = vld [vmem:[%s4370_s17 + $0x10] sm:$0xff]  ;;  %v489_v42 = vld [vmem:[%s4352_s12 + $0x128] sm:$0xff] }
 0x242   : > { %2635 = vmatpush.msrb.mxu1 %v1192_v51  ;;  %2656 = vmatpush.msrb.mxu2 %v1312_v52  ;;  %v1152_v25 = vld [vmem:[%s4352_s12 + $0x15e0] sm:$0xff]  ;;  %v577_v51 = vld [vmem:[%s4352_s12 + $0x3e8] sm:$0xff] }
 0x243   : > { %2675 = vmatpush.msrb.mxu3 %v1448_v14  ;;  %2617 = vmatpush.msrb.mxu0 %v1048_v54  ;;  %v1272_v27 = vld [vmem:[%s4352_s12 + $0x19a0] sm:$0xff]  ;;  %3342 = vst [vmem:[#allocation2 + $0x18] sm:$0xff] %v3334_v59  ;;  %v481_v3 = vld [vmem:[%s4352_s12 + $0xe8] sm:$0xff] }
 0x244   : > { %2636 = vmatpush.msrb.mxu1 %v1184_v55  ;;  %2657 = vmatpush.msrb.mxu2 %v1304_v56  ;;  %v1408_v28 = vld [vmem:[%s4352_s12 + $0x1de0] sm:$0xff]  ;;  %v569_v56 = vld [vmem:[%s4352_s12 + $0x3a8] sm:$0xff] }
 0x245   : > { %2676 = vmatpush.msrb.mxu3 %v1440_v49  ;;  %2618 = vmatpush.msrb.mxu0 %v1040_v57  ;;  %v1008_v29 = vld [vmem:[%s4352_s12 + $0x1160] sm:$0xff]  ;;  %v705_v49 = vld [vmem:[%s4352_s12 + $0x7e8] sm:$0xff] }
 0x246   : > { %2637 = vmatpush.msrb.mxu1 %v1176_v60  ;;  %2658 = vmatpush.msrb.mxu2 %v1296_v62  ;;  %v1144_v30 = vld [vmem:[%s4352_s12 + $0x15a0] sm:$0xff]  ;;  %v5261_v57 = vld [vmem:[%s4370_s17 + $0x8] sm:$0xff] }
 0x247   : > { %2677 = vmatpush.msrb.mxu3 %v1432_v2  ;;  %2619 = vmatpush.msrb.mxu0 %v1032_v7  ;;  %v1264_v32 = vld [vmem:[%s4352_s12 + $0x1960] sm:$0xff]  ;;  %v561_v62 = vld [vmem:[%s4352_s12 + $0x368] sm:$0xff] }
 0x248   : > { %2638 = vmatpush.msrb.mxu1 %v1168_v9  ;;  %2659 = vmatpush.msrb.mxu2 %v1288_v10  ;;  %v1400_v0 = vld [vmem:[%s4352_s12 + $0x1da0] sm:$0xff]  ;;  %v697_v2 = vld [vmem:[%s4352_s12 + $0x7a8] sm:$0xff] }
 0x249   : > { %2678 = vmatpush.msrb.mxu3 %v1424_v12  ;;  %2620 = vmatpush.msrb.mxu0 %v1024_v13  ;;  %v1000_v34 = vld [vmem:[%s4352_s12 + $0x1120] sm:$0xff]  ;;  %v553_v9 = vld [vmem:[%s4352_s12 + $0x328] sm:$0xff]  ;;  %v5273_v12 = vld [vmem:[%s4370_s17 + $0x30] sm:$0xff] }
 0x24a   : > { %2639 = vmatpush.msrb.mxu1 %v1160_v16  ;;  %2660 = vmatpush.msrb.mxu2 %v1280_v19  ;;  %v1136_v35 = vld [vmem:[%s4352_s12 + $0x1560] sm:$0xff]  ;;  %v689_v10 = vld [vmem:[%s4352_s12 + $0x768] sm:$0xff] }
 0x24b   : > { %2679 = vmatpush.msrb.mxu3 %v1416_v22  ;;  %2621 = vmatpush.msrb.mxu0 %v1016_v24  ;;  %v1256_v36 = vld [vmem:[%s4352_s12 + $0x1920] sm:$0xff]  ;;  %v681_v22 = vld [vmem:[%s4352_s12 + $0x728] sm:$0xff] }
 0x24c   : > { %2640 = vmatpush.msrb.mxu1 %v1152_v25  ;;  %2661 = vmatpush.msrb.mxu2 %v1272_v27  ;;  %v1392_v37 = vld [vmem:[%s4352_s12 + $0x1d60] sm:$0xff]  ;;  %v537_v27 = vld [vmem:[%s4352_s12 + $0x2a8] sm:$0xff] }
 0x24d   : > { %2680 = vmatpush.msrb.mxu3 %v1408_v28  ;;  %2622 = vmatpush.msrb.mxu0 %v1008_v29  ;;  %v992_v15 = vld [vmem:[%s4352_s12 + $0x10e0] sm:$0xff]  ;;  %v673_v28 = vld [vmem:[%s4352_s12 + $0x6e8] sm:$0xff] }
 0x24e   : > { %2641 = vmatpush.msrb.mxu1 %v1144_v30  ;;  %2662 = vmatpush.msrb.mxu2 %v1264_v32  ;;  %v1128_v11 = vld [vmem:[%s4352_s12 + $0x1520] sm:$0xff]  ;;  %v5293_v29 = vld [vmem:[%s4370_s17 + $0x28] sm:$0xff] }
 0x24f   : > { %2681 = vmatpush.msrb.mxu3 %v1400_v0  ;;  %2623 = vmatpush.msrb.mxu0 %v1000_v34  ;;  %v1248_v48 = vld [vmem:[%s4352_s12 + $0x18e0] sm:$0xff]  ;;  %v529_v32 = vld [vmem:[%s4352_s12 + $0x268] sm:$0xff] }
 0x250   : > { %2642 = vmatpush.msrb.mxu1 %v1136_v35  ;;  %v1384_v38 = vld [vmem:[%s4352_s12 + $0x1d20] sm:$0xff]  ;;  %2663 = vmatpush.msrb.mxu2 %v1256_v36  ;;  %v665_v0 = vld [vmem:[%s4352_s12 + $0x6a8] sm:$0xff] }
 0x251   : > { %2682 = vmatpush.msrb.mxu3 %v1392_v37  ;;  %v984_v39 = vld [vmem:[%s4352_s12 + $0x10a0] sm:$0xff]  ;;  %2624 = vmatpush.msrb.mxu0 %v992_v15  ;;  %v521_v35 = vld [vmem:[%s4352_s12 + $0x228] sm:$0xff] }
 0x252   : > { %v1120_v40 = vld [vmem:[%s4352_s12 + $0x14e0] sm:$0xff]  ;;  %2643 = vmatpush.msrb.mxu1 %v1128_v11  ;;  %2664 = vmatpush.msrb.mxu2 %v1248_v48  ;;  %v657_v36 = vld [vmem:[%s4352_s12 + $0x668] sm:$0xff] }
 0x253   : > { %v1240_v17 = vld [vmem:[%s4352_s12 + $0x18a0] sm:$0xff]  ;;  %2683 = vmatpush.msrb.mxu3 %v1384_v38  ;;  %2625 = vmatpush.msrb.mxu0 %v984_v39  ;;  %v513_v11 = vld [vmem:[%s4352_s12 + $0x1e8] sm:$0xff] }
 0x254   : > { %v1376_v41 = vld [vmem:[%s4352_s12 + $0x1ce0] sm:$0xff]  ;;  %2644 = vmatpush.msrb.mxu1 %v1120_v40  ;;  %2665 = vmatpush.msrb.mxu2 %v1240_v17  ;;  %v505_v39 = vld [vmem:[%s4352_s12 + $0x1a8] sm:$0xff] }
 0x255   : > { %v976_v58 = vld [vmem:[%s4352_s12 + $0x1060] sm:$0xff]  ;;  %2684 = vmatpush.msrb.mxu3 %v1376_v41  ;;  %2588 = vmatmul.f32.vlgmr.msra.gmra.mxu2 %v5241_v26  ;;  %v641_v40 = vld [vmem:[%s4352_s12 + $0x5e8] sm:$0xff] }
 0x256   : > { %v1112_v53 = vld [vmem:[%s4352_s12 + $0x14a0] sm:$0xff]  ;;  %2626 = vmatpush.msrb.mxu0 %v976_v58  ;;  %2608 = vmatmul.f32.vlgmr.msra.gmra.mxu3 %v5253_v1  ;;  %v497_v41 = vld [vmem:[%s4352_s12 + $0x168] sm:$0xff] }
 0x257   : > { %v1232_v44 = vld [vmem:[%s4352_s12 + $0x1860] sm:$0xff]  ;;  %2645 = vmatpush.msrb.mxu1 %v1112_v53  ;;  %v473_v59 = vld [vmem:[%s4352_s12 + $0xa8] sm:$0xff] }
 0x258   : > { %v1368_v8 = vld [vmem:[%s4352_s12 + $0x1ca0] sm:$0xff]  ;;  %2666 = vmatpush.msrb.mxu2 %v1232_v44  ;;  %2568 = vmatmul.f32.vlgmr.msra.gmra.mxu1 %v5261_v57 }
 0x259   : > { %v968_v20 = vld [vmem:[%s4352_s12 + $0x1020] sm:$0xff]  ;;  %2685 = vmatpush.msrb.mxu3 %v1368_v8 }
 0x25a   : > { %v1104_v46 = vld [vmem:[%s4352_s12 + $0x1460] sm:$0xff]  ;;  %2627 = vmatpush.msrb.mxu0 %v968_v20  ;;  %v617_v20 = vld [vmem:[%s4352_s12 + $0x528] sm:$0xff] }
 0x25b   : > { %v1224_v47 = vld [vmem:[%s4352_s12 + $0x1820] sm:$0xff]  ;;  %2646 = vmatpush.msrb.mxu1 %v1104_v46 }
 0x25c   : > { %v1360_v5 = vld [vmem:[%s4352_s12 + $0x1c60] sm:$0xff]  ;;  %2667 = vmatpush.msrb.mxu2 %v1224_v47 }
 0x25d   : > { %v1600_v50 = vld [vmem:[%s4352_s12 + $0x23e0] sm:$0xff]  ;;  %2686 = vmatpush.msrb.mxu3 %v1360_v5  ;;  %2668 = vmatmul.f32.vlgmr.msrb.gmra.mxu2 %v5273_v12  ;;  %v609_v5 = vld [vmem:[%s4352_s12 + $0x4e8] sm:$0xff] }
 0x25e   : > { %v1096_v45 = vld [vmem:[%s4352_s12 + $0x1420] sm:$0xff]  ;;  %2732 = vmatpush.msra.mxu2 %v577_v51 }
 0x25f   : > { %v5248_v52 = vld [vmem:[%s4370_s17] sm:$0xff]  ;;  %2647 = vmatpush.msrb.mxu1 %v1096_v45  ;;  %v465_v45 = vld [vmem:[%s4352_s12 + $0x68] sm:$0xff] }
 0x260   : > { %2548 = vmatmul.f32.vlgmr.msra.gmra.mxu0 %v5248_v52  ;;  %v1352_v14 = vld [vmem:[%s4352_s12 + $0x1c20] sm:$0xff]  ;;  %2733 = vmatpush.msra.mxu2 %v569_v56  ;;  %v457_v56 = vld [vmem:[%s4352_s12 + $0x28] sm:$0xff] }
 0x261   : > { %2692 = vmatpush.msra.mxu0 %v1600_v50  ;;  %v1592_v54 = vld [vmem:[%s4352_s12 + $0x23a0] sm:$0xff]  ;;  %2687 = vmatpush.msrb.mxu3 %v1352_v14  ;;  %v601_v14 = vld [vmem:[%s4352_s12 + $0x4a8] sm:$0xff] }
 0x262   : > { %v1728_v55 = vld [vmem:[%s4352_s12 + $0x27e0] sm:$0xff]  ;;  %2734 = vmatpush.msra.mxu2 %v561_v62  ;;  %2688 = vmatmul.f32.vlgmr.msrb.gmra.mxu3 %v5285_v23 }
 0x263   : > { %v1584_v60 = vld [vmem:[%s4352_s12 + $0x2360] sm:$0xff]  ;;  %2693 = vmatpush.msra.mxu0 %v1592_v54  ;;  %2712 = vmatpush.msra.mxu1 %v1728_v55 }
 0x264   : > { %v1720_v61 = vld [vmem:[%s4352_s12 + $0x27a0] sm:$0xff]  ;;  %2752 = vmatpush.msra.mxu3 %v705_v49  ;;  %2735 = vmatpush.msra.mxu2 %v553_v9  ;;  %v593_v49 = vld [vmem:[%s4352_s12 + $0x468] sm:$0xff] }
 0x265   : > { %v1576_v4 = vld [vmem:[%s4352_s12 + $0x2320] sm:$0xff]  ;;  %2694 = vmatpush.msra.mxu0 %v1584_v60  ;;  %2713 = vmatpush.msra.mxu1 %v1720_v61  ;;  %v1089_v60 = vld [vmem:[%s4352_s12 + $0x13e8] sm:$0xff] }
 0x266   : > { %v1712_v7 = vld [vmem:[%s4352_s12 + $0x2760] sm:$0xff]  ;;  %2753 = vmatpush.msra.mxu3 %v697_v2  ;;  %2736 = vmatpush.msra.mxu2 %v545_v18  ;;  %v833_v61 = vld [vmem:[%s4352_s12 + $0xbe8] sm:$0xff] }
 0x267   : > { %2695 = vmatpush.msra.mxu0 %v1576_v4  ;;  %v1568_v13 = vld [vmem:[%s4352_s12 + $0x22e0] sm:$0xff]  ;;  %2714 = vmatpush.msra.mxu1 %v1712_v7  ;;  %v585_v2 = vld [vmem:[%s4352_s12 + $0x428] sm:$0xff] }
 0x268   : > { %v1704_v16 = vld [vmem:[%s4352_s12 + $0x2720] sm:$0xff]  ;;  %2754 = vmatpush.msra.mxu3 %v689_v10  ;;  %2648 = vmatmul.f32.vlgmr.msrb.gmra.mxu1 %v5293_v29  ;;  %v825_v7 = vld [vmem:[%s4352_s12 + $0xba8] sm:$0xff] }
 0x269   : > { %v5280_v19 = vld [vmem:[%s4370_s17 + $0x20] sm:$0xff]  ;;  %2696 = vmatpush.msra.mxu0 %v1568_v13  ;;  %2715 = vmatpush.msra.mxu1 %v1704_v16  ;;  %v961_v9 = vld [vmem:[%s4352_s12 + $0xfe8] sm:$0xff] }
 0x26a   : > { %2628 = vmatmul.f32.vlgmr.msrb.gmra.mxu0 %v5280_v19  ;;  %v1560_v24 = vld [vmem:[%s4352_s12 + $0x22a0] sm:$0xff]  ;;  %2755 = vmatpush.msra.mxu3 %v681_v22  ;;  %v1081_v10 = vld [vmem:[%s4352_s12 + $0x13a8] sm:$0xff] }
 0x26b   : > { %v1696_v25 = vld [vmem:[%s4352_s12 + $0x26e0] sm:$0xff]  ;;  %2697 = vmatpush.msra.mxu0 %v1560_v24  ;;  %2737 = vmatpush.msra.mxu2 %v537_v27  ;;  %v1217_v13 = vld [vmem:[%s4352_s12 + $0x17e8] sm:$0xff]  ;;  %v2369_v27 = vpop.f32.mrf.mxu3 }
 0x26c   : > { %v1552_v30 = vld [vmem:[%s4352_s12 + $0x2260] sm:$0xff]  ;;  %2716 = vmatpush.msra.mxu1 %v1696_v25  ;;  %2756 = vmatpush.msra.mxu3 %v673_v28  ;;  %v5349_v16 = vld [vmem:[%s4370_s17 + $0x48] sm:$0xff] }
 0x26d   : > { %v1688_v31 = vld [vmem:[%s4352_s12 + $0x26a0] sm:$0xff]  ;;  %2698 = vmatpush.msra.mxu0 %v1552_v30  ;;  %2738 = vmatpush.msra.mxu2 %v529_v32  ;;  %v817_v18 = vld [vmem:[%s4352_s12 + $0xb68] sm:$0xff] }
 0x26e   : > { %v1544_v33 = vld [vmem:[%s4352_s12 + $0x2220] sm:$0xff]  ;;  %2717 = vmatpush.msra.mxu1 %v1688_v31  ;;  %2757 = vmatpush.msra.mxu3 %v665_v0  ;;  %v953_v22 = vld [vmem:[%s4352_s12 + $0xfa8] sm:$0xff]  ;;  %v2349_v31 = vpop.f32.mrf.mxu2 }
 0x26f   : > { %v1680_v34 = vld [vmem:[%s4352_s12 + $0x2660] sm:$0xff]  ;;  %2699 = vmatpush.msra.mxu0 %v1544_v33  ;;  %2739 = vmatpush.msra.mxu2 %v521_v35  ;;  %v1073_v24 = vld [vmem:[%s4352_s12 + $0x1368] sm:$0xff]  ;;  %v2370_v33 = vadd.f32 %v2369_v27, %v2349_v31 }
 0x270   : > { %v1536_v37 = vld [vmem:[%s4352_s12 + $0x21e0] sm:$0xff]  ;;  %2718 = vmatpush.msra.mxu1 %v1680_v34  ;;  %2758 = vmatpush.msra.mxu3 %v657_v36  ;;  %v1209_v25 = vld [vmem:[%s4352_s12 + $0x17a8] sm:$0xff] }
 0x271   : > { %v1672_v15 = vld [vmem:[%s4352_s12 + $0x2620] sm:$0xff]  ;;  %2700 = vmatpush.msra.mxu0 %v1536_v37  ;;  %2740 = vmatpush.msra.mxu2 %v513_v11  ;;  %v809_v28 = vld [vmem:[%s4352_s12 + $0xb28] sm:$0xff] }
 0x272   : > { %v1528_v48 = vld [vmem:[%s4352_s12 + $0x21a0] sm:$0xff]  ;;  %2719 = vmatpush.msra.mxu1 %v1672_v15  ;;  %2759 = vmatpush.msra.mxu3 %v649_v6  ;;  %v945_v30 = vld [vmem:[%s4352_s12 + $0xf68] sm:$0xff]  ;;  %v2389_v15 = vpop.f32.mrf.mxu0 }
 0x273   : > { %v1664_v38 = vld [vmem:[%s4352_s12 + $0x25e0] sm:$0xff]  ;;  %2701 = vmatpush.msra.mxu0 %v1528_v48  ;;  %2741 = vmatpush.msra.mxu2 %v505_v39  ;;  %v1065_v32 = vld [vmem:[%s4352_s12 + $0x1328] sm:$0xff]  ;;  %v2390_v39 = vadd.f32 %v2389_v15, %v2370_v33 }
 0x274   : > { %v1520_v21 = vld [vmem:[%s4352_s12 + $0x2160] sm:$0xff]  ;;  %2720 = vmatpush.msra.mxu1 %v1664_v38  ;;  %2760 = vmatpush.msra.mxu3 %v641_v40  ;;  %v1201_v0 = vld [vmem:[%s4352_s12 + $0x1768] sm:$0xff] }
 0x275   : > { %v1656_v17 = vld [vmem:[%s4352_s12 + $0x25a0] sm:$0xff]  ;;  %2702 = vmatpush.msra.mxu0 %v1520_v21  ;;  %2742 = vmatpush.msra.mxu2 %v497_v41  ;;  %v801_v34 = vld [vmem:[%s4352_s12 + $0xae8] sm:$0xff] }
 0x276   : > { %v1512_v58 = vld [vmem:[%s4352_s12 + $0x2120] sm:$0xff]  ;;  %2721 = vmatpush.msra.mxu1 %v1656_v17  ;;  %2761 = vmatpush.msra.mxu3 %v633_v63  ;;  %v937_v35 = vld [vmem:[%s4352_s12 + $0xf28] sm:$0xff]  ;;  %v2409_v17 = vpop.f32.mrf.mxu1 }
 0x277   : > { %v1648_v53 = vld [vmem:[%s4352_s12 + $0x2560] sm:$0xff]  ;;  %2703 = vmatpush.msra.mxu0 %v1512_v58  ;;  %2743 = vmatpush.msra.mxu2 %v489_v42  ;;  %v1057_v36 = vld [vmem:[%s4352_s12 + $0x12e8] sm:$0xff] }
 0x278   : > { %v1504_v44 = vld [vmem:[%s4352_s12 + $0x20e0] sm:$0xff]  ;;  %2722 = vmatpush.msra.mxu1 %v1648_v53  ;;  %2762 = vmatpush.msra.mxu3 %v625_v43  ;;  %v1193_v37 = vld [vmem:[%s4352_s12 + $0x1728] sm:$0xff] }
 0x279   : > { %v1640_v8 = vld [vmem:[%s4352_s12 + $0x2520] sm:$0xff]  ;;  %2704 = vmatpush.msra.mxu0 %v1504_v44  ;;  %2744 = vmatpush.msra.mxu2 %v481_v3  ;;  %v793_v11 = vld [vmem:[%s4352_s12 + $0xaa8] sm:$0xff]  ;;  %v2410_v44 = vadd.f32 %v2409_v17, %v2390_v39  ;;  %v437_v17 = vld [vmem:[#allocation2 + $0x10] sm:$0xff] }
 0x27a   : > { %v1496_v46 = vld [vmem:[%s4352_s12 + $0x20a0] sm:$0xff]  ;;  %2723 = vmatpush.msra.mxu1 %v1640_v8  ;;  %2763 = vmatpush.msra.mxu3 %v617_v20  ;;  %v929_v6 = vld [vmem:[%s4352_s12 + $0xee8] sm:$0xff]  ;;  %v2429_v20 = vpop.f32.mrf.mxu2 }
 0x27b   : > { %v1632_v47 = vld [vmem:[%s4352_s12 + $0x24e0] sm:$0xff]  ;;  %2705 = vmatpush.msra.mxu0 %v1496_v46  ;;  %2745 = vmatpush.msra.mxu2 %v473_v59  ;;  %v1049_v48 = vld [vmem:[%s4352_s12 + $0x12a8] sm:$0xff] }
 0x27c   : > { %v1488_v50 = vld [vmem:[%s4352_s12 + $0x2060] sm:$0xff]  ;;  %2724 = vmatpush.msra.mxu1 %v1632_v47  ;;  %2764 = vmatpush.msra.mxu3 %v609_v5  ;;  %v1185_v38 = vld [vmem:[%s4352_s12 + $0x16e8] sm:$0xff] }
 0x27d   : > { %v1624_v51 = vld [vmem:[%s4352_s12 + $0x24a0] sm:$0xff]  ;;  %2706 = vmatpush.msra.mxu0 %v1488_v50  ;;  %2746 = vmatpush.msra.mxu2 %v465_v45  ;;  %v785_v40 = vld [vmem:[%s4352_s12 + $0xa68] sm:$0xff]  ;;  %v2430_v45 = vadd.f32 %v2429_v20, %v2410_v44 }
 0x27e   : > { %v1480_v54 = vld [vmem:[%s4352_s12 + $0x2020] sm:$0xff]  ;;  %2725 = vmatpush.msra.mxu1 %v1624_v51  ;;  %2765 = vmatpush.msra.mxu3 %v601_v14  ;;  %v921_v21 = vld [vmem:[%s4352_s12 + $0xea8] sm:$0xff] }
 0x27f   : > { %v1616_v55 = vld [vmem:[%s4352_s12 + $0x2460] sm:$0xff]  ;;  %2707 = vmatpush.msra.mxu0 %v1480_v54  ;;  %2747 = vmatpush.msra.mxu2 %v457_v56  ;;  %v1041_v41 = vld [vmem:[%s4352_s12 + $0x1268] sm:$0xff] }
 0x280   : > { %2726 = vmatpush.msra.mxu1 %v1616_v55  ;;  %v1608_v62 = vld [vmem:[%s4352_s12 + $0x2420] sm:$0xff]  ;;  %2766 = vmatpush.msra.mxu3 %v593_v49  ;;  %v1177_v63 = vld [vmem:[%s4352_s12 + $0x16a8] sm:$0xff]  ;;  %v2449_v55 = vpop.f32.mrf.mxu3 }
 0x281   : > { %v5341_v4 = vld [vmem:[%s4370_s17 + $0x40] sm:$0xff]  ;;  %2812 = vmatpush.msrb.mxu2 %v1089_v60  ;;  %2772 = vmatpush.msrb.mxu0 %v833_v61  ;;  %v777_v58 = vld [vmem:[%s4352_s12 + $0xa28] sm:$0xff] }
 0x282   : > { %2708 = vmatmul.f32.vlgmr.msra.gmra.mxu0 %v5341_v4  ;;  %2727 = vmatpush.msra.mxu1 %v1608_v62  ;;  %v913_v53 = vld [vmem:[%s4352_s12 + $0xe68] sm:$0xff] }
 0x283   : > { %2767 = vmatpush.msra.mxu3 %v585_v2  ;;  %2728 = vmatmul.f32.vlgmr.msra.gmra.mxu1 %v5349_v16  ;;  %v1033_v42 = vld [vmem:[%s4352_s12 + $0x1228] sm:$0xff] }
 0x284   : > { %2773 = vmatpush.msrb.mxu0 %v825_v7  ;;  %2792 = vmatpush.msrb.mxu1 %v961_v9  ;;  %v1169_v43 = vld [vmem:[%s4352_s12 + $0x1668] sm:$0xff]  ;;  %v2450_v7 = vadd.f32 %v2449_v55, %v2430_v45 }
 0x285   : > { %2813 = vmatpush.msrb.mxu2 %v1081_v10  ;;  %2832 = vmatpush.msrb.mxu3 %v1217_v13  ;;  %v769_v8 = vld [vmem:[%s4352_s12 + $0x9e8] sm:$0xff] }
 0x286   : > { %2774 = vmatpush.msrb.mxu0 %v817_v18  ;;  %2793 = vmatpush.msrb.mxu1 %v953_v22  ;;  %v905_v3 = vld [vmem:[%s4352_s12 + $0xe28] sm:$0xff] }
 0x287   : > { %2814 = vmatpush.msrb.mxu2 %v1073_v24  ;;  %2833 = vmatpush.msrb.mxu3 %v1209_v25  ;;  %v1025_v46 = vld [vmem:[%s4352_s12 + $0x11e8] sm:$0xff] }
 0x288   : > { %2775 = vmatpush.msrb.mxu0 %v809_v28  ;;  %2794 = vmatpush.msrb.mxu1 %v945_v30  ;;  %v1161_v47 = vld [vmem:[%s4352_s12 + $0x1628] sm:$0xff] }
 0x289   : > { %2815 = vmatpush.msrb.mxu2 %v1065_v32  ;;  %2834 = vmatpush.msrb.mxu3 %v1201_v0  ;;  %v761_v59 = vld [vmem:[%s4352_s12 + $0x9a8] sm:$0xff] }
 0x28a   : > { %2776 = vmatpush.msrb.mxu0 %v801_v34  ;;  %2795 = vmatpush.msrb.mxu1 %v937_v35  ;;  %v897_v5 = vld [vmem:[%s4352_s12 + $0xde8] sm:$0xff] }
 0x28b   : > { %2816 = vmatpush.msrb.mxu2 %v1057_v36  ;;  %2835 = vmatpush.msrb.mxu3 %v1193_v37  ;;  %v1017_v50 = vld [vmem:[%s4352_s12 + $0x11a8] sm:$0xff] }
 0x28c   : > { %2777 = vmatpush.msrb.mxu0 %v793_v11  ;;  %2796 = vmatpush.msrb.mxu1 %v929_v6  ;;  %v1153_v51 = vld [vmem:[%s4352_s12 + $0x15e8] sm:$0xff] }
 0x28d   : > { %2817 = vmatpush.msrb.mxu2 %v1049_v48  ;;  %2836 = vmatpush.msrb.mxu3 %v1185_v38  ;;  %v753_v14 = vld [vmem:[%s4352_s12 + $0x968] sm:$0xff] }
 0x28e   : > { %2778 = vmatpush.msrb.mxu0 %v785_v40  ;;  %2797 = vmatpush.msrb.mxu1 %v921_v21  ;;  %v889_v54 = vld [vmem:[%s4352_s12 + $0xda8] sm:$0xff] }
 0x28f   : > { %2818 = vmatpush.msrb.mxu2 %v1041_v41  ;;  %2837 = vmatpush.msrb.mxu3 %v1177_v63  ;;  %v1009_v56 = vld [vmem:[%s4352_s12 + $0x1168] sm:$0xff] }
 0x290   : > { %2779 = vmatpush.msrb.mxu0 %v777_v58  ;;  %2798 = vmatpush.msrb.mxu1 %v913_v53  ;;  %v1145_v49 = vld [vmem:[%s4352_s12 + $0x15a8] sm:$0xff] }
 0x291   : > { %2819 = vmatpush.msrb.mxu2 %v1033_v42  ;;  %2838 = vmatpush.msrb.mxu3 %v1169_v43  ;;  %v745_v60 = vld [vmem:[%s4352_s12 + $0x928] sm:$0xff] }
 0x292   : > { %2780 = vmatpush.msrb.mxu0 %v769_v8  ;;  %2799 = vmatpush.msrb.mxu1 %v905_v3  ;;  %v881_v61 = vld [vmem:[%s4352_s12 + $0xd68] sm:$0xff] }
 0x293   : > { %2820 = vmatpush.msrb.mxu2 %v1025_v46  ;;  %2839 = vmatpush.msrb.mxu3 %v1161_v47  ;;  %v1001_v62 = vld [vmem:[%s4352_s12 + $0x1128] sm:$0xff]  ;;  %v2469_v22 = vpop.f32.mrf.mxu0 }
 0x294   : > { %2781 = vmatpush.msrb.mxu0 %v761_v59  ;;  %2800 = vmatpush.msrb.mxu1 %v897_v5  ;;  %v1137_v2 = vld [vmem:[%s4352_s12 + $0x1568] sm:$0xff]  ;;  %v2470_v27 = vadd.f32 %v2469_v22, %v2450_v7 }
 0x295   : > { %2821 = vmatpush.msrb.mxu2 %v1017_v50  ;;  %2840 = vmatpush.msrb.mxu3 %v1153_v51  ;;  %v737_v9 = vld [vmem:[%s4352_s12 + $0x8e8] sm:$0xff] }
 0x296   : > { %2782 = vmatpush.msrb.mxu0 %v753_v14  ;;  %2801 = vmatpush.msrb.mxu1 %v889_v54  ;;  %v873_v10 = vld [vmem:[%s4352_s12 + $0xd28] sm:$0xff] }
 0x297   : > { %2822 = vmatpush.msrb.mxu2 %v1009_v56  ;;  %2841 = vmatpush.msrb.mxu3 %v1145_v49  ;;  %v993_v13 = vld [vmem:[%s4352_s12 + $0x10e8] sm:$0xff]  ;;  %v2489_v0 = vpop.f32.mrf.mxu1 }
 0x298   : > { %2783 = vmatpush.msrb.mxu0 %v745_v60  ;;  %2802 = vmatpush.msrb.mxu1 %v881_v61  ;;  %v1129_v18 = vld [vmem:[%s4352_s12 + $0x1528] sm:$0xff]  ;;  %v2490_v36 = vadd.f32 %v2489_v0, %v2470_v27 }
 0x299   : > { %2823 = vmatpush.msrb.mxu2 %v1001_v62  ;;  %2842 = vmatpush.msrb.mxu3 %v1137_v2  ;;  %v729_v24 = vld [vmem:[%s4352_s12 + $0x8a8] sm:$0xff] }
 0x29a   : > { %v865_v25 = vld [vmem:[%s4352_s12 + $0xce8] sm:$0xff]  ;;  %2784 = vmatpush.msrb.mxu0 %v737_v9  ;;  %2803 = vmatpush.msrb.mxu1 %v873_v10 }
 0x29b   : > { %v985_v28 = vld [vmem:[%s4352_s12 + $0x10a8] sm:$0xff]  ;;  %2824 = vmatpush.msrb.mxu2 %v993_v13  ;;  %2843 = vmatpush.msrb.mxu3 %v1129_v18  ;;  %v2509_v11 = vpop.f32.mrf.mxu2 }
 0x29c   : > { %v1121_v30 = vld [vmem:[%s4352_s12 + $0x14e8] sm:$0xff]  ;;  %2785 = vmatpush.msrb.mxu0 %v729_v24  ;;  %2804 = vmatpush.msrb.mxu1 %v865_v25  ;;  %v2510_v38 = vadd.f32 %v2509_v11, %v2490_v36 }
 0x29d   : > { %v721_v31 = vld [vmem:[%s4352_s12 + $0x868] sm:$0xff]  ;;  %2825 = vmatpush.msrb.mxu2 %v985_v28  ;;  %2844 = vmatpush.msrb.mxu3 %v1121_v30 }
 0x29e   : > { %v857_v32 = vld [vmem:[%s4352_s12 + $0xca8] sm:$0xff]  ;;  %2786 = vmatpush.msrb.mxu0 %v721_v31  ;;  %2748 = vmatmul.f32.vlgmr.msra.gmra.mxu2 %v5248_v52  ;;  %v2529_v41 = vpop.f32.mrf.mxu3 }
 0x29f   : > { %v977_v33 = vld [vmem:[%s4352_s12 + $0x1068] sm:$0xff]  ;;  %2805 = vmatpush.msrb.mxu1 %v857_v32  ;;  %v2530_v53 = vadd.f32 %v2529_v41, %v2510_v38  ;;  %2768 = vmatmul.f32.vlgmr.msra.gmra.mxu3 %v5261_v57 }
 0x2a0   : > { %v1113_v34 = vld [vmem:[%s4352_s12 + $0x14a8] sm:$0xff]  ;;  %2826 = vmatpush.msrb.mxu2 %v977_v33 }
 0x2a1   : > { %v713_v35 = vld [vmem:[%s4352_s12 + $0x828] sm:$0xff]  ;;  %2845 = vmatpush.msrb.mxu3 %v1113_v34  ;;  %v3335_v8 = vadd.f32 %v2530_v53, %v437_v17  ;;  %v578_v53 = vld [vmem:[%s4352_s12 + $0x3f0] sm:$0xff] }
 0x2a2   : > { %v849_v37 = vld [vmem:[%s4352_s12 + $0xc68] sm:$0xff]  ;;  %2787 = vmatpush.msrb.mxu0 %v713_v35 }
 0x2a3   : > { %v969_v15 = vld [vmem:[%s4352_s12 + $0x1028] sm:$0xff]  ;;  %2806 = vmatpush.msrb.mxu1 %v849_v37  ;;  %3343 = vst [vmem:[#allocation2 + $0x10] sm:$0xff] %v3335_v8  ;;  %2788 = vmatmul.f32.vlgmr.msrb.gmra.mxu0 %v5241_v26  ;;  %v706_v8 = vld [vmem:[%s4352_s12 + $0x7f0] sm:$0xff] }
 0x2a4   : > { %v1105_v6 = vld [vmem:[%s4352_s12 + $0x1468] sm:$0xff]  ;;  %2827 = vmatpush.msrb.mxu2 %v969_v15 }
 0x2a5   : > { %v1345_v48 = vld [vmem:[%s4352_s12 + $0x1be8] sm:$0xff]  ;;  %2846 = vmatpush.msrb.mxu3 %v1105_v6 }
 0x2a6   : > { %v1601_v39 = vld [vmem:[%s4352_s12 + $0x23e8] sm:$0xff]  ;;  %2852 = vmatpush.msra.mxu0 %v1345_v48  ;;  %2828 = vmatmul.f32.vlgmr.msrb.gmra.mxu2 %v5280_v19 }
 0x2a7   : > { %v841_v40 = vld [vmem:[%s4352_s12 + $0xc28] sm:$0xff]  ;;  %2892 = vmatpush.msra.mxu2 %v1601_v39 }
 0x2a8   : > { %v1097_v21 = vld [vmem:[%s4352_s12 + $0x1428] sm:$0xff]  ;;  %2807 = vmatpush.msrb.mxu1 %v841_v40 }
 0x2a9   : > { %v1337_v63 = vld [vmem:[%s4352_s12 + $0x1ba8] sm:$0xff]  ;;  %2847 = vmatpush.msrb.mxu3 %v1097_v21  ;;  %2808 = vmatmul.f32.vlgmr.msrb.gmra.mxu1 %v5253_v1 }
 0x2aa   : > { %v1473_v58 = vld [vmem:[%s4352_s12 + $0x1fe8] sm:$0xff]  ;;  %2853 = vmatpush.msra.mxu0 %v1337_v63  ;;  %2848 = vmatmul.f32.vlgmr.msrb.gmra.mxu3 %v5293_v29 }
 0x2ab   : > { %v1593_v52 = vld [vmem:[%s4352_s12 + $0x23a8] sm:$0xff]  ;;  %2872 = vmatpush.msra.mxu1 %v1473_v58 }
 0x2ac   : > { %v1729_v42 = vld [vmem:[%s4352_s12 + $0x27e8] sm:$0xff]  ;;  %2893 = vmatpush.msra.mxu2 %v1593_v52  ;;  %v834_v52 = vld [vmem:[%s4352_s12 + $0xbf0] sm:$0xff] }
 0x2ad   : > { %v1329_v43 = vld [vmem:[%s4352_s12 + $0x1b68] sm:$0xff]  ;;  %2912 = vmatpush.msra.mxu3 %v1729_v42 }
 0x2ae   : > { %v1465_v44 = vld [vmem:[%s4352_s12 + $0x1fa8] sm:$0xff]  ;;  %2854 = vmatpush.msra.mxu0 %v1329_v43 }
 0x2af   : > { %v1585_v3 = vld [vmem:[%s4352_s12 + $0x2368] sm:$0xff]  ;;  %2873 = vmatpush.msra.mxu1 %v1465_v44  ;;  %v570_v44 = vld [vmem:[%s4352_s12 + $0x3b0] sm:$0xff] }
 0x2b0   : > { %v1721_v20 = vld [vmem:[%s4352_s12 + $0x27a8] sm:$0xff]  ;;  %2894 = vmatpush.msra.mxu2 %v1585_v3  ;;  %v826_v3 = vld [vmem:[%s4352_s12 + $0xbb0] sm:$0xff] }
 0x2b1   : > { %v1321_v57 = vld [vmem:[%s4352_s12 + $0x1b28] sm:$0xff]  ;;  %2913 = vmatpush.msra.mxu3 %v1721_v20  ;;  %v962_v20 = vld [vmem:[%s4352_s12 + $0xff0] sm:$0xff] }
 0x2b2   : > { %v1457_v46 = vld [vmem:[%s4352_s12 + $0x1f68] sm:$0xff]  ;;  %2855 = vmatpush.msra.mxu0 %v1321_v57  ;;  %v818_v57 = vld [vmem:[%s4352_s12 + $0xb70] sm:$0xff] }
 0x2b3   : > { %v1577_v47 = vld [vmem:[%s4352_s12 + $0x2328] sm:$0xff]  ;;  %2874 = vmatpush.msra.mxu1 %v1457_v46  ;;  %v954_v46 = vld [vmem:[%s4352_s12 + $0xfb0] sm:$0xff] }
 0x2b4   : > { %v1713_v59 = vld [vmem:[%s4352_s12 + $0x2768] sm:$0xff]  ;;  %2895 = vmatpush.msra.mxu2 %v1577_v47  ;;  %v554_v47 = vld [vmem:[%s4352_s12 + $0x330] sm:$0xff] }
 0x2b5   : > { %v1313_v5 = vld [vmem:[%s4352_s12 + $0x1ae8] sm:$0xff]  ;;  %2914 = vmatpush.msra.mxu3 %v1713_v59  ;;  %v690_v59 = vld [vmem:[%s4352_s12 + $0x770] sm:$0xff] }
 0x2b6   : > { %v1449_v50 = vld [vmem:[%s4352_s12 + $0x1f28] sm:$0xff]  ;;  %2856 = vmatpush.msra.mxu0 %v1313_v5  ;;  %v546_v5 = vld [vmem:[%s4352_s12 + $0x2f0] sm:$0xff] }
 0x2b7   : > { %v1569_v51 = vld [vmem:[%s4352_s12 + $0x22e8] sm:$0xff]  ;;  %2875 = vmatpush.msra.mxu1 %v1449_v50  ;;  %v682_v50 = vld [vmem:[%s4352_s12 + $0x730] sm:$0xff] }
 0x2b8   : > { %v1705_v45 = vld [vmem:[%s4352_s12 + $0x2728] sm:$0xff]  ;;  %2896 = vmatpush.msra.mxu2 %v1569_v51  ;;  %v802_v51 = vld [vmem:[%s4352_s12 + $0xaf0] sm:$0xff] }
 0x2b9   : > { %v1305_v19 = vld [vmem:[%s4352_s12 + $0x1aa8] sm:$0xff]  ;;  %2915 = vmatpush.msra.mxu3 %v1705_v45  ;;  %v938_v45 = vld [vmem:[%s4352_s12 + $0xf30] sm:$0xff] }
 0x2ba   : > { %v1441_v14 = vld [vmem:[%s4352_s12 + $0x1ee8] sm:$0xff]  ;;  %2857 = vmatpush.msra.mxu0 %v1305_v19  ;;  %v538_v19 = vld [vmem:[%s4352_s12 + $0x2b0] sm:$0xff] }
 0x2bb   : > { %v1561_v54 = vld [vmem:[%s4352_s12 + $0x22a8] sm:$0xff]  ;;  %2876 = vmatpush.msra.mxu1 %v1441_v14  ;;  %v674_v14 = vld [vmem:[%s4352_s12 + $0x6f0] sm:$0xff] }
 0x2bc   : > { %v1697_v55 = vld [vmem:[%s4352_s12 + $0x26e8] sm:$0xff]  ;;  %2897 = vmatpush.msra.mxu2 %v1561_v54  ;;  %v794_v54 = vld [vmem:[%s4352_s12 + $0xab0] sm:$0xff] }
 0x2bd   : > { %v1297_v26 = vld [vmem:[%s4352_s12 + $0x1a68] sm:$0xff]  ;;  %2916 = vmatpush.msra.mxu3 %v1697_v55  ;;  %v930_v55 = vld [vmem:[%s4352_s12 + $0xef0] sm:$0xff] }
 0x2be   : > { %v1433_v56 = vld [vmem:[%s4352_s12 + $0x1ea8] sm:$0xff]  ;;  %2858 = vmatpush.msra.mxu0 %v1297_v26  ;;  %v530_v26 = vld [vmem:[%s4352_s12 + $0x270] sm:$0xff] }
 0x2bf   : > { %v1553_v29 = vld [vmem:[%s4352_s12 + $0x2268] sm:$0xff]  ;;  %2877 = vmatpush.msra.mxu1 %v1433_v56  ;;  %v666_v56 = vld [vmem:[%s4352_s12 + $0x6b0] sm:$0xff] }
 0x2c0   : > { %v1689_v49 = vld [vmem:[%s4352_s12 + $0x26a8] sm:$0xff]  ;;  %2898 = vmatpush.msra.mxu2 %v1553_v29  ;;  %v786_v29 = vld [vmem:[%s4352_s12 + $0xa70] sm:$0xff] }
 0x2c1   : > { %v1289_v60 = vld [vmem:[%s4352_s12 + $0x1a28] sm:$0xff]  ;;  %2917 = vmatpush.msra.mxu3 %v1689_v49  ;;  %v922_v49 = vld [vmem:[%s4352_s12 + $0xeb0] sm:$0xff] }
 0x2c2   : > { %v1425_v61 = vld [vmem:[%s4352_s12 + $0x1e68] sm:$0xff]  ;;  %2859 = vmatpush.msra.mxu0 %v1289_v60  ;;  %v522_v60 = vld [vmem:[%s4352_s12 + $0x230] sm:$0xff] }
 0x2c3   : > { %v1545_v62 = vld [vmem:[%s4352_s12 + $0x2228] sm:$0xff]  ;;  %2878 = vmatpush.msra.mxu1 %v1425_v61  ;;  %v658_v61 = vld [vmem:[%s4352_s12 + $0x670] sm:$0xff] }
 0x2c4   : > { %v1681_v1 = vld [vmem:[%s4352_s12 + $0x2668] sm:$0xff]  ;;  %2899 = vmatpush.msra.mxu2 %v1545_v62  ;;  %v778_v62 = vld [vmem:[%s4352_s12 + $0xa30] sm:$0xff] }
 0x2c5   : > { %v1281_v2 = vld [vmem:[%s4352_s12 + $0x19e8] sm:$0xff]  ;;  %2918 = vmatpush.msra.mxu3 %v1681_v1  ;;  %v914_v1 = vld [vmem:[%s4352_s12 + $0xe70] sm:$0xff] }
 0x2c6   : > { %v1417_v7 = vld [vmem:[%s4352_s12 + $0x1e28] sm:$0xff]  ;;  %2860 = vmatpush.msra.mxu0 %v1281_v2  ;;  %v514_v2 = vld [vmem:[%s4352_s12 + $0x1f0] sm:$0xff] }
 0x2c7   : > { %v1537_v9 = vld [vmem:[%s4352_s12 + $0x21e8] sm:$0xff]  ;;  %2879 = vmatpush.msra.mxu1 %v1417_v7  ;;  %v650_v7 = vld [vmem:[%s4352_s12 + $0x630] sm:$0xff] }
 0x2c8   : > { %v1673_v10 = vld [vmem:[%s4352_s12 + $0x2628] sm:$0xff]  ;;  %2900 = vmatpush.msra.mxu2 %v1537_v9  ;;  %v770_v9 = vld [vmem:[%s4352_s12 + $0x9f0] sm:$0xff] }
 0x2c9   : > { %v1273_v13 = vld [vmem:[%s4352_s12 + $0x19a8] sm:$0xff]  ;;  %2919 = vmatpush.msra.mxu3 %v1673_v10  ;;  %v906_v10 = vld [vmem:[%s4352_s12 + $0xe30] sm:$0xff] }
 0x2ca   : > { %v1409_v18 = vld [vmem:[%s4352_s12 + $0x1de8] sm:$0xff]  ;;  %2861 = vmatpush.msra.mxu0 %v1273_v13  ;;  %v506_v13 = vld [vmem:[%s4352_s12 + $0x1b0] sm:$0xff] }
 0x2cb   : > { %v1529_v22 = vld [vmem:[%s4352_s12 + $0x21a8] sm:$0xff]  ;;  %2880 = vmatpush.msra.mxu1 %v1409_v18  ;;  %v642_v18 = vld [vmem:[%s4352_s12 + $0x5f0] sm:$0xff] }
 0x2cc   : > { %v1665_v24 = vld [vmem:[%s4352_s12 + $0x25e8] sm:$0xff]  ;;  %2901 = vmatpush.msra.mxu2 %v1529_v22  ;;  %v762_v22 = vld [vmem:[%s4352_s12 + $0x9b0] sm:$0xff] }
 0x2cd   : > { %v1265_v25 = vld [vmem:[%s4352_s12 + $0x1968] sm:$0xff]  ;;  %2920 = vmatpush.msra.mxu3 %v1665_v24  ;;  %v898_v24 = vld [vmem:[%s4352_s12 + $0xdf0] sm:$0xff] }
 0x2ce   : > { %v1401_v27 = vld [vmem:[%s4352_s12 + $0x1da8] sm:$0xff]  ;;  %2862 = vmatpush.msra.mxu0 %v1265_v25  ;;  %v498_v25 = vld [vmem:[%s4352_s12 + $0x170] sm:$0xff] }
 0x2cf   : > { %v1521_v28 = vld [vmem:[%s4352_s12 + $0x2168] sm:$0xff]  ;;  %2881 = vmatpush.msra.mxu1 %v1401_v27  ;;  %v634_v27 = vld [vmem:[%s4352_s12 + $0x5b0] sm:$0xff] }
 0x2d0   : > { %v1657_v30 = vld [vmem:[%s4352_s12 + $0x25a8] sm:$0xff]  ;;  %2902 = vmatpush.msra.mxu2 %v1521_v28  ;;  %v754_v28 = vld [vmem:[%s4352_s12 + $0x970] sm:$0xff] }
 0x2d1   : > { %v1257_v31 = vld [vmem:[%s4352_s12 + $0x1928] sm:$0xff]  ;;  %2921 = vmatpush.msra.mxu3 %v1657_v30  ;;  %v890_v30 = vld [vmem:[%s4352_s12 + $0xdb0] sm:$0xff] }
 0x2d2   : > { %v1393_v32 = vld [vmem:[%s4352_s12 + $0x1d68] sm:$0xff]  ;;  %2863 = vmatpush.msra.mxu0 %v1257_v31  ;;  %v490_v31 = vld [vmem:[%s4352_s12 + $0x130] sm:$0xff] }
 0x2d3   : > { %v1513_v0 = vld [vmem:[%s4352_s12 + $0x2128] sm:$0xff]  ;;  %2882 = vmatpush.msra.mxu1 %v1393_v32  ;;  %v626_v32 = vld [vmem:[%s4352_s12 + $0x570] sm:$0xff] }
 0x2d4   : > { %v1649_v33 = vld [vmem:[%s4352_s12 + $0x2568] sm:$0xff]  ;;  %2903 = vmatpush.msra.mxu2 %v1513_v0  ;;  %v746_v0 = vld [vmem:[%s4352_s12 + $0x930] sm:$0xff] }
 0x2d5   : > { %v1249_v34 = vld [vmem:[%s4352_s12 + $0x18e8] sm:$0xff]  ;;  %2922 = vmatpush.msra.mxu3 %v1649_v33  ;;  %v882_v33 = vld [vmem:[%s4352_s12 + $0xd70] sm:$0xff] }
 0x2d6   : > { %v1385_v35 = vld [vmem:[%s4352_s12 + $0x1d28] sm:$0xff]  ;;  %2864 = vmatpush.msra.mxu0 %v1249_v34  ;;  %v482_v34 = vld [vmem:[%s4352_s12 + $0xf0] sm:$0xff] }
 0x2d7   : > { %v1505_v36 = vld [vmem:[%s4352_s12 + $0x20e8] sm:$0xff]  ;;  %2883 = vmatpush.msra.mxu1 %v1385_v35  ;;  %v618_v35 = vld [vmem:[%s4352_s12 + $0x530] sm:$0xff] }
 0x2d8   : > { %v1641_v37 = vld [vmem:[%s4352_s12 + $0x2528] sm:$0xff]  ;;  %2904 = vmatpush.msra.mxu2 %v1505_v36  ;;  %v738_v36 = vld [vmem:[%s4352_s12 + $0x8f0] sm:$0xff] }
 0x2d9   : > { %v1241_v15 = vld [vmem:[%s4352_s12 + $0x18a8] sm:$0xff]  ;;  %2923 = vmatpush.msra.mxu3 %v1641_v37  ;;  %v874_v37 = vld [vmem:[%s4352_s12 + $0xd30] sm:$0xff] }
 0x2da   : > { %v1377_v11 = vld [vmem:[%s4352_s12 + $0x1ce8] sm:$0xff]  ;;  %2865 = vmatpush.msra.mxu0 %v1241_v15  ;;  %v474_v15 = vld [vmem:[%s4352_s12 + $0xb0] sm:$0xff] }
 0x2db   : > { %v1497_v6 = vld [vmem:[%s4352_s12 + $0x20a8] sm:$0xff]  ;;  %2884 = vmatpush.msra.mxu1 %v1377_v11  ;;  %v610_v11 = vld [vmem:[%s4352_s12 + $0x4f0] sm:$0xff] }
 0x2dc   : > { %v1633_v48 = vld [vmem:[%s4352_s12 + $0x24e8] sm:$0xff]  ;;  %2905 = vmatpush.msra.mxu2 %v1497_v6  ;;  %v730_v6 = vld [vmem:[%s4352_s12 + $0x8b0] sm:$0xff] }
 0x2dd   : > { %v1233_v38 = vld [vmem:[%s4352_s12 + $0x1868] sm:$0xff]  ;;  %2924 = vmatpush.msra.mxu3 %v1633_v48  ;;  %v866_v48 = vld [vmem:[%s4352_s12 + $0xcf0] sm:$0xff] }
 0x2de   : > { %v1369_v39 = vld [vmem:[%s4352_s12 + $0x1ca8] sm:$0xff]  ;;  %2866 = vmatpush.msra.mxu0 %v1233_v38  ;;  %v466_v38 = vld [vmem:[%s4352_s12 + $0x70] sm:$0xff] }
 0x2df   : > { %v1489_v40 = vld [vmem:[%s4352_s12 + $0x2068] sm:$0xff]  ;;  %2885 = vmatpush.msra.mxu1 %v1369_v39  ;;  %v602_v39 = vld [vmem:[%s4352_s12 + $0x4b0] sm:$0xff] }
 0x2e0   : > { %v1625_v21 = vld [vmem:[%s4352_s12 + $0x24a8] sm:$0xff]  ;;  %2906 = vmatpush.msra.mxu2 %v1489_v40  ;;  %v722_v40 = vld [vmem:[%s4352_s12 + $0x870] sm:$0xff] }
 0x2e1   : > { %v1225_v17 = vld [vmem:[%s4352_s12 + $0x1828] sm:$0xff]  ;;  %2925 = vmatpush.msra.mxu3 %v1625_v21  ;;  %v858_v21 = vld [vmem:[%s4352_s12 + $0xcb0] sm:$0xff] }
 0x2e2   : > { %v1361_v41 = vld [vmem:[%s4352_s12 + $0x1c68] sm:$0xff]  ;;  %2867 = vmatpush.msra.mxu0 %v1225_v17  ;;  %v458_v17 = vld [vmem:[%s4352_s12 + $0x30] sm:$0xff] }
 0x2e3   : > { %v1481_v63 = vld [vmem:[%s4352_s12 + $0x2028] sm:$0xff]  ;;  %2886 = vmatpush.msra.mxu1 %v1361_v41  ;;  %2868 = vmatmul.f32.vlgmr.msra.gmra.mxu0 %v5273_v12  ;;  %v562_v12 = vld [vmem:[%s4352_s12 + $0x370] sm:$0xff] }
 0x2e4   : > { %v1617_v58 = vld [vmem:[%s4352_s12 + $0x2468] sm:$0xff]  ;;  %2907 = vmatpush.msra.mxu2 %v1481_v63  ;;  %2932 = vmatpush.msrb.mxu0 %v578_v53  ;;  %v594_v41 = vld [vmem:[%s4352_s12 + $0x470] sm:$0xff]  ;;  %v2569_v63 = vpop.f32.mrf.mxu1 }
 0x2e5   : > { %2926 = vmatpush.msra.mxu3 %v1617_v58  ;;  %v1353_v42 = vld [vmem:[%s4352_s12 + $0x1c28] sm:$0xff]  ;;  %2908 = vmatmul.f32.vlgmr.msra.gmra.mxu2 %v5341_v4  ;;  %v698_v4 = vld [vmem:[%s4352_s12 + $0x7b0] sm:$0xff] }
 0x2e6   : > { %v1609_v43 = vld [vmem:[%s4352_s12 + $0x2428] sm:$0xff]  ;;  %2972 = vmatpush.msrb.mxu2 %v834_v52  ;;  %2887 = vmatpush.msra.mxu1 %v1353_v42  ;;  %v714_v58 = vld [vmem:[%s4352_s12 + $0x830] sm:$0xff] }
 0x2e7   : > { %2927 = vmatpush.msra.mxu3 %v1609_v43  ;;  %2888 = vmatmul.f32.vlgmr.msra.gmra.mxu1 %v5285_v23  ;;  %v810_v23 = vld [vmem:[%s4352_s12 + $0xb30] sm:$0xff]  ;;  %v2549_v43 = vpop.f32.mrf.mxu0 }
 0x2e8   : > { %2928 = vmatmul.f32.vlgmr.msra.gmra.mxu3 %v5349_v16  ;;  %2933 = vmatpush.msrb.mxu0 %v570_v44  ;;  %v946_v16 = vld [vmem:[%s4352_s12 + $0xf70] sm:$0xff] }
 0x2e9   : > { %2952 = vmatpush.msrb.mxu1 %v706_v8  ;;  %2973 = vmatpush.msrb.mxu2 %v826_v3  ;;  %v850_v53 = vld [vmem:[%s4352_s12 + $0xc70] sm:$0xff]  ;;  %v2570_v3 = vadd.f32 %v2569_v63, %v2549_v43 }
 0x2ea   : > { %2992 = vmatpush.msrb.mxu3 %v962_v20  ;;  %2934 = vmatpush.msrb.mxu0 %v562_v12  ;;  %v1090_v52 = vld [vmem:[%s4352_s12 + $0x13f0] sm:$0xff] }
 0x2eb   : > { %2953 = vmatpush.msrb.mxu1 %v698_v4  ;;  %2974 = vmatpush.msrb.mxu2 %v818_v57  ;;  %v1346_v42 = vld [vmem:[%s4352_s12 + $0x1bf0] sm:$0xff]  ;;  %v2589_v4 = vpop.f32.mrf.mxu2 }
 0x2ec   : > { %2993 = vmatpush.msrb.mxu3 %v954_v46  ;;  %2935 = vmatpush.msrb.mxu0 %v554_v47  ;;  %v586_v44 = vld [vmem:[%s4352_s12 + $0x430] sm:$0xff] }
 0x2ed   : > { %2954 = vmatpush.msrb.mxu1 %v690_v59  ;;  %2975 = vmatpush.msrb.mxu2 %v810_v23  ;;  %v842_v8 = vld [vmem:[%s4352_s12 + $0xc30] sm:$0xff] }
 0x2ee   : > { %2994 = vmatpush.msrb.mxu3 %v946_v16  ;;  %2936 = vmatpush.msrb.mxu0 %v546_v5  ;;  %v1082_v20 = vld [vmem:[%s4352_s12 + $0x13b0] sm:$0xff]  ;;  %v2590_v5 = vadd.f32 %v2589_v4, %v2570_v3 }
 0x2ef   : > { %2955 = vmatpush.msrb.mxu1 %v682_v50  ;;  %2976 = vmatpush.msrb.mxu2 %v802_v51  ;;  %v1218_v12 = vld [vmem:[%s4352_s12 + $0x17f0] sm:$0xff] }
 0x2f0   : > { %2995 = vmatpush.msrb.mxu3 %v938_v45  ;;  %2937 = vmatpush.msrb.mxu0 %v538_v19  ;;  %v1338_v57 = vld [vmem:[%s4352_s12 + $0x1bb0] sm:$0xff]  ;;  %v2609_v45 = vpop.f32.mrf.mxu3 }
 0x2f1   : > { %2956 = vmatpush.msrb.mxu1 %v674_v14  ;;  %2977 = vmatpush.msrb.mxu2 %v794_v54  ;;  %v1474_v46 = vld [vmem:[%s4352_s12 + $0x1ff0] sm:$0xff] }
 0x2f2   : > { %2996 = vmatpush.msrb.mxu3 %v930_v55  ;;  %2938 = vmatpush.msrb.mxu0 %v530_v26  ;;  %v1074_v47 = vld [vmem:[%s4352_s12 + $0x1370] sm:$0xff]  ;;  %v2610_v26 = vadd.f32 %v2609_v45, %v2590_v5 }
 0x2f3   : > { %2957 = vmatpush.msrb.mxu1 %v666_v56  ;;  %2978 = vmatpush.msrb.mxu2 %v786_v29  ;;  %v1210_v59 = vld [vmem:[%s4352_s12 + $0x17b0] sm:$0xff] }
 0x2f4   : > { %2997 = vmatpush.msrb.mxu3 %v922_v49  ;;  %2939 = vmatpush.msrb.mxu0 %v522_v60  ;;  %v1330_v23 = vld [vmem:[%s4352_s12 + $0x1b70] sm:$0xff]  ;;  %v2629_v49 = vpop.f32.mrf.mxu0 }
 0x2f5   : > { %2958 = vmatpush.msrb.mxu1 %v658_v61  ;;  %2979 = vmatpush.msrb.mxu2 %v778_v62  ;;  %v1466_v16 = vld [vmem:[%s4352_s12 + $0x1fb0] sm:$0xff] }
 0x2f6   : > { %2998 = vmatpush.msrb.mxu3 %v914_v1  ;;  %2940 = vmatpush.msrb.mxu0 %v514_v2  ;;  %v1066_v50 = vld [vmem:[%s4352_s12 + $0x1330] sm:$0xff] }
 0x2f7   : > { %2959 = vmatpush.msrb.mxu1 %v650_v7  ;;  %2980 = vmatpush.msrb.mxu2 %v770_v9  ;;  %v1202_v51 = vld [vmem:[%s4352_s12 + $0x1770] sm:$0xff]  ;;  %v2630_v9 = vadd.f32 %v2629_v49, %v2610_v26  ;;  %v5623_v49 = vld [vmem:[%s4370_s17 + $0x18] sm:$0xff] }
 0x2f8   : > { %2999 = vmatpush.msrb.mxu3 %v906_v10  ;;  %2941 = vmatpush.msrb.mxu0 %v506_v13  ;;  %v1322_v19 = vld [vmem:[%s4352_s12 + $0x1b30] sm:$0xff] }
 0x2f9   : > { %2960 = vmatpush.msrb.mxu1 %v642_v18  ;;  %2981 = vmatpush.msrb.mxu2 %v762_v22  ;;  %v1458_v14 = vld [vmem:[%s4352_s12 + $0x1f70] sm:$0xff]  ;;  %v2649_v18 = vpop.f32.mrf.mxu1 }
 0x2fa   : > { %3000 = vmatpush.msrb.mxu3 %v898_v24  ;;  %2942 = vmatpush.msrb.mxu0 %v498_v25  ;;  %v1058_v54 = vld [vmem:[%s4352_s12 + $0x12f0] sm:$0xff] }
 0x2fb   : > { %2961 = vmatpush.msrb.mxu1 %v634_v27  ;;  %2982 = vmatpush.msrb.mxu2 %v754_v28  ;;  %v1194_v55 = vld [vmem:[%s4352_s12 + $0x1730] sm:$0xff] }
 0x2fc   : > { %3001 = vmatpush.msrb.mxu3 %v890_v30  ;;  %2943 = vmatpush.msrb.mxu0 %v490_v31  ;;  %v1314_v56 = vld [vmem:[%s4352_s12 + $0x1af0] sm:$0xff]  ;;  %v2650_v31 = vadd.f32 %v2649_v18, %v2630_v9 }
 0x2fd   : > { %2962 = vmatpush.msrb.mxu1 %v626_v32  ;;  %2983 = vmatpush.msrb.mxu2 %v746_v0  ;;  %v1450_v29 = vld [vmem:[%s4352_s12 + $0x1f30] sm:$0xff] }
 0x2fe   : > { %3002 = vmatpush.msrb.mxu3 %v882_v33  ;;  %2944 = vmatpush.msrb.mxu0 %v482_v34  ;;  %v1050_v60 = vld [vmem:[%s4352_s12 + $0x12b0] sm:$0xff]  ;;  %v2669_v33 = vpop.f32.mrf.mxu2 }
 0x2ff   : > { %2963 = vmatpush.msrb.mxu1 %v618_v35  ;;  %2984 = vmatpush.msrb.mxu2 %v738_v36  ;;  %v1186_v61 = vld [vmem:[%s4352_s12 + $0x16f0] sm:$0xff] }
 0x300   : > { %3003 = vmatpush.msrb.mxu3 %v874_v37  ;;  %2945 = vmatpush.msrb.mxu0 %v474_v15  ;;  %v1306_v62 = vld [vmem:[%s4352_s12 + $0x1ab0] sm:$0xff] }
 0x301   : > { %2964 = vmatpush.msrb.mxu1 %v610_v11  ;;  %2985 = vmatpush.msrb.mxu2 %v730_v6  ;;  %v1442_v1 = vld [vmem:[%s4352_s12 + $0x1ef0] sm:$0xff]  ;;  %v2670_v6 = vadd.f32 %v2669_v33, %v2650_v31  ;;  %v547_v31 = vld [vmem:[%s4352_s12 + $0x2f8] sm:$0xff] }
 0x302   : > { %3004 = vmatpush.msrb.mxu3 %v866_v48  ;;  %2946 = vmatpush.msrb.mxu0 %v466_v38  ;;  %v1042_v2 = vld [vmem:[%s4352_s12 + $0x1270] sm:$0xff]  ;;  %v5655_v33 = vld [vmem:[%s4370_s17 + $0x38] sm:$0xff] }
 0x303   : > { %2965 = vmatpush.msrb.mxu1 %v602_v39  ;;  %2986 = vmatpush.msrb.mxu2 %v722_v40  ;;  %v1178_v7 = vld [vmem:[%s4352_s12 + $0x16b0] sm:$0xff]  ;;  %v2689_v39 = vpop.f32.mrf.mxu3 }
 0x304   : > { %3005 = vmatpush.msrb.mxu3 %v858_v21  ;;  %2947 = vmatpush.msrb.mxu0 %v458_v17  ;;  %v1298_v10 = vld [vmem:[%s4352_s12 + $0x1a70] sm:$0xff] }
 0x305   : > { %2966 = vmatpush.msrb.mxu1 %v594_v41  ;;  %2987 = vmatpush.msrb.mxu2 %v714_v58  ;;  %v1434_v13 = vld [vmem:[%s4352_s12 + $0x1eb0] sm:$0xff] }
 0x306   : > { %3006 = vmatpush.msrb.mxu3 %v850_v53  ;;  %3012 = vmatpush.msra.mxu0 %v1090_v52  ;;  %v1034_v22 = vld [vmem:[%s4352_s12 + $0x1230] sm:$0xff]  ;;  %v2690_v53 = vadd.f32 %v2689_v39, %v2670_v6 }
 0x307   : > { %3052 = vmatpush.msra.mxu2 %v1346_v42  ;;  %2967 = vmatpush.msrb.mxu1 %v586_v44  ;;  %v1170_v24 = vld [vmem:[%s4352_s12 + $0x1670] sm:$0xff] }
 0x308   : > { %3007 = vmatpush.msrb.mxu3 %v842_v8  ;;  %3013 = vmatpush.msra.mxu0 %v1082_v20  ;;  %v1290_v25 = vld [vmem:[%s4352_s12 + $0x1a30] sm:$0xff]  ;;  %v2709_v8 = vpop.f32.mrf.mxu0 }
 0x309   : > { %3032 = vmatpush.msra.mxu1 %v1218_v12  ;;  %3053 = vmatpush.msra.mxu2 %v1338_v57  ;;  %v1426_v27 = vld [vmem:[%s4352_s12 + $0x1e70] sm:$0xff]  ;;  %v2710_v12 = vadd.f32 %v2709_v8, %v2690_v53  ;;  %v651_v53 = vld [vmem:[%s4352_s12 + $0x638] sm:$0xff] }
 0x30a   : > { %3072 = vmatpush.msra.mxu3 %v1474_v46  ;;  %3014 = vmatpush.msra.mxu0 %v1074_v47  ;;  %v1026_v28 = vld [vmem:[%s4352_s12 + $0x11f0] sm:$0xff]  ;;  %v438_v46 = vld [vmem:[#allocation2 + $0x8] sm:$0xff]  ;;  %v2729_v47 = vpop.f32.mrf.mxu1 }
 0x30b   : > { %3033 = vmatpush.msra.mxu1 %v1210_v59  ;;  %3054 = vmatpush.msra.mxu2 %v1330_v23  ;;  %v1162_v30 = vld [vmem:[%s4352_s12 + $0x1630] sm:$0xff] }
 0x30c   : > { %3073 = vmatpush.msra.mxu3 %v1466_v16  ;;  %3015 = vmatpush.msra.mxu0 %v1066_v50  ;;  %v1282_v32 = vld [vmem:[%s4352_s12 + $0x19f0] sm:$0xff]  ;;  %v2730_v16 = vadd.f32 %v2729_v47, %v2710_v12  ;;  %v635_v12 = vld [vmem:[%s4352_s12 + $0x5b8] sm:$0xff] }
 0x30d   : > { %3034 = vmatpush.msra.mxu1 %v1202_v51  ;;  %3055 = vmatpush.msra.mxu2 %v1322_v19  ;;  %v1418_v0 = vld [vmem:[%s4352_s12 + $0x1e30] sm:$0xff]  ;;  %v627_v47 = vld [vmem:[%s4352_s12 + $0x578] sm:$0xff] }
 0x30e   : > { %3074 = vmatpush.msra.mxu3 %v1458_v14  ;;  %3016 = vmatpush.msra.mxu0 %v1058_v54  ;;  %v1018_v34 = vld [vmem:[%s4352_s12 + $0x11b0] sm:$0xff]  ;;  %v3336_v45 = vadd.f32 %v2730_v16, %v438_v46  ;;  %v491_v46 = vld [vmem:[%s4352_s12 + $0x138] sm:$0xff] }
 0x30f   : > { %3035 = vmatpush.msra.mxu1 %v1194_v55  ;;  %3056 = vmatpush.msra.mxu2 %v1314_v56  ;;  %v1154_v35 = vld [vmem:[%s4352_s12 + $0x15f0] sm:$0xff]  ;;  %v579_v55 = vld [vmem:[%s4352_s12 + $0x3f8] sm:$0xff]  ;;  %v5618_v56 = vld [vmem:[%s4370_s17] sm:$0xff] }
 0x310   : > { %3075 = vmatpush.msra.mxu3 %v1450_v29  ;;  %3017 = vmatpush.msra.mxu0 %v1050_v60  ;;  %v1274_v36 = vld [vmem:[%s4352_s12 + $0x19b0] sm:$0xff]  ;;  %3344 = vst [vmem:[#allocation2 + $0x8] sm:$0xff] %v3336_v45  ;;  %v483_v16 = vld [vmem:[%s4352_s12 + $0xf8] sm:$0xff] }
 0x311   : > { %3036 = vmatpush.msra.mxu1 %v1186_v61  ;;  %3057 = vmatpush.msra.mxu2 %v1306_v62  ;;  %v1410_v37 = vld [vmem:[%s4352_s12 + $0x1df0] sm:$0xff]  ;;  %v571_v62 = vld [vmem:[%s4352_s12 + $0x3b8] sm:$0xff] }
 0x312   : > { %3076 = vmatpush.msra.mxu3 %v1442_v1  ;;  %3018 = vmatpush.msra.mxu0 %v1042_v2  ;;  %v1010_v15 = vld [vmem:[%s4352_s12 + $0x1170] sm:$0xff]  ;;  %v707_v1 = vld [vmem:[%s4352_s12 + $0x7f8] sm:$0xff]  ;;  %v5631_v2 = vld [vmem:[%s4370_s17 + $0x8] sm:$0xff] }
 0x313   : > { %3037 = vmatpush.msra.mxu1 %v1178_v7  ;;  %3058 = vmatpush.msra.mxu2 %v1298_v10  ;;  %v1146_v11 = vld [vmem:[%s4352_s12 + $0x15b0] sm:$0xff]  ;;  %v563_v10 = vld [vmem:[%s4352_s12 + $0x378] sm:$0xff] }
 0x314   : > { %3077 = vmatpush.msra.mxu3 %v1434_v13  ;;  %3019 = vmatpush.msra.mxu0 %v1034_v22  ;;  %v1266_v48 = vld [vmem:[%s4352_s12 + $0x1970] sm:$0xff]  ;;  %v699_v13 = vld [vmem:[%s4352_s12 + $0x7b8] sm:$0xff] }
 0x315   : > { %3038 = vmatpush.msra.mxu1 %v1170_v24  ;;  %3059 = vmatpush.msra.mxu2 %v1290_v25  ;;  %v1402_v38 = vld [vmem:[%s4352_s12 + $0x1db0] sm:$0xff]  ;;  %v555_v24 = vld [vmem:[%s4352_s12 + $0x338] sm:$0xff] }
 0x316   : > { %3078 = vmatpush.msra.mxu3 %v1426_v27  ;;  %3020 = vmatpush.msra.mxu0 %v1026_v28  ;;  %v1002_v40 = vld [vmem:[%s4352_s12 + $0x1130] sm:$0xff]  ;;  %v691_v25 = vld [vmem:[%s4352_s12 + $0x778] sm:$0xff] }
 0x317   : > { %3039 = vmatpush.msra.mxu1 %v1162_v30  ;;  %3060 = vmatpush.msra.mxu2 %v1282_v32  ;;  %v1138_v21 = vld [vmem:[%s4352_s12 + $0x1570] sm:$0xff]  ;;  %v5650_v32 = vld [vmem:[%s4370_s17 + $0x20] sm:$0xff]  ;;  %v475_v45 = vld [vmem:[%s4352_s12 + $0xb8] sm:$0xff] }
 0x318   : > { %3079 = vmatpush.msra.mxu3 %v1418_v0  ;;  %3021 = vmatpush.msra.mxu0 %v1018_v34  ;;  %v1258_v17 = vld [vmem:[%s4352_s12 + $0x1930] sm:$0xff]  ;;  %v683_v0 = vld [vmem:[%s4352_s12 + $0x738] sm:$0xff] }
 0x319   : > { %3040 = vmatpush.msra.mxu1 %v1154_v35  ;;  %3061 = vmatpush.msra.mxu2 %v1274_v36  ;;  %v1394_v41 = vld [vmem:[%s4352_s12 + $0x1d70] sm:$0xff]  ;;  %v539_v36 = vld [vmem:[%s4352_s12 + $0x2b8] sm:$0xff] }
 0x31a   : > { %3080 = vmatpush.msra.mxu3 %v1410_v37  ;;  %3022 = vmatpush.msra.mxu0 %v1010_v15  ;;  %v994_v63 = vld [vmem:[%s4352_s12 + $0x10f0] sm:$0xff]  ;;  %v675_v37 = vld [vmem:[%s4352_s12 + $0x6f8] sm:$0xff]  ;;  %v5663_v15 = vld [vmem:[%s4370_s17 + $0x28] sm:$0xff] }
 0x31b   : > { %3041 = vmatpush.msra.mxu1 %v1146_v11  ;;  %3062 = vmatpush.msra.mxu2 %v1266_v48  ;;  %v1130_v58 = vld [vmem:[%s4352_s12 + $0x1530] sm:$0xff]  ;;  %v531_v48 = vld [vmem:[%s4352_s12 + $0x278] sm:$0xff] }
 0x31c   : > { %3081 = vmatpush.msra.mxu3 %v1402_v38  ;;  %3023 = vmatpush.msra.mxu0 %v1002_v40  ;;  %v1250_v52 = vld [vmem:[%s4352_s12 + $0x18f0] sm:$0xff]  ;;  %v667_v38 = vld [vmem:[%s4352_s12 + $0x6b8] sm:$0xff] }
 0x31d   : > { %3042 = vmatpush.msra.mxu1 %v1138_v21  ;;  %v1386_v42 = vld [vmem:[%s4352_s12 + $0x1d30] sm:$0xff]  ;;  %3063 = vmatpush.msra.mxu2 %v1258_v17  ;;  %v523_v21 = vld [vmem:[%s4352_s12 + $0x238] sm:$0xff] }
 0x31e   : > { %3082 = vmatpush.msra.mxu3 %v1394_v41  ;;  %v986_v43 = vld [vmem:[%s4352_s12 + $0x10b0] sm:$0xff]  ;;  %3024 = vmatpush.msra.mxu0 %v994_v63  ;;  %v659_v17 = vld [vmem:[%s4352_s12 + $0x678] sm:$0xff] }
 0x31f   : > { %v1122_v44 = vld [vmem:[%s4352_s12 + $0x14f0] sm:$0xff]  ;;  %3043 = vmatpush.msra.mxu1 %v1130_v58  ;;  %3064 = vmatpush.msra.mxu2 %v1250_v52  ;;  %v515_v58 = vld [vmem:[%s4352_s12 + $0x1f8] sm:$0xff] }
 0x320   : > { %v1242_v3 = vld [vmem:[%s4352_s12 + $0x18b0] sm:$0xff]  ;;  %3083 = vmatpush.msra.mxu3 %v1386_v42  ;;  %3025 = vmatpush.msra.mxu0 %v986_v43  ;;  %v507_v43 = vld [vmem:[%s4352_s12 + $0x1b8] sm:$0xff] }
 0x321   : > { %v1378_v20 = vld [vmem:[%s4352_s12 + $0x1cf0] sm:$0xff]  ;;  %3044 = vmatpush.msra.mxu1 %v1122_v44  ;;  %3065 = vmatpush.msra.mxu2 %v1242_v3  ;;  %v643_v44 = vld [vmem:[%s4352_s12 + $0x5f8] sm:$0xff] }
 0x322   : > { %v978_v4 = vld [vmem:[%s4352_s12 + $0x1070] sm:$0xff]  ;;  %3084 = vmatpush.msra.mxu3 %v1378_v20  ;;  %2948 = vmatmul.f32.vlgmr.msrb.gmra.mxu0 %v5618_v56  ;;  %v499_v20 = vld [vmem:[%s4352_s12 + $0x178] sm:$0xff] }
 0x323   : > { %v1114_v57 = vld [vmem:[%s4352_s12 + $0x14b0] sm:$0xff]  ;;  %3026 = vmatpush.msra.mxu0 %v978_v4  ;;  %3008 = vmatmul.f32.vlgmr.msrb.gmra.mxu3 %v5623_v49 }
 0x324   : > { %v1234_v59 = vld [vmem:[%s4352_s12 + $0x1870] sm:$0xff]  ;;  %3045 = vmatpush.msra.mxu1 %v1114_v57 }
 0x325   : > { %v1370_v23 = vld [vmem:[%s4352_s12 + $0x1cb0] sm:$0xff]  ;;  %3066 = vmatpush.msra.mxu2 %v1234_v59  ;;  %2968 = vmatmul.f32.vlgmr.msrb.gmra.mxu1 %v5631_v2 }
 0x326   : > { %v970_v5 = vld [vmem:[%s4352_s12 + $0x1030] sm:$0xff]  ;;  %3085 = vmatpush.msra.mxu3 %v1370_v23 }
 0x327   : > { %v1106_v50 = vld [vmem:[%s4352_s12 + $0x1470] sm:$0xff]  ;;  %3027 = vmatpush.msra.mxu0 %v970_v5  ;;  %v619_v5 = vld [vmem:[%s4352_s12 + $0x538] sm:$0xff] }
 0x328   : > { %v1226_v51 = vld [vmem:[%s4352_s12 + $0x1830] sm:$0xff]  ;;  %3046 = vmatpush.msra.mxu1 %v1106_v50 }
 0x329   : > { %v1362_v19 = vld [vmem:[%s4352_s12 + $0x1c70] sm:$0xff]  ;;  %3067 = vmatpush.msra.mxu2 %v1226_v51 }
 0x32a   : > { %v5611_v14 = vld [vmem:[%s4370_s17 + $0x10] sm:$0xff]  ;;  %3086 = vmatpush.msra.mxu3 %v1362_v19  ;;  %3028 = vmatmul.f32.vlgmr.msra.gmra.mxu0 %v5650_v32  ;;  %v611_v19 = vld [vmem:[%s4352_s12 + $0x4f8] sm:$0xff] }
 0x32b   : > { %2988 = vmatmul.f32.vlgmr.msrb.gmra.mxu2 %v5611_v14  ;;  %v1602_v54 = vld [vmem:[%s4352_s12 + $0x23f0] sm:$0xff] }
 0x32c   : > { %v1098_v26 = vld [vmem:[%s4352_s12 + $0x1430] sm:$0xff]  ;;  %3092 = vmatpush.msrb.mxu0 %v1602_v54  ;;  %3132 = vmatpush.msrb.mxu2 %v579_v55 }
 0x32d   : > { %v1354_v29 = vld [vmem:[%s4352_s12 + $0x1c30] sm:$0xff]  ;;  %3047 = vmatpush.msra.mxu1 %v1098_v26  ;;  %v467_v26 = vld [vmem:[%s4352_s12 + $0x78] sm:$0xff] }
 0x32e   : > { %v1594_v60 = vld [vmem:[%s4352_s12 + $0x23b0] sm:$0xff]  ;;  %3087 = vmatpush.msra.mxu3 %v1354_v29  ;;  %3133 = vmatpush.msrb.mxu2 %v571_v62  ;;  %v603_v29 = vld [vmem:[%s4352_s12 + $0x4b8] sm:$0xff] }
 0x32f   : > { %v1730_v61 = vld [vmem:[%s4352_s12 + $0x27f0] sm:$0xff]  ;;  %3093 = vmatpush.msrb.mxu0 %v1594_v60  ;;  %3088 = vmatmul.f32.vlgmr.msra.gmra.mxu3 %v5655_v33  ;;  %v459_v62 = vld [vmem:[%s4352_s12 + $0x38] sm:$0xff] }
 0x330   : > { %v1586_v7 = vld [vmem:[%s4352_s12 + $0x2370] sm:$0xff]  ;;  %3112 = vmatpush.msrb.mxu1 %v1730_v61  ;;  %3152 = vmatpush.msrb.mxu3 %v707_v1  ;;  %v595_v1 = vld [vmem:[%s4352_s12 + $0x478] sm:$0xff] }
 0x331   : > { %v1722_v9 = vld [vmem:[%s4352_s12 + $0x27b0] sm:$0xff]  ;;  %3094 = vmatpush.msrb.mxu0 %v1586_v7  ;;  %3134 = vmatpush.msrb.mxu2 %v563_v10  ;;  %v1091_v7 = vld [vmem:[%s4352_s12 + $0x13f8] sm:$0xff] }
 0x332   : > { %v1578_v18 = vld [vmem:[%s4352_s12 + $0x2330] sm:$0xff]  ;;  %3113 = vmatpush.msrb.mxu1 %v1722_v9  ;;  %3153 = vmatpush.msrb.mxu3 %v699_v13  ;;  %v835_v9 = vld [vmem:[%s4352_s12 + $0xbf8] sm:$0xff] }
 0x333   : > { %v1714_v22 = vld [vmem:[%s4352_s12 + $0x2770] sm:$0xff]  ;;  %3095 = vmatpush.msrb.mxu0 %v1578_v18  ;;  %3135 = vmatpush.msrb.mxu2 %v555_v24  ;;  %v587_v13 = vld [vmem:[%s4352_s12 + $0x438] sm:$0xff]  ;;  %v5711_v18 = vld [vmem:[%s4370_s17 + $0x40] sm:$0xff] }
 0x334   : > { %v5643_v27 = vld [vmem:[%s4370_s17 + $0x30] sm:$0xff]  ;;  %3114 = vmatpush.msrb.mxu1 %v1714_v22  ;;  %3154 = vmatpush.msrb.mxu3 %v691_v25  ;;  %v827_v22 = vld [vmem:[%s4352_s12 + $0xbb8] sm:$0xff] }
 0x335   : > { %3068 = vmatmul.f32.vlgmr.msra.gmra.mxu2 %v5643_v27  ;;  %v1570_v28 = vld [vmem:[%s4352_s12 + $0x22f0] sm:$0xff]  ;;  %3048 = vmatmul.f32.vlgmr.msra.gmra.mxu1 %v5663_v15  ;;  %v963_v24 = vld [vmem:[%s4352_s12 + $0xff8] sm:$0xff] }
 0x336   : > { %v1706_v30 = vld [vmem:[%s4352_s12 + $0x2730] sm:$0xff]  ;;  %3096 = vmatpush.msrb.mxu0 %v1570_v28  ;;  %3136 = vmatpush.msrb.mxu2 %v547_v31  ;;  %v1083_v25 = vld [vmem:[%s4352_s12 + $0x13b8] sm:$0xff] }
 0x337   : > { %v1562_v34 = vld [vmem:[%s4352_s12 + $0x22b0] sm:$0xff]  ;;  %3115 = vmatpush.msrb.mxu1 %v1706_v30  ;;  %3155 = vmatpush.msrb.mxu3 %v683_v0  ;;  %v1219_v28 = vld [vmem:[%s4352_s12 + $0x17f8] sm:$0xff]  ;;  %v5719_v30 = vld [vmem:[%s4370_s17 + $0x48] sm:$0xff] }
 0x338   : > { %v1698_v35 = vld [vmem:[%s4352_s12 + $0x26f0] sm:$0xff]  ;;  %3097 = vmatpush.msrb.mxu0 %v1562_v34  ;;  %3137 = vmatpush.msrb.mxu2 %v539_v36  ;;  %v819_v31 = vld [vmem:[%s4352_s12 + $0xb78] sm:$0xff]  ;;  %v2769_v36 = vpop.f32.mrf.mxu3 }
 0x339   : > { %v1554_v11 = vld [vmem:[%s4352_s12 + $0x2270] sm:$0xff]  ;;  %3116 = vmatpush.msrb.mxu1 %v1698_v35  ;;  %3156 = vmatpush.msrb.mxu3 %v675_v37  ;;  %v955_v0 = vld [vmem:[%s4352_s12 + $0xfb8] sm:$0xff] }
 0x33a   : > { %v1690_v6 = vld [vmem:[%s4352_s12 + $0x26b0] sm:$0xff]  ;;  %3098 = vmatpush.msrb.mxu0 %v1554_v11  ;;  %3138 = vmatpush.msrb.mxu2 %v531_v48  ;;  %v1075_v34 = vld [vmem:[%s4352_s12 + $0x1378] sm:$0xff] }
 0x33b   : > { %v1546_v39 = vld [vmem:[%s4352_s12 + $0x2230] sm:$0xff]  ;;  %3117 = vmatpush.msrb.mxu1 %v1690_v6  ;;  %3157 = vmatpush.msrb.mxu3 %v667_v38  ;;  %v1211_v35 = vld [vmem:[%s4352_s12 + $0x17b8] sm:$0xff]  ;;  %v2749_v6 = vpop.f32.mrf.mxu2 }
 0x33c   : > { %v1682_v40 = vld [vmem:[%s4352_s12 + $0x2670] sm:$0xff]  ;;  %3099 = vmatpush.msrb.mxu0 %v1546_v39  ;;  %3139 = vmatpush.msrb.mxu2 %v523_v21  ;;  %v811_v37 = vld [vmem:[%s4352_s12 + $0xb38] sm:$0xff]  ;;  %v2770_v39 = vadd.f32 %v2769_v36, %v2749_v6 }
 0x33d   : > { %v1538_v41 = vld [vmem:[%s4352_s12 + $0x21f0] sm:$0xff]  ;;  %3118 = vmatpush.msrb.mxu1 %v1682_v40  ;;  %3158 = vmatpush.msrb.mxu3 %v659_v17  ;;  %v947_v11 = vld [vmem:[%s4352_s12 + $0xf78] sm:$0xff] }
 0x33e   : > { %v1674_v63 = vld [vmem:[%s4352_s12 + $0x2630] sm:$0xff]  ;;  %3100 = vmatpush.msrb.mxu0 %v1538_v41  ;;  %3140 = vmatpush.msrb.mxu2 %v515_v58  ;;  %v1067_v48 = vld [vmem:[%s4352_s12 + $0x1338] sm:$0xff] }
 0x33f   : > { %v1530_v52 = vld [vmem:[%s4352_s12 + $0x21b0] sm:$0xff]  ;;  %3119 = vmatpush.msrb.mxu1 %v1674_v63  ;;  %3159 = vmatpush.msrb.mxu3 %v651_v53  ;;  %v1203_v38 = vld [vmem:[%s4352_s12 + $0x1778] sm:$0xff]  ;;  %v2789_v63 = vpop.f32.mrf.mxu0 }
 0x340   : > { %v1666_v42 = vld [vmem:[%s4352_s12 + $0x25f0] sm:$0xff]  ;;  %3101 = vmatpush.msrb.mxu0 %v1530_v52  ;;  %3141 = vmatpush.msrb.mxu2 %v507_v43  ;;  %v803_v40 = vld [vmem:[%s4352_s12 + $0xaf8] sm:$0xff]  ;;  %v2790_v43 = vadd.f32 %v2789_v63, %v2770_v39 }
 0x341   : > { %v1522_v8 = vld [vmem:[%s4352_s12 + $0x2170] sm:$0xff]  ;;  %3120 = vmatpush.msrb.mxu1 %v1666_v42  ;;  %3160 = vmatpush.msrb.mxu3 %v643_v44  ;;  %v939_v21 = vld [vmem:[%s4352_s12 + $0xf38] sm:$0xff] }
 0x342   : > { %v1658_v3 = vld [vmem:[%s4352_s12 + $0x25b0] sm:$0xff]  ;;  %3102 = vmatpush.msrb.mxu0 %v1522_v8  ;;  %3142 = vmatpush.msrb.mxu2 %v499_v20  ;;  %v1059_v17 = vld [vmem:[%s4352_s12 + $0x12f8] sm:$0xff] }
 0x343   : > { %v1514_v4 = vld [vmem:[%s4352_s12 + $0x2130] sm:$0xff]  ;;  %3121 = vmatpush.msrb.mxu1 %v1658_v3  ;;  %3161 = vmatpush.msrb.mxu3 %v635_v12  ;;  %v1195_v41 = vld [vmem:[%s4352_s12 + $0x1738] sm:$0xff]  ;;  %v2809_v3 = vpop.f32.mrf.mxu1 }
 0x344   : > { %v1650_v57 = vld [vmem:[%s4352_s12 + $0x2570] sm:$0xff]  ;;  %3103 = vmatpush.msrb.mxu0 %v1514_v4  ;;  %3143 = vmatpush.msrb.mxu2 %v491_v46  ;;  %v795_v58 = vld [vmem:[%s4352_s12 + $0xab8] sm:$0xff] }
 0x345   : > { %v1506_v59 = vld [vmem:[%s4352_s12 + $0x20f0] sm:$0xff]  ;;  %3122 = vmatpush.msrb.mxu1 %v1650_v57  ;;  %3162 = vmatpush.msrb.mxu3 %v627_v47  ;;  %v931_v53 = vld [vmem:[%s4352_s12 + $0xef8] sm:$0xff] }
 0x346   : > { %v1642_v23 = vld [vmem:[%s4352_s12 + $0x2530] sm:$0xff]  ;;  %3104 = vmatpush.msrb.mxu0 %v1506_v59  ;;  %3144 = vmatpush.msrb.mxu2 %v483_v16  ;;  %v1051_v52 = vld [vmem:[%s4352_s12 + $0x12b8] sm:$0xff]  ;;  %v2810_v59 = vadd.f32 %v2809_v3, %v2790_v43  ;;  %v439_v3 = vld [vmem:[#allocation2 + $0x20] sm:$0xff] }
 0x347   : > { %v1498_v50 = vld [vmem:[%s4352_s12 + $0x20b0] sm:$0xff]  ;;  %3123 = vmatpush.msrb.mxu1 %v1642_v23  ;;  %3163 = vmatpush.msrb.mxu3 %v619_v5  ;;  %v1187_v42 = vld [vmem:[%s4352_s12 + $0x16f8] sm:$0xff]  ;;  %v2829_v5 = vpop.f32.mrf.mxu2 }
 0x348   : > { %v1634_v51 = vld [vmem:[%s4352_s12 + $0x24f0] sm:$0xff]  ;;  %3105 = vmatpush.msrb.mxu0 %v1498_v50  ;;  %3145 = vmatpush.msrb.mxu2 %v475_v45  ;;  %v787_v44 = vld [vmem:[%s4352_s12 + $0xa78] sm:$0xff] }
 0x349   : > { %v1490_v54 = vld [vmem:[%s4352_s12 + $0x2070] sm:$0xff]  ;;  %3124 = vmatpush.msrb.mxu1 %v1634_v51  ;;  %3164 = vmatpush.msrb.mxu3 %v611_v19  ;;  %v923_v8 = vld [vmem:[%s4352_s12 + $0xeb8] sm:$0xff] }
 0x34a   : > { %v1626_v55 = vld [vmem:[%s4352_s12 + $0x24b0] sm:$0xff]  ;;  %3106 = vmatpush.msrb.mxu0 %v1490_v54  ;;  %3146 = vmatpush.msrb.mxu2 %v467_v26  ;;  %v1043_v20 = vld [vmem:[%s4352_s12 + $0x1278] sm:$0xff]  ;;  %v2830_v26 = vadd.f32 %v2829_v5, %v2810_v59 }
 0x34b   : > { %v1482_v60 = vld [vmem:[%s4352_s12 + $0x2030] sm:$0xff]  ;;  %3125 = vmatpush.msrb.mxu1 %v1626_v55  ;;  %3165 = vmatpush.msrb.mxu3 %v603_v29  ;;  %v1179_v12 = vld [vmem:[%s4352_s12 + $0x16b8] sm:$0xff] }
 0x34c   : > { %v1618_v61 = vld [vmem:[%s4352_s12 + $0x2470] sm:$0xff]  ;;  %3107 = vmatpush.msrb.mxu0 %v1482_v60  ;;  %3147 = vmatpush.msrb.mxu2 %v459_v62  ;;  %v779_v4 = vld [vmem:[%s4352_s12 + $0xa38] sm:$0xff] }
 0x34d   : > { %3126 = vmatpush.msrb.mxu1 %v1618_v61  ;;  %v1610_v10 = vld [vmem:[%s4352_s12 + $0x2430] sm:$0xff]  ;;  %3166 = vmatpush.msrb.mxu3 %v595_v1  ;;  %v915_v57 = vld [vmem:[%s4352_s12 + $0xe78] sm:$0xff]  ;;  %v2849_v61 = vpop.f32.mrf.mxu3 }
 0x34e   : > { %3108 = vmatmul.f32.vlgmr.msrb.gmra.mxu0 %v5711_v18  ;;  %3212 = vmatpush.msra.mxu2 %v1091_v7  ;;  %v1035_v46 = vld [vmem:[%s4352_s12 + $0x1238] sm:$0xff] }
 0x34f   : > { %3172 = vmatpush.msra.mxu0 %v835_v9  ;;  %3127 = vmatpush.msrb.mxu1 %v1610_v10  ;;  %v1171_v47 = vld [vmem:[%s4352_s12 + $0x1678] sm:$0xff] }
 0x350   : > { %3167 = vmatpush.msrb.mxu3 %v587_v13  ;;  %3128 = vmatmul.f32.vlgmr.msrb.gmra.mxu1 %v5719_v30  ;;  %v771_v23 = vld [vmem:[%s4352_s12 + $0x9f8] sm:$0xff] }
 0x351   : > { %3173 = vmatpush.msra.mxu0 %v827_v22  ;;  %3192 = vmatpush.msra.mxu1 %v963_v24  ;;  %v907_v16 = vld [vmem:[%s4352_s12 + $0xe38] sm:$0xff]  ;;  %v2850_v22 = vadd.f32 %v2849_v61, %v2830_v26 }
 0x352   : > { %3213 = vmatpush.msra.mxu2 %v1083_v25  ;;  %3232 = vmatpush.msra.mxu3 %v1219_v28  ;;  %v1027_v50 = vld [vmem:[%s4352_s12 + $0x11f8] sm:$0xff] }
 0x353   : > { %3174 = vmatpush.msra.mxu0 %v819_v31  ;;  %3193 = vmatpush.msra.mxu1 %v955_v0  ;;  %v1163_v51 = vld [vmem:[%s4352_s12 + $0x1638] sm:$0xff] }
 0x354   : > { %3214 = vmatpush.msra.mxu2 %v1075_v34  ;;  %3233 = vmatpush.msra.mxu3 %v1211_v35  ;;  %v763_v45 = vld [vmem:[%s4352_s12 + $0x9b8] sm:$0xff] }
 0x355   : > { %3175 = vmatpush.msra.mxu0 %v811_v37  ;;  %3194 = vmatpush.msra.mxu1 %v947_v11  ;;  %v899_v19 = vld [vmem:[%s4352_s12 + $0xdf8] sm:$0xff] }
 0x356   : > { %3215 = vmatpush.msra.mxu2 %v1067_v48  ;;  %3234 = vmatpush.msra.mxu3 %v1203_v38  ;;  %v1019_v54 = vld [vmem:[%s4352_s12 + $0x11b8] sm:$0xff] }
 0x357   : > { %3176 = vmatpush.msra.mxu0 %v803_v40  ;;  %3195 = vmatpush.msra.mxu1 %v939_v21  ;;  %v1155_v55 = vld [vmem:[%s4352_s12 + $0x15f8] sm:$0xff] }
 0x358   : > { %3216 = vmatpush.msra.mxu2 %v1059_v17  ;;  %3235 = vmatpush.msra.mxu3 %v1195_v41  ;;  %v755_v29 = vld [vmem:[%s4352_s12 + $0x978] sm:$0xff] }
 0x359   : > { %3177 = vmatpush.msra.mxu0 %v795_v58  ;;  %3196 = vmatpush.msra.mxu1 %v931_v53  ;;  %v891_v60 = vld [vmem:[%s4352_s12 + $0xdb8] sm:$0xff] }
 0x35a   : > { %3217 = vmatpush.msra.mxu2 %v1051_v52  ;;  %3236 = vmatpush.msra.mxu3 %v1187_v42  ;;  %v1011_v62 = vld [vmem:[%s4352_s12 + $0x1178] sm:$0xff] }
 0x35b   : > { %3178 = vmatpush.msra.mxu0 %v787_v44  ;;  %3197 = vmatpush.msra.mxu1 %v923_v8  ;;  %v1147_v1 = vld [vmem:[%s4352_s12 + $0x15b8] sm:$0xff] }
 0x35c   : > { %3218 = vmatpush.msra.mxu2 %v1043_v20  ;;  %3237 = vmatpush.msra.mxu3 %v1179_v12  ;;  %v747_v7 = vld [vmem:[%s4352_s12 + $0x938] sm:$0xff] }
 0x35d   : > { %3179 = vmatpush.msra.mxu0 %v779_v4  ;;  %3198 = vmatpush.msra.mxu1 %v915_v57  ;;  %v883_v9 = vld [vmem:[%s4352_s12 + $0xd78] sm:$0xff] }
 0x35e   : > { %3219 = vmatpush.msra.mxu2 %v1035_v46  ;;  %3238 = vmatpush.msra.mxu3 %v1171_v47  ;;  %v1003_v10 = vld [vmem:[%s4352_s12 + $0x1138] sm:$0xff] }
 0x35f   : > { %3180 = vmatpush.msra.mxu0 %v771_v23  ;;  %3199 = vmatpush.msra.mxu1 %v907_v16  ;;  %v1139_v13 = vld [vmem:[%s4352_s12 + $0x1578] sm:$0xff] }
 0x360   : > { %3220 = vmatpush.msra.mxu2 %v1027_v50  ;;  %3239 = vmatpush.msra.mxu3 %v1163_v51  ;;  %v739_v24 = vld [vmem:[%s4352_s12 + $0x8f8] sm:$0xff]  ;;  %v2869_v0 = vpop.f32.mrf.mxu0 }
 0x361   : > { %3181 = vmatpush.msra.mxu0 %v763_v45  ;;  %3200 = vmatpush.msra.mxu1 %v899_v19  ;;  %v875_v25 = vld [vmem:[%s4352_s12 + $0xd38] sm:$0xff]  ;;  %v2870_v36 = vadd.f32 %v2869_v0, %v2850_v22 }
 0x362   : > { %3221 = vmatpush.msra.mxu2 %v1019_v54  ;;  %3240 = vmatpush.msra.mxu3 %v1155_v55  ;;  %v995_v28 = vld [vmem:[%s4352_s12 + $0x10f8] sm:$0xff] }
 0x363   : > { %3182 = vmatpush.msra.mxu0 %v755_v29  ;;  %3201 = vmatpush.msra.mxu1 %v891_v60  ;;  %v1131_v31 = vld [vmem:[%s4352_s12 + $0x1538] sm:$0xff] }
 0x364   : > { %3222 = vmatpush.msra.mxu2 %v1011_v62  ;;  %3241 = vmatpush.msra.mxu3 %v1147_v1  ;;  %v731_v34 = vld [vmem:[%s4352_s12 + $0x8b8] sm:$0xff]  ;;  %v2889_v38 = vpop.f32.mrf.mxu1 }
 0x365   : > { %3183 = vmatpush.msra.mxu0 %v747_v7  ;;  %3202 = vmatpush.msra.mxu1 %v883_v9  ;;  %v867_v35 = vld [vmem:[%s4352_s12 + $0xcf8] sm:$0xff]  ;;  %v2890_v17 = vadd.f32 %v2889_v38, %v2870_v36 }
 0x366   : > { %3223 = vmatpush.msra.mxu2 %v1003_v10  ;;  %3242 = vmatpush.msra.mxu3 %v1139_v13  ;;  %v987_v37 = vld [vmem:[%s4352_s12 + $0x10b8] sm:$0xff] }
 0x367   : > { %3184 = vmatpush.msra.mxu0 %v739_v24  ;;  %3203 = vmatpush.msra.mxu1 %v875_v25  ;;  %v1123_v11 = vld [vmem:[%s4352_s12 + $0x14f8] sm:$0xff] }
 0x368   : > { %3224 = vmatpush.msra.mxu2 %v995_v28  ;;  %3243 = vmatpush.msra.mxu3 %v1131_v31  ;;  %v723_v6 = vld [vmem:[%s4352_s12 + $0x878] sm:$0xff]  ;;  %v2909_v58 = vpop.f32.mrf.mxu2 }
 0x369   : > { %v859_v48 = vld [vmem:[%s4352_s12 + $0xcb8] sm:$0xff]  ;;  %3185 = vmatpush.msra.mxu0 %v731_v34  ;;  %3204 = vmatpush.msra.mxu1 %v867_v35  ;;  %v2910_v42 = vadd.f32 %v2909_v58, %v2890_v17 }
 0x36a   : > { %v979_v39 = vld [vmem:[%s4352_s12 + $0x1078] sm:$0xff]  ;;  %3225 = vmatpush.msra.mxu2 %v987_v37  ;;  %3244 = vmatpush.msra.mxu3 %v1123_v11 }
 0x36b   : > { %v1115_v40 = vld [vmem:[%s4352_s12 + $0x14b8] sm:$0xff]  ;;  %3186 = vmatpush.msra.mxu0 %v723_v6  ;;  %3205 = vmatpush.msra.mxu1 %v859_v48  ;;  %v2929_v20 = vpop.f32.mrf.mxu3 }
 0x36c   : > { %v715_v21 = vld [vmem:[%s4352_s12 + $0x838] sm:$0xff]  ;;  %3226 = vmatpush.msra.mxu2 %v979_v39  ;;  %3245 = vmatpush.msra.mxu3 %v1115_v40  ;;  %v2930_v57 = vadd.f32 %v2929_v20, %v2910_v42 }
 0x36d   : > { %v851_v41 = vld [vmem:[%s4352_s12 + $0xc78] sm:$0xff]  ;;  %3148 = vmatmul.f32.vlgmr.msrb.gmra.mxu2 %v5618_v56  ;;  %3187 = vmatpush.msra.mxu0 %v715_v21 }
 0x36e   : > { %v971_v63 = vld [vmem:[%s4352_s12 + $0x1038] sm:$0xff]  ;;  %3206 = vmatpush.msra.mxu1 %v851_v41  ;;  %3168 = vmatmul.f32.vlgmr.msrb.gmra.mxu3 %v5631_v2  ;;  %v3337_v23 = vadd.f32 %v2930_v57, %v439_v3 }
 0x36f   : > { %v1107_v53 = vld [vmem:[%s4352_s12 + $0x1478] sm:$0xff]  ;;  %3227 = vmatpush.msra.mxu2 %v971_v63  ;;  %3188 = vmatmul.f32.vlgmr.msra.gmra.mxu0 %v5611_v14 }
 0x370   : > { %v1347_v52 = vld [vmem:[%s4352_s12 + $0x1bf8] sm:$0xff]  ;;  %3246 = vmatpush.msra.mxu3 %v1107_v53  ;;  %3345 = vst [vmem:[#allocation2 + $0x20] sm:$0xff] %v3337_v23 }
 0x371   : > { %v1603_v43 = vld [vmem:[%s4352_s12 + $0x23f8] sm:$0xff]  ;;  %3252 = vmatpush.msrb.mxu0 %v1347_v52 }
 0x372   : > { %v843_v44 = vld [vmem:[%s4352_s12 + $0xc38] sm:$0xff]  ;;  %3292 = vmatpush.msrb.mxu2 %v1603_v43 }
 0x373   : > { %v1099_v8 = vld [vmem:[%s4352_s12 + $0x1438] sm:$0xff]  ;;  %3207 = vmatpush.msra.mxu1 %v843_v44 }
 0x374   : > { %v1339_v12 = vld [vmem:[%s4352_s12 + $0x1bb8] sm:$0xff]  ;;  %3247 = vmatpush.msra.mxu3 %v1099_v8  ;;  %3208 = vmatmul.f32.vlgmr.msra.gmra.mxu1 %v5623_v49 }
 0x375   : > { %v1475_v4 = vld [vmem:[%s4352_s12 + $0x1ff8] sm:$0xff]  ;;  %3253 = vmatpush.msrb.mxu0 %v1339_v12  ;;  %3228 = vmatmul.f32.vlgmr.msra.gmra.mxu2 %v5650_v32 }
 0x376   : > { %v1595_v56 = vld [vmem:[%s4352_s12 + $0x23b8] sm:$0xff]  ;;  %3272 = vmatpush.msrb.mxu1 %v1475_v4  ;;  %3248 = vmatmul.f32.vlgmr.msra.gmra.mxu3 %v5663_v15 }
 0x377   : > { %v1731_v46 = vld [vmem:[%s4352_s12 + $0x27f8] sm:$0xff]  ;;  %3293 = vmatpush.msrb.mxu2 %v1595_v56 }
 0x378   : > { %v1331_v47 = vld [vmem:[%s4352_s12 + $0x1b78] sm:$0xff]  ;;  %3312 = vmatpush.msrb.mxu3 %v1731_v46 }
 0x379   : > { %v1467_v59 = vld [vmem:[%s4352_s12 + $0x1fb8] sm:$0xff]  ;;  %3254 = vmatpush.msrb.mxu0 %v1331_v47 }
 0x37a   : > { %v1587_v16 = vld [vmem:[%s4352_s12 + $0x2378] sm:$0xff]  ;;  %3273 = vmatpush.msrb.mxu1 %v1467_v59 }
 0x37b   : > { %v1723_v5 = vld [vmem:[%s4352_s12 + $0x27b8] sm:$0xff]  ;;  %3294 = vmatpush.msrb.mxu2 %v1587_v16 }
 0x37c   : > { %v1323_v2 = vld [vmem:[%s4352_s12 + $0x1b38] sm:$0xff]  ;;  %3313 = vmatpush.msrb.mxu3 %v1723_v5 }
 0x37d   : > { %v1459_v50 = vld [vmem:[%s4352_s12 + $0x1f78] sm:$0xff]  ;;  %3255 = vmatpush.msrb.mxu0 %v1323_v2 }
 0x37e   : > { %v1579_v51 = vld [vmem:[%s4352_s12 + $0x2338] sm:$0xff]  ;;  %3274 = vmatpush.msrb.mxu1 %v1459_v50 }
 0x37f   : > { %v1715_v45 = vld [vmem:[%s4352_s12 + $0x2778] sm:$0xff]  ;;  %3295 = vmatpush.msrb.mxu2 %v1579_v51 }
 0x380   : > { %v1315_v19 = vld [vmem:[%s4352_s12 + $0x1af8] sm:$0xff]  ;;  %3314 = vmatpush.msrb.mxu3 %v1715_v45 }
 0x381   : > { %v1451_v54 = vld [vmem:[%s4352_s12 + $0x1f38] sm:$0xff]  ;;  %3256 = vmatpush.msrb.mxu0 %v1315_v19 }
 0x382   : > { %v1571_v55 = vld [vmem:[%s4352_s12 + $0x22f8] sm:$0xff]  ;;  %3275 = vmatpush.msrb.mxu1 %v1451_v54 }
 0x383   : > { %v1707_v26 = vld [vmem:[%s4352_s12 + $0x2738] sm:$0xff]  ;;  %3296 = vmatpush.msrb.mxu2 %v1571_v55 }
 0x384   : > { %v1307_v32 = vld [vmem:[%s4352_s12 + $0x1ab8] sm:$0xff]  ;;  %3315 = vmatpush.msrb.mxu3 %v1707_v26 }
 0x385   : > { %v1443_v29 = vld [vmem:[%s4352_s12 + $0x1ef8] sm:$0xff]  ;;  %3257 = vmatpush.msrb.mxu0 %v1307_v32 }
 0x386   : > { %v1563_v60 = vld [vmem:[%s4352_s12 + $0x22b8] sm:$0xff]  ;;  %3276 = vmatpush.msrb.mxu1 %v1443_v29 }
 0x387   : > { %v1699_v61 = vld [vmem:[%s4352_s12 + $0x26f8] sm:$0xff]  ;;  %3297 = vmatpush.msrb.mxu2 %v1563_v60 }
 0x388   : > { %v1299_v14 = vld [vmem:[%s4352_s12 + $0x1a78] sm:$0xff]  ;;  %3316 = vmatpush.msrb.mxu3 %v1699_v61 }
 0x389   : > { %v1435_v62 = vld [vmem:[%s4352_s12 + $0x1eb8] sm:$0xff]  ;;  %3258 = vmatpush.msrb.mxu0 %v1299_v14 }
 0x38a   : > { %v1555_v15 = vld [vmem:[%s4352_s12 + $0x2278] sm:$0xff]  ;;  %3277 = vmatpush.msrb.mxu1 %v1435_v62 }
 0x38b   : > { %v1691_v1 = vld [vmem:[%s4352_s12 + $0x26b8] sm:$0xff]  ;;  %3298 = vmatpush.msrb.mxu2 %v1555_v15 }
 0x38c   : > { %v1291_v7 = vld [vmem:[%s4352_s12 + $0x1a38] sm:$0xff]  ;;  %3317 = vmatpush.msrb.mxu3 %v1691_v1 }
 0x38d   : > { %v1427_v9 = vld [vmem:[%s4352_s12 + $0x1e78] sm:$0xff]  ;;  %3259 = vmatpush.msrb.mxu0 %v1291_v7 }
 0x38e   : > { %v1547_v10 = vld [vmem:[%s4352_s12 + $0x2238] sm:$0xff]  ;;  %3278 = vmatpush.msrb.mxu1 %v1427_v9 }
 0x38f   : > { %v1683_v49 = vld [vmem:[%s4352_s12 + $0x2678] sm:$0xff]  ;;  %3299 = vmatpush.msrb.mxu2 %v1547_v10 }
 0x390   : > { %v1283_v13 = vld [vmem:[%s4352_s12 + $0x19f8] sm:$0xff]  ;;  %3318 = vmatpush.msrb.mxu3 %v1683_v49 }
 0x391   : > { %v1419_v22 = vld [vmem:[%s4352_s12 + $0x1e38] sm:$0xff]  ;;  %3260 = vmatpush.msrb.mxu0 %v1283_v13 }
 0x392   : > { %v1539_v24 = vld [vmem:[%s4352_s12 + $0x21f8] sm:$0xff]  ;;  %3279 = vmatpush.msrb.mxu1 %v1419_v22 }
 0x393   : > { %v1675_v25 = vld [vmem:[%s4352_s12 + $0x2638] sm:$0xff]  ;;  %3300 = vmatpush.msrb.mxu2 %v1539_v24 }
 0x394   : > { %v1275_v28 = vld [vmem:[%s4352_s12 + $0x19b8] sm:$0xff]  ;;  %3319 = vmatpush.msrb.mxu3 %v1675_v25 }
 0x395   : > { %v1411_v31 = vld [vmem:[%s4352_s12 + $0x1df8] sm:$0xff]  ;;  %3261 = vmatpush.msrb.mxu0 %v1275_v28 }
 0x396   : > { %v1531_v0 = vld [vmem:[%s4352_s12 + $0x21b8] sm:$0xff]  ;;  %3280 = vmatpush.msrb.mxu1 %v1411_v31 }
 0x397   : > { %v1667_v34 = vld [vmem:[%s4352_s12 + $0x25f8] sm:$0xff]  ;;  %3301 = vmatpush.msrb.mxu2 %v1531_v0 }
 0x398   : > { %v1267_v35 = vld [vmem:[%s4352_s12 + $0x1978] sm:$0xff]  ;;  %3320 = vmatpush.msrb.mxu3 %v1667_v34 }
 0x399   : > { %v1403_v36 = vld [vmem:[%s4352_s12 + $0x1db8] sm:$0xff]  ;;  %3262 = vmatpush.msrb.mxu0 %v1267_v35 }
 0x39a   : > { %v1523_v37 = vld [vmem:[%s4352_s12 + $0x2178] sm:$0xff]  ;;  %3281 = vmatpush.msrb.mxu1 %v1403_v36 }
 0x39b   : > { %v1659_v11 = vld [vmem:[%s4352_s12 + $0x25b8] sm:$0xff]  ;;  %3302 = vmatpush.msrb.mxu2 %v1523_v37 }
 0x39c   : > { %v1259_v6 = vld [vmem:[%s4352_s12 + $0x1938] sm:$0xff]  ;;  %3321 = vmatpush.msrb.mxu3 %v1659_v11 }
 0x39d   : > { %v1395_v48 = vld [vmem:[%s4352_s12 + $0x1d78] sm:$0xff]  ;;  %3263 = vmatpush.msrb.mxu0 %v1259_v6 }
 0x39e   : > { %v1515_v38 = vld [vmem:[%s4352_s12 + $0x2138] sm:$0xff]  ;;  %3282 = vmatpush.msrb.mxu1 %v1395_v48 }
 0x39f   : > { %v1651_v39 = vld [vmem:[%s4352_s12 + $0x2578] sm:$0xff]  ;;  %3303 = vmatpush.msrb.mxu2 %v1515_v38  ;;  %v2949_v47 = vpop.f32.mrf.mxu0 }
 0x3a0   : > { %v1251_v40 = vld [vmem:[%s4352_s12 + $0x18f8] sm:$0xff]  ;;  %3322 = vmatpush.msrb.mxu3 %v1651_v39 }
 0x3a1   : > { %v1387_v21 = vld [vmem:[%s4352_s12 + $0x1d38] sm:$0xff]  ;;  %3264 = vmatpush.msrb.mxu0 %v1251_v40 }
 0x3a2   : > { %v1507_v17 = vld [vmem:[%s4352_s12 + $0x20f8] sm:$0xff]  ;;  %3283 = vmatpush.msrb.mxu1 %v1387_v21  ;;  %v2969_v46 = vpop.f32.mrf.mxu1 }
 0x3a3   : > { %v1643_v41 = vld [vmem:[%s4352_s12 + $0x2538] sm:$0xff]  ;;  %3304 = vmatpush.msrb.mxu2 %v1507_v17  ;;  %v2970_v59 = vadd.f32 %v2969_v46, %v2949_v47 }
 0x3a4   : > { %v1243_v63 = vld [vmem:[%s4352_s12 + $0x18b8] sm:$0xff]  ;;  %3323 = vmatpush.msrb.mxu3 %v1643_v41 }
 0x3a5   : > { %v1379_v58 = vld [vmem:[%s4352_s12 + $0x1cf8] sm:$0xff]  ;;  %3265 = vmatpush.msrb.mxu0 %v1243_v63 }
 0x3a6   : > { %v1499_v53 = vld [vmem:[%s4352_s12 + $0x20b8] sm:$0xff]  ;;  %3284 = vmatpush.msrb.mxu1 %v1379_v58  ;;  %v3009_v5 = vpop.f32.mrf.mxu3 }
 0x3a7   : > { %v1635_v52 = vld [vmem:[%s4352_s12 + $0x24f8] sm:$0xff]  ;;  %3305 = vmatpush.msrb.mxu2 %v1499_v53  ;;  %v3029_v50 = vpop.f32.mrf.mxu0 }
 0x3a8   : > { %v1235_v42 = vld [vmem:[%s4352_s12 + $0x1878] sm:$0xff]  ;;  %3324 = vmatpush.msrb.mxu3 %v1635_v52 }
 0x3a9   : > { %v1371_v43 = vld [vmem:[%s4352_s12 + $0x1cb8] sm:$0xff]  ;;  %3266 = vmatpush.msrb.mxu0 %v1235_v42 }
 0x3aa   : > { %v1491_v44 = vld [vmem:[%s4352_s12 + $0x2078] sm:$0xff]  ;;  %3285 = vmatpush.msrb.mxu1 %v1371_v43 }
 0x3ab   : > { %v1627_v8 = vld [vmem:[%s4352_s12 + $0x24b8] sm:$0xff]  ;;  %3306 = vmatpush.msrb.mxu2 %v1491_v44 }
 0x3ac   : > { %v1227_v3 = vld [vmem:[%s4352_s12 + $0x1838] sm:$0xff]  ;;  %3325 = vmatpush.msrb.mxu3 %v1627_v8 }
 0x3ad   : > { %v1363_v20 = vld [vmem:[%s4352_s12 + $0x1c78] sm:$0xff]  ;;  %3267 = vmatpush.msrb.mxu0 %v1227_v3 }
 0x3ae   : > { %v1483_v12 = vld [vmem:[%s4352_s12 + $0x2038] sm:$0xff]  ;;  %3286 = vmatpush.msrb.mxu1 %v1363_v20  ;;  %3268 = vmatmul.f32.vlgmr.msrb.gmra.mxu0 %v5643_v27  ;;  %v2989_v23 = vpop.f32.mrf.mxu2 }
 0x3af   : > { %v1619_v4 = vld [vmem:[%s4352_s12 + $0x2478] sm:$0xff]  ;;  %3307 = vmatpush.msrb.mxu2 %v1483_v12  ;;  %v2990_v16 = vadd.f32 %v2989_v23, %v2970_v59 }
 0x3b0   : > { %v1355_v57 = vld [vmem:[%s4352_s12 + $0x1c38] sm:$0xff]  ;;  %3326 = vmatpush.msrb.mxu3 %v1619_v4  ;;  %3308 = vmatmul.f32.vlgmr.msrb.gmra.mxu2 %v5711_v18 }
 0x3b1   : > { %v1611_v56 = vld [vmem:[%s4352_s12 + $0x2438] sm:$0xff]  ;;  %3287 = vmatpush.msrb.mxu1 %v1355_v57  ;;  %v3010_v2 = vadd.f32 %v3009_v5, %v2990_v16 }
 0x3b2   : > { %3327 = vmatpush.msrb.mxu3 %v1611_v56  ;;  %3288 = vmatmul.f32.vlgmr.msrb.gmra.mxu1 %v5655_v33  ;;  %v3049_v45 = vpop.f32.mrf.mxu1  ;;  %v3089_v18 = vpop.f32.mrf.mxu3  ;;  %v440_v33 = vld [vmem:[#allocation2 + $0x28] sm:$0xff]  ;;  %v441_v35 = vld [vmem:[#allocation2 + $0x38] sm:$0xff] }
 0x3b3   : > { %3328 = vmatmul.f32.vlgmr.msrb.gmra.mxu3 %v5719_v30  ;;  %v3030_v51 = vadd.f32 %v3029_v50, %v3010_v2 }
 0x3b5   : > { %v3050_v19 = vadd.f32 %v3049_v45, %v3030_v51 }
 0x3b8   : > { %v3069_v27 = vpop.f32.mrf.mxu2 }
 0x3b9   : > { %v3070_v54 = vadd.f32 %v3069_v27, %v3050_v19 }
 0x3bb   : > { %v3090_v55 = vadd.f32 %v3089_v18, %v3070_v54 }
 0x3cb   : > { %v3109_v26 = vpop.f32.mrf.mxu0 }
 0x3cc   : > { %v3110_v32 = vadd.f32 %v3109_v26, %v3090_v55 }
 0x3cd   : > { %v3129_v29 = vpop.f32.mrf.mxu1 }
 0x3ce   : > { %v3130_v30 = vadd.f32 %v3129_v29, %v3110_v32 }
 0x3d0   : > { %v3338_v60 = vadd.f32 %v3130_v30, %v440_v33 }
 0x3d2   : > { %3346 = vst [vmem:[#allocation2 + $0x28] sm:$0xff] %v3338_v60 }
 0x3ec   : > { %v3189_v15 = vpop.f32.mrf.mxu0 }
 0x3f0   : > { %v3149_v14 = vpop.f32.mrf.mxu2 }
 0x3f1   : > { %v3169_v61 = vpop.f32.mrf.mxu3  ;;  %v3209_v7 = vpop.f32.mrf.mxu1 }
 0x3f2   : > { %v3170_v62 = vadd.f32 %v3169_v61, %v3149_v14 }
 0x3f4   : > { %v3190_v1 = vadd.f32 %v3189_v15, %v3170_v62 }
 0x3f6   : > { %v3210_v9 = vadd.f32 %v3209_v7, %v3190_v1 }
 0x3f8   : > { %v3229_v10 = vpop.f32.mrf.mxu2 }
 0x3f9   : > { %v3230_v49 = vadd.f32 %v3229_v10, %v3210_v9  ;;  %v3249_v13 = vpop.f32.mrf.mxu3 }
 0x3fb   : > { %v3250_v22 = vadd.f32 %v3249_v13, %v3230_v49 }
 0x42b   : > { %v3269_v24 = vpop.f32.mrf.mxu0 }
 0x42c   : > { %v3270_v25 = vadd.f32 %v3269_v24, %v3250_v22 }
 0x42f   : > { %v3289_v28 = vpop.f32.mrf.mxu1 }
 0x430   : > { %v3290_v31 = vadd.f32 %v3289_v28, %v3270_v25 }
 0x433   : > { %v3309_v0 = vpop.f32.mrf.mxu2 }
 0x434   : > { %v3310_v34 = vadd.f32 %v3309_v0, %v3290_v31 }
 0x436   : > { %v3329_v36 = vpop.f32.mrf.mxu3 }
 0x437   : > { %v3330_v37 = vadd.f32 %v3329_v36, %v3310_v34  ;;  %3351 = sbr.rel (%p3874_p1) target bundleno = 1547 (0x60b), region = 84 }
 0x439   : > { %v3339_v11 = vadd.f32 %v3330_v37, %v441_v35 }
 0x43b   : > { %3347 = vst [vmem:[#allocation2 + $0x38] sm:$0xff] %v3339_v11 }
 0x43c   : > { %v3441_v6 = vld [vmem:[%s6313_s3 + $0x178] sm:$0xff]  ;;  %v3440_v38 = vld [vmem:[%s6313_s3 + $0x170] sm:$0xff]  ;;  %v3439_v17 = vld [vmem:[%s6313_s3 + $0x168] sm:$0xff]  ;;  %vm3708_vm0 = vcmask 1043456   ;;  %vm3743_vm1 = vcmask 1041408   ;;  %vm3704_vm2 = vcmask 818176  }
 0x43d   : > { %v3409_v48 = vld [vmem:[%s6313_s3 + $0x78] sm:$0xff]  ;;  %3566 = vmatpush.msra.mxu2 %v3441_v6  ;;  %v3408_v40 = vld [vmem:[%s6313_s3 + $0x70] sm:$0xff]  ;;  %v3407_v63 = vld [vmem:[%s6313_s3 + $0x68] sm:$0xff]  ;;  %vm3739_vm3 = vcmask 80896   ;;  %vm3767_vm4 = vcmask 15360  }
 0x43e   : > { %3526 = vmatpush.msra.mxu0 %v3409_v48  ;;  %v3457_v39 = vld [vmem:[%s6313_s3 + $0x1f8] sm:$0xff]  ;;  %v3456_v41 = vld [vmem:[%s6313_s3 + $0x1f0] sm:$0xff]  ;;  %v3455_v53 = vld [vmem:[%s6313_s3 + $0x1e8] sm:$0xff] }
 0x43f   : > { %v3425_v21 = vld [vmem:[%s6313_s3 + $0xf8] sm:$0xff]  ;;  %3586 = vmatpush.msra.mxu3 %v3457_v39  ;;  %3567 = vmatpush.msra.mxu2 %v3440_v38  ;;  %v3424_v58 = vld [vmem:[%s6313_s3 + $0xf0] sm:$0xff]  ;;  %v3438_v52 = vld [vmem:[%s6313_s3 + $0x160] sm:$0xff] }
 0x440   : > { %3546 = vmatpush.msra.mxu1 %v3425_v21  ;;  %3527 = vmatpush.msra.mxu0 %v3408_v40  ;;  %v3406_v42 = vld [vmem:[%s6313_s3 + $0x60] sm:$0xff]  ;;  %v3423_v43 = vld [vmem:[%s6313_s3 + $0xe8] sm:$0xff]  ;;  %v3437_v3 = vld [vmem:[%s6313_s3 + $0x158] sm:$0xff] }
 0x441   : > { %3587 = vmatpush.msra.mxu3 %v3456_v41  ;;  %3568 = vmatpush.msra.mxu2 %v3439_v17  ;;  %v3454_v44 = vld [vmem:[%s6313_s3 + $0x1e0] sm:$0xff]  ;;  %v3405_v20 = vld [vmem:[%s6313_s3 + $0x58] sm:$0xff]  ;;  %v3436_v57 = vld [vmem:[%s6313_s3 + $0x150] sm:$0xff] }
 0x442   : > { %3547 = vmatpush.msra.mxu1 %v3424_v58  ;;  %3528 = vmatpush.msra.mxu0 %v3407_v63  ;;  %v3422_v8 = vld [vmem:[%s6313_s3 + $0xe0] sm:$0xff]  ;;  %v3453_v12 = vld [vmem:[%s6313_s3 + $0x1d8] sm:$0xff]  ;;  %v3404_v56 = vld [vmem:[%s6313_s3 + $0x50] sm:$0xff] }
 0x443   : > { %3588 = vmatpush.msra.mxu3 %v3455_v53  ;;  %3569 = vmatpush.msra.mxu2 %v3438_v52  ;;  %v3421_v4 = vld [vmem:[%s6313_s3 + $0xd8] sm:$0xff]  ;;  %v3452_v46 = vld [vmem:[%s6313_s3 + $0x1d0] sm:$0xff]  ;;  %v3435_v59 = vld [vmem:[%s6313_s3 + $0x148] sm:$0xff] }
 0x444   : > { %3548 = vmatpush.msra.mxu1 %v3423_v43  ;;  %3529 = vmatpush.msra.mxu0 %v3406_v42  ;;  %v3420_v47 = vld [vmem:[%s6313_s3 + $0xd0] sm:$0xff]  ;;  %v3403_v23 = vld [vmem:[%s6313_s3 + $0x48] sm:$0xff]  ;;  %v3434_v2 = vld [vmem:[%s6313_s3 + $0x140] sm:$0xff] }
 0x445   : > { %3589 = vmatpush.msra.mxu3 %v3454_v44  ;;  %3570 = vmatpush.msra.mxu2 %v3437_v3  ;;  %v3451_v16 = vld [vmem:[%s6313_s3 + $0x1c8] sm:$0xff]  ;;  %v3402_v50 = vld [vmem:[%s6313_s3 + $0x40] sm:$0xff]  ;;  %v3433_v19 = vld [vmem:[%s6313_s3 + $0x138] sm:$0xff] }
 0x446   : > { %3549 = vmatpush.msra.mxu1 %v3422_v8  ;;  %3530 = vmatpush.msra.mxu0 %v3405_v20  ;;  %v3419_v5 = vld [vmem:[%s6313_s3 + $0xc8] sm:$0xff]  ;;  %v3450_v51 = vld [vmem:[%s6313_s3 + $0x1c0] sm:$0xff]  ;;  %v3401_v27 = vld [vmem:[%s6313_s3 + $0x38] sm:$0xff] }
 0x447   : > { %3590 = vmatpush.msra.mxu3 %v3453_v12  ;;  %3571 = vmatpush.msra.mxu2 %v3436_v57  ;;  %v3418_v45 = vld [vmem:[%s6313_s3 + $0xc0] sm:$0xff]  ;;  %v3449_v54 = vld [vmem:[%s6313_s3 + $0x1b8] sm:$0xff]  ;;  %v3432_v55 = vld [vmem:[%s6313_s3 + $0x130] sm:$0xff] }
 0x448   : > { %3550 = vmatpush.msra.mxu1 %v3421_v4  ;;  %3531 = vmatpush.msra.mxu0 %v3404_v56  ;;  %v3417_v18 = vld [vmem:[%s6313_s3 + $0xb8] sm:$0xff]  ;;  %v3400_v26 = vld [vmem:[%s6313_s3 + $0x30] sm:$0xff]  ;;  %v3431_v29 = vld [vmem:[%s6313_s3 + $0x128] sm:$0xff] }
 0x449   : > { %3591 = vmatpush.msra.mxu3 %v3452_v46  ;;  %3572 = vmatpush.msra.mxu2 %v3435_v59  ;;  %v3448_v32 = vld [vmem:[%s6313_s3 + $0x1b0] sm:$0xff]  ;;  %v3399_v30 = vld [vmem:[%s6313_s3 + $0x28] sm:$0xff]  ;;  %v3430_v14 = vld [vmem:[%s6313_s3 + $0x120] sm:$0xff] }
 0x44a   : > { %3551 = vmatpush.msra.mxu1 %v3420_v47  ;;  %3532 = vmatpush.msra.mxu0 %v3403_v23  ;;  %v3416_v33 = vld [vmem:[%s6313_s3 + $0xb0] sm:$0xff]  ;;  %v3447_v60 = vld [vmem:[%s6313_s3 + $0x1a8] sm:$0xff]  ;;  %v3398_v62 = vld [vmem:[%s6313_s3 + $0x20] sm:$0xff] }
 0x44b   : > { %3592 = vmatpush.msra.mxu3 %v3451_v16  ;;  %3573 = vmatpush.msra.mxu2 %v3434_v2  ;;  %v3415_v61 = vld [vmem:[%s6313_s3 + $0xa8] sm:$0xff]  ;;  %v3446_v15 = vld [vmem:[%s6313_s3 + $0x1a0] sm:$0xff]  ;;  %v3429_v7 = vld [vmem:[%s6313_s3 + $0x118] sm:$0xff] }
 0x44c   : > { %3552 = vmatpush.msra.mxu1 %v3419_v5  ;;  %3533 = vmatpush.msra.mxu0 %v3402_v50  ;;  %v3414_v1 = vld [vmem:[%s6313_s3 + $0xa0] sm:$0xff]  ;;  %v3397_v9 = vld [vmem:[%s6313_s3 + $0x18] sm:$0xff]  ;;  %v3428_v13 = vld [vmem:[%s6313_s3 + $0x110] sm:$0xff] }
 0x44d   : > { %3593 = vmatpush.msra.mxu3 %v3450_v51  ;;  %3574 = vmatpush.msra.mxu2 %v3433_v19  ;;  %v3445_v10 = vld [vmem:[%s6313_s3 + $0x198] sm:$0xff]  ;;  %v3396_v22 = vld [vmem:[%s6313_s3 + $0x10] sm:$0xff]  ;;  %v3427_v28 = vld [vmem:[%s6313_s3 + $0x108] sm:$0xff] }
 0x44e   : > { %3553 = vmatpush.msra.mxu1 %v3418_v45  ;;  %3534 = vmatpush.msra.mxu0 %v3401_v27  ;;  %v3413_v49 = vld [vmem:[%s6313_s3 + $0x98] sm:$0xff]  ;;  %v3444_v24 = vld [vmem:[%s6313_s3 + $0x190] sm:$0xff]  ;;  %v3395_v31 = vld [vmem:[%s6313_s3 + $0x8] sm:$0xff] }
 0x44f   : > { %3594 = vmatpush.msra.mxu3 %v3449_v54  ;;  %3575 = vmatpush.msra.mxu2 %v3432_v55  ;;  %v3412_v25 = vld [vmem:[%s6313_s3 + $0x90] sm:$0xff]  ;;  %v3443_v0 = vld [vmem:[%s6313_s3 + $0x188] sm:$0xff]  ;;  %v3426_v35 = vld [vmem:[%s6313_s3 + $0x100] sm:$0xff] }
 0x450   : > { %3554 = vmatpush.msra.mxu1 %v3417_v18  ;;  %3535 = vmatpush.msra.mxu0 %v3400_v26  ;;  %v3411_v34 = vld [vmem:[%s6313_s3 + $0x88] sm:$0xff]  ;;  %v3394_v36 = vld [vmem:[%s6313_s3] sm:$0xff]  ;;  %v3505_v37 = vld [vmem:[%s6313_s3 + $0x378] sm:$0xff] }
 0x451   : > { %3595 = vmatpush.msra.mxu3 %v3448_v32  ;;  %3576 = vmatpush.msra.mxu2 %v3431_v29  ;;  %v3442_v11 = vld [vmem:[%s6313_s3 + $0x180] sm:$0xff]  ;;  %v3473_v6 = vld [vmem:[%s6313_s3 + $0x278] sm:$0xff]  ;;  %v3504_v38 = vld [vmem:[%s6313_s3 + $0x370] sm:$0xff] }
 0x452   : > { %3555 = vmatpush.msra.mxu1 %v3416_v33  ;;  %3536 = vmatpush.msra.mxu0 %v3399_v30  ;;  %v3521_v48 = vld [vmem:[%s6313_s3 + $0x3f8] sm:$0xff]  ;;  %v3410_v39 = vld [vmem:[%s6313_s3 + $0x80] sm:$0xff]  ;;  %v3472_v40 = vld [vmem:[%s6313_s3 + $0x270] sm:$0xff] }
 0x453   : > { %3596 = vmatpush.msra.mxu3 %v3447_v60  ;;  %3577 = vmatpush.msra.mxu2 %v3430_v14  ;;  %v3489_v21 = vld [vmem:[%s6313_s3 + $0x2f8] sm:$0xff]  ;;  %v3503_v17 = vld [vmem:[%s6313_s3 + $0x368] sm:$0xff]  ;;  %v3520_v41 = vld [vmem:[%s6313_s3 + $0x3f0] sm:$0xff] }
 0x454   : > { %3556 = vmatpush.msra.mxu1 %v3415_v61  ;;  %3537 = vmatpush.msra.mxu0 %v3398_v62  ;;  %v3471_v63 = vld [vmem:[%s6313_s3 + $0x268] sm:$0xff]  ;;  %v3488_v58 = vld [vmem:[%s6313_s3 + $0x2f0] sm:$0xff]  ;;  %v3502_v53 = vld [vmem:[%s6313_s3 + $0x360] sm:$0xff] }
 0x455   : > { %3597 = vmatpush.msra.mxu3 %v3446_v15  ;;  %3578 = vmatpush.msra.mxu2 %v3429_v7  ;;  %v3519_v52 = vld [vmem:[%s6313_s3 + $0x3e8] sm:$0xff]  ;;  %v3470_v42 = vld [vmem:[%s6313_s3 + $0x260] sm:$0xff]  ;;  %v3501_v44 = vld [vmem:[%s6313_s3 + $0x358] sm:$0xff] }
 0x456   : > { %3557 = vmatpush.msra.mxu1 %v3414_v1  ;;  %3538 = vmatpush.msra.mxu0 %v3397_v9  ;;  %v3487_v43 = vld [vmem:[%s6313_s3 + $0x2e8] sm:$0xff]  ;;  %v3518_v8 = vld [vmem:[%s6313_s3 + $0x3e0] sm:$0xff]  ;;  %v3469_v3 = vld [vmem:[%s6313_s3 + $0x258] sm:$0xff] }
 0x457   : > { %3598 = vmatpush.msra.mxu3 %v3445_v10  ;;  %3579 = vmatpush.msra.mxu2 %v3428_v13  ;;  %v3486_v20 = vld [vmem:[%s6313_s3 + $0x2e0] sm:$0xff]  ;;  %v3500_v12 = vld [vmem:[%s6313_s3 + $0x350] sm:$0xff]  ;;  %v3517_v4 = vld [vmem:[%s6313_s3 + $0x3d8] sm:$0xff] }
 0x458   : > { %3558 = vmatpush.msra.mxu1 %v3413_v49  ;;  %3539 = vmatpush.msra.mxu0 %v3396_v22  ;;  %v3468_v57 = vld [vmem:[%s6313_s3 + $0x250] sm:$0xff]  ;;  %v3485_v56 = vld [vmem:[%s6313_s3 + $0x2d8] sm:$0xff]  ;;  %v6113_v46 = vld [vmem:[#allocation5] sm:$0xff] }
 0x459   : > { %3599 = vmatpush.msra.mxu3 %v3444_v24  ;;  %3580 = vmatpush.msra.mxu2 %v3427_v28  ;;  %v3499_v47 = vld [vmem:[%s6313_s3 + $0x348] sm:$0xff]  ;;  %v3516_v59 = vld [vmem:[%s6313_s3 + $0x3d0] sm:$0xff]  ;;  %v3498_v5 = vld [vmem:[%s6313_s3 + $0x340] sm:$0xff]  ;;  %v3364_v51 = vperm.slane %v6113_v46, 2  ;;  %v3362_v26 = vperm.slane %v6113_v46, 0  ;;  %v3365_v29 = vperm.slane %v6113_v46, 3 }
 0x45a   : > { %3559 = vmatpush.msra.mxu1 %v3412_v25  ;;  %3540 = vmatpush.msra.mxu0 %v3395_v31  ;;  %v3467_v23 = vld [vmem:[%s6313_s3 + $0x248] sm:$0xff]  ;;  %v3484_v16 = vld [vmem:[%s6313_s3 + $0x2d0] sm:$0xff]  ;;  %v3466_v50 = vld [vmem:[%s6313_s3 + $0x240] sm:$0xff]  ;;  %v3363_v15 = vperm.slane %v6113_v46, 1 }
 0x45b   : > { %3600 = vmatpush.msra.mxu3 %v3443_v0  ;;  %3581 = vmatpush.msra.mxu2 %v3426_v35  ;;  %v3515_v2 = vld [vmem:[%s6313_s3 + $0x3c8] sm:$0xff]  ;;  %v3497_v19 = vld [vmem:[%s6313_s3 + $0x338] sm:$0xff]  ;;  %v3514_v54 = vld [vmem:[%s6313_s3 + $0x3c0] sm:$0xff] }
 0x45c   : > { %3560 = vmatpush.msra.mxu1 %v3411_v34  ;;  %3541 = vmatpush.msra.mxu0 %v3394_v36  ;;  %v3483_v45 = vld [vmem:[%s6313_s3 + $0x2c8] sm:$0xff]  ;;  %v3354_v27 = vld [vmem:[#allocation2 + $0x18] sm:$0xff]  ;;  %v3482_v55 = vld [vmem:[%s6313_s3 + $0x2c0] sm:$0xff] }
 0x45d   : > { %3646 = vmatpush.msrb.mxu2 %v3505_v37  ;;  %3601 = vmatpush.msra.mxu3 %v3442_v11  ;;  %v3465_v18 = vld [vmem:[%s6313_s3 + $0x238] sm:$0xff]  ;;  %v3496_v32 = vld [vmem:[%s6313_s3 + $0x330] sm:$0xff]  ;;  %v3380_v60 = vadd.f32 %v3364_v51, %v3354_v27  ;;  %v3495_v1 = vld [vmem:[%s6313_s3 + $0x328] sm:$0xff]  ;;  %v3368_v37 = vperm.slane %v6113_v46, 6 }
 0x45e   : > { %3606 = vmatpush.msrb.mxu0 %v3473_v6  ;;  %3561 = vmatpush.msra.mxu1 %v3410_v39  ;;  %v3352_v33 = vld [vmem:[#allocation2 + $0x30] sm:$0xff]  ;;  %v3513_v30 = vld [vmem:[%s6313_s3 + $0x3b8] sm:$0xff]  ;;  %v3353_v10 = vld [vmem:[#allocation2] sm:$0xff] }
 0x45f   : > { %3666 = vmatpush.msrb.mxu3 %v3521_v48  ;;  %3647 = vmatpush.msrb.mxu2 %v3504_v38  ;;  %v3355_v61 = vld [vmem:[#allocation2 + $0x10] sm:$0xff]  ;;  %v3481_v62 = vld [vmem:[%s6313_s3 + $0x2b8] sm:$0xff]  ;;  %v3378_v9 = vadd.f32 %v3362_v26, %v3352_v33  ;;  %v3463_v49 = vld [vmem:[%s6313_s3 + $0x228] sm:$0xff]  ;;  %v3388_v28 = vmax.f32 %v3380_v60, 0.0  ;;  %v3379_v0 = vadd.f32 %v3363_v15, %v3353_v10 }
 0x460   : > { %3607 = vmatpush.msrb.mxu0 %v3472_v40  ;;  %3626 = vmatpush.msrb.mxu1 %v3489_v21  ;;  %v3464_v14 = vld [vmem:[%s6313_s3 + $0x230] sm:$0xff]  ;;  %v3381_v22 = vadd.f32 %v3365_v29, %v3355_v61  ;;  %v3494_v24 = vld [vmem:[%s6313_s3 + $0x320] sm:$0xff]  ;;  %v3511_v25 = vld [vmem:[%s6313_s3 + $0x3a8] sm:$0xff]  ;;  %v3366_v40 = vperm.slane %v6113_v46, 4  ;;  %v3369_v21 = vperm.slane %v6113_v46, 7 }
 0x461   : > { %3648 = vmatpush.msrb.mxu2 %v3503_v17  ;;  %3667 = vmatpush.msrb.mxu3 %v3520_v41  ;;  %v3512_v7 = vld [vmem:[%s6313_s3 + $0x3b0] sm:$0xff]  ;;  %v3462_v31 = vld [vmem:[%s6313_s3 + $0x220] sm:$0xff]  ;;  %v3479_v34 = vld [vmem:[%s6313_s3 + $0x2a8] sm:$0xff]  ;;  %v3386_v36 = vmax.f32 %v3378_v9, 0.0  ;;  %v3387_v41 = vmax.f32 %v3379_v0, 0.0 }
 0x462   : > { %3608 = vmatpush.msrb.mxu0 %v3471_v63  ;;  %3627 = vmatpush.msrb.mxu1 %v3488_v58  ;;  %v3480_v13 = vld [vmem:[%s6313_s3 + $0x2b0] sm:$0xff]  ;;  %v3493_v35 = vld [vmem:[%s6313_s3 + $0x318] sm:$0xff]  ;;  %v3510_v11 = vld [vmem:[%s6313_s3 + $0x3a0] sm:$0xff]  ;;  %v3389_v6 = vmax.f32 %v3381_v22, 0.0 }
 0x463   : > { %3649 = vmatpush.msrb.mxu2 %v3502_v53  ;;  %3668 = vmatpush.msrb.mxu3 %v3519_v52  ;;  %v3358_v48 = vld [vmem:[#allocation2 + $0x28] sm:$0xff]  ;;  %v3461_v38 = vld [vmem:[%s6313_s3 + $0x218] sm:$0xff]  ;;  %v3478_v39 = vld [vmem:[%s6313_s3 + $0x2a0] sm:$0xff] }
 0x464   : > { %3609 = vmatpush.msrb.mxu0 %v3470_v42  ;;  %3628 = vmatpush.msrb.mxu1 %v3487_v43  ;;  %v3492_v17 = vld [vmem:[%s6313_s3 + $0x310] sm:$0xff]  ;;  %v3356_v63 = vld [vmem:[#allocation2 + $0x8] sm:$0xff]  ;;  %v3359_v58 = vld [vmem:[#allocation2 + $0x38] sm:$0xff]  ;;  %v3384_v52 = vadd.f32 %v3368_v37, %v3358_v48  ;;  %v3367_v42 = vperm.slane %v6113_v46, 5 }
 0x465   : > { %3650 = vmatpush.msrb.mxu2 %v3501_v44  ;;  %3669 = vmatpush.msrb.mxu3 %v3518_v8  ;;  %v3509_v53 = vld [vmem:[%s6313_s3 + $0x398] sm:$0xff]  ;;  %v3460_v43 = vld [vmem:[%s6313_s3 + $0x210] sm:$0xff]  ;;  %v3357_v8 = vld [vmem:[#allocation2 + $0x20] sm:$0xff] }
 0x466   : > { %3610 = vmatpush.msrb.mxu0 %v3469_v3  ;;  %3629 = vmatpush.msrb.mxu1 %v3486_v20  ;;  %v3477_v44 = vld [vmem:[%s6313_s3 + $0x298] sm:$0xff]  ;;  %v3491_v3 = vld [vmem:[%s6313_s3 + $0x308] sm:$0xff]  ;;  %v3508_v20 = vld [vmem:[%s6313_s3 + $0x390] sm:$0xff] }
 0x467   : > { %3651 = vmatpush.msrb.mxu2 %v3500_v12  ;;  %3670 = vmatpush.msrb.mxu3 %v3517_v4  ;;  %v3382_v12 = vadd.f32 %v3366_v40, %v3356_v63  ;;  %v3385_v4 = vadd.f32 %v3369_v21, %v3359_v58  ;;  %v3490_v46 = vld [vmem:[%s6313_s3 + $0x300] sm:$0xff]  ;;  %v3693_v33 = vld [vmem:[%s6315_s5 + $0x30] sm:$0xff]  ;;  %v3692_v29 = vld [vmem:[%s6315_s5 + $0x28] sm:$0xff] }
 0x468   : > { %3611 = vmatpush.msrb.mxu0 %v3468_v57  ;;  %3630 = vmatpush.msrb.mxu1 %v3485_v56  ;;  %v3459_v57 = vld [vmem:[%s6313_s3 + $0x208] sm:$0xff]  ;;  %v3476_v56 = vld [vmem:[%s6313_s3 + $0x290] sm:$0xff]  ;;  %v3699_v27 = vld [vmem:[%s6315_s5 + $0x60] sm:$0xf] }
 0x469   : > { %3652 = vmatpush.msrb.mxu2 %v3499_v47  ;;  %3671 = vmatpush.msrb.mxu3 %v3516_v59  ;;  %v3507_v47 = vld [vmem:[%s6313_s3 + $0x388] sm:$0xff]  ;;  %v3392_v59 = vmax.f32 %v3384_v52, 0.0  ;;  %v3393_v51 = vmax.f32 %v3385_v4, 0.0  ;;  %v3695_v26 = vld [vmem:[%s6315_s5 + $0x40] sm:$0xff]  ;;  %v3690_v60 = vld [vmem:[%s6315_s5 + $0x18] sm:$0xff] }
 0x46a   : > { %3612 = vmatpush.msrb.mxu0 %v3467_v23  ;;  %3631 = vmatpush.msrb.mxu1 %v3484_v16  ;;  %v3383_v23 = vadd.f32 %v3367_v42, %v3357_v8  ;;  %v3458_v16 = vld [vmem:[%s6313_s3 + $0x200] sm:$0xff]  ;;  %v3689_v61 = vld [vmem:[%s6315_s5 + $0x10] sm:$0xff]  ;;  %v3734_v15 = vld [vmem:[%s6317_s7 + $0x8] sm:$0x3] }
 0x46b   : > { %3653 = vmatpush.msrb.mxu2 %v3498_v5  ;;  %3672 = vmatpush.msrb.mxu3 %v3515_v2  ;;  %v3475_v5 = vld [vmem:[%s6313_s3 + $0x288] sm:$0xff]  ;;  %v3506_v2 = vld [vmem:[%s6313_s3 + $0x380] sm:$0xff] }
 0x46c   : > { %3613 = vmatpush.msrb.mxu0 %v3466_v50  ;;  %3632 = vmatpush.msrb.mxu1 %v3483_v45  ;;  %v3390_v50 = vmax.f32 %v3382_v12, 0.0  ;;  %v3474_v45 = vld [vmem:[%s6313_s3 + $0x280] sm:$0xff] }
 0x46d   : > { %3654 = vmatpush.msrb.mxu2 %v3497_v19  ;;  %3673 = vmatpush.msrb.mxu3 %v3514_v54  ;;  %v3391_v19 = vmax.f32 %v3383_v23, 0.0  ;;  %v3698_v54 = vld [vmem:[%s6315_s5 + $0x58] sm:$0xff]  ;;  %v3733_v48 = vld [vmem:[%s6317_s7] sm:$0xff] }
 0x46e   : > { %3614 = vmatpush.msrb.mxu0 %v3465_v18  ;;  %3633 = vmatpush.msrb.mxu1 %v3482_v55  ;;  %v3697_v18 = vld [vmem:[%s6315_s5 + $0x50] sm:$0xff]  ;;  %v3696_v55 = vld [vmem:[%s6315_s5 + $0x48] sm:$0xff] }
 0x46f   : > { %3655 = vmatpush.msrb.mxu2 %v3496_v32  ;;  %3674 = vmatpush.msrb.mxu3 %v3513_v30  ;;  %v3694_v32 = vld [vmem:[%s6315_s5 + $0x38] sm:$0xff]  ;;  %v3691_v30 = vld [vmem:[%s6315_s5 + $0x20] sm:$0xff] }
 0x470   : > { %3615 = vmatpush.msrb.mxu0 %v3464_v14  ;;  %3634 = vmatpush.msrb.mxu1 %v3481_v62  ;;  %v3688_v14 = vld [vmem:[%s6315_s5 + $0x8] sm:$0xff]  ;;  %v3687_v62 = vld [vmem:[%s6315_s5] sm:$0xff] }
 0x471   : > { %3656 = vmatpush.msrb.mxu2 %v3495_v1  ;;  %3675 = vmatpush.msrb.mxu3 %v3512_v7  ;;  %v3999_v1 = vld [vmem:[#allocation7] ss:$0 sm:$0xff] }
 0x472   : > { %3616 = vmatpush.msrb.mxu0 %v3463_v49  ;;  %3635 = vmatpush.msrb.mxu1 %v3480_v13 }
 0x473   : > { %3657 = vmatpush.msrb.mxu2 %v3494_v24  ;;  %3676 = vmatpush.msrb.mxu3 %v3511_v25 }
 0x474   : > { %3582 = vmatmul.f32.vlgmr.msra.gmra.mxu2 %v3388_v28  ;;  %3617 = vmatpush.msrb.mxu0 %v3462_v31 }
 0x475   : > { %3636 = vmatpush.msrb.mxu1 %v3479_v34  ;;  %3658 = vmatpush.msrb.mxu2 %v3493_v35 }
 0x476   : > { %3677 = vmatpush.msrb.mxu3 %v3510_v11  ;;  %3542 = vmatmul.f32.vlgmr.msra.gmra.mxu0 %v3386_v36 }
 0x477   : > { %3602 = vmatmul.f32.vlgmr.msra.gmra.mxu3 %v3389_v6  ;;  %3618 = vmatpush.msrb.mxu0 %v3461_v38  ;;  %v4000_v38 = vld [vmem:[#allocation8] ss:$0 sm:$0xff] }
 0x478   : > { %3637 = vmatpush.msrb.mxu1 %v3478_v39  ;;  %3659 = vmatpush.msrb.mxu2 %v3492_v17  ;;  %v4001_v17 = vld [vmem:[#allocation10] ss:$0 sm:$0xff] }
 0x479   : > { %3678 = vmatpush.msrb.mxu3 %v3509_v53  ;;  %3562 = vmatmul.f32.vlgmr.msra.gmra.mxu1 %v3387_v41 }
 0x47a   : > { %3619 = vmatpush.msrb.mxu0 %v3460_v43  ;;  %3638 = vmatpush.msrb.mxu1 %v3477_v44 }
 0x47b   : > { %3660 = vmatpush.msrb.mxu2 %v3491_v3  ;;  %3679 = vmatpush.msrb.mxu3 %v3508_v20 }
 0x47c   : > { %3620 = vmatpush.msrb.mxu0 %v3459_v57  ;;  %3639 = vmatpush.msrb.mxu1 %v3476_v56 }
 0x47d   : > { %3661 = vmatpush.msrb.mxu2 %v3490_v46  ;;  %3680 = vmatpush.msrb.mxu3 %v3507_v47 }
 0x47e   : > { %3662 = vmatmul.f32.vlgmr.msrb.gmra.mxu2 %v3392_v59  ;;  %3621 = vmatpush.msrb.mxu0 %v3458_v16 }
 0x47f   : > { %3640 = vmatpush.msrb.mxu1 %v3475_v5  ;;  %3681 = vmatpush.msrb.mxu3 %v3506_v2 }
 0x480   : > { %3622 = vmatmul.f32.vlgmr.msrb.gmra.mxu0 %v3390_v50  ;;  %3682 = vmatmul.f32.vlgmr.msrb.gmra.mxu3 %v3393_v51 }
 0x481   : > { %3641 = vmatpush.msrb.mxu1 %v3474_v45  ;;  %3875 = vmatpush.msk.msra.mxu0 %vm3708_vm0, %v3699_v27 }
 0x482   : > { %3642 = vmatmul.f32.vlgmr.msrb.gmra.mxu1 %v3391_v19 }
 0x483   : > { %3716 = vmatpush.msra.mxu0 %v3698_v54  ;;  %3877 = vmatpush.msk.msra.mxu1 %vm3743_vm1, %v3734_v15 }
 0x485   : > { %3717 = vmatpush.msra.mxu0 %v3697_v18  ;;  %3762 = vmatpush.msra.mxu1 %v3733_v48 }
 0x487   : > { %3718 = vmatpush.msra.mxu0 %v3696_v55 }
 0x489   : > { %3719 = vmatpush.msra.mxu0 %v3695_v26 }
 0x48b   : > { %3720 = vmatpush.msra.mxu0 %v3694_v32 }
 0x48d   : > { %3721 = vmatpush.msra.mxu0 %v3693_v33 }
 0x48f   : > { %3722 = vmatpush.msra.mxu0 %v3692_v29 }
 0x491   : > { %3723 = vmatpush.msra.mxu0 %v3691_v30 }
 0x493   : > { %3724 = vmatpush.msra.mxu0 %v3690_v60 }
 0x495   : > { %3725 = vmatpush.msra.mxu0 %v3689_v61 }
 0x497   : > { %3726 = vmatpush.msra.mxu0 %v3688_v14 }
 0x499   : > { %3727 = vmatpush.msra.mxu0 %v3687_v62 }
 0x4f3   : > { %v3543_v7 = vpop.f32.mrf.mxu0 }
 0x4f4   : > { %v3544_v9 = vadd.f32 %v3999_v1, %v3543_v7 }
 0x4f6   : > { %v3563_v10 = vpop.f32.mrf.mxu1 }
 0x4f7   : > { %v3564_v49 = vadd.f32 %v3563_v10, %v3544_v9  ;;  %v3583_v13 = vpop.f32.mrf.mxu2 }
 0x4f9   : > { %v3584_v22 = vadd.f32 %v3583_v13, %v3564_v49 }
 0x4fa   : > { %v3603_v24 = vpop.f32.mrf.mxu3 }
 0x4fb   : > { %v3604_v25 = vadd.f32 %v3603_v24, %v3584_v22 }
 0x4fd   : > { %v3623_v28 = vpop.f32.mrf.mxu0 }
 0x4fe   : > { %v3624_v31 = vadd.f32 %v3623_v28, %v3604_v25 }
 0x4ff   : > { %v3643_v0 = vpop.f32.mrf.mxu1 }
 0x500   : > { %v3644_v34 = vadd.f32 %v3643_v0, %v3624_v31 }
 0x501   : > { %v3663_v35 = vpop.f32.mrf.mxu2 }
 0x502   : > { %v3664_v36 = vadd.f32 %v3663_v35, %v3644_v34 }
 0x503   : > { %v3683_v37 = vpop.f32.mrf.mxu3 }
 0x504   : > { %v3684_v11 = vadd.f32 %v3683_v37, %v3664_v36 }
 0x506   : > { %v3686_v6 = vmax.f32 %v3684_v11, 0.0 }
 0x508   : > { %3876 = vmatmul.msk.f32.vlgmr.msra.gmra.mxu0 %vm3704_vm2, %v3686_v6 }
 0x585   : > { %v3729_v39 = vpop.f32.mrf.mxu0 }
 0x586   : > { %v3730_v40 = vadd.f32 %v4000_v38, %v3729_v39 }
 0x588   : > { %v3732_v21 = vmax.f32 %v3730_v40, 0.0 }
 0x58a   : > { %3878 = vmatmul.msk.f32.vlgmr.msra.gmra.mxu1 %vm3739_vm3, %v3732_v21 }
 0x607   : > { %v3764_v41 = vpop.f32.mrf.mxu1 }
 0x608   : > { %v3765_v63 = vadd.f32 %v4001_v17, %v3764_v41 }
 0x60a   : > { %3768 = vst.msk [vmem:[%s6319_s9] sm:$0xff] %vm3767_vm4, %v3765_v63 }
 0x60b PF: > { %p21_p4 = scmp.ge.s32.totalorder %s4318_s22, 6   ;;  %s6326_s30 = smov %s4186_s10 }
 0x60c   : > { %s6327_s10 = smov %s4190_s11  ;;  %s6328_s11 = smov %s4329_s28 }
 0x60d   : > { %s6329_s12 = smov %s4318_s22  ;;  %23 = sbr.rel (!%p21_p4) target bundleno = 7 (0x7), region = 119 }
 0x612   :  { %3780 = vsyncpa [#allocation4], 1 }
 0x613   :  { %3782 = vsyncpa [#allocation4 + $0x1], 1 }
 0x614   :  { %3783 = vsyncpa [#allocation6], 1 }
 0x615   :  { %3784 = vsyncpa [#allocation9], 1 }

</bundles_post_ra>
